<compile_context>
chip_gen: v7x
topology: tpu7x:2x2x1
jax: 0.10.0
libtpu: 0.0.40
codegen_flags: <defaults>
</compile_context>

<pallas_src>
import functools

import jax
import jax.numpy as jnp
from jax import lax
from jax.experimental import pallas as pl
from jax.experimental.pallas import tpu as pltpu


def _local_attention_kernel(x_ref, w_ref, bqkv_ref, out_ref, probs_ref,
                            *, num_heads, head_dim, num_instances):
    C = num_heads * head_dim
    x = x_ref[0]                          # (C+1, N) f32, channels-first (+ ones row)
    N = x.shape[-1]

    # ---- fused 1x1 convs: [instance(+bias) ; Q ; K ; V] in ONE MXU matmul ----
    # rows [0:I): instance logits incl. bias (ones row of x * bias column of w)
    # rows [I:I+3C): bias-free Q/K/V projections of the *unmasked* features
    # (hoist identity: (x*mask) @ W == mask * (x @ W); bias added post-mask).
    proj = jnp.dot(w_ref[...], x, preferred_element_type=jnp.float32)  # (I+3C, N)

    # instance softmax over the instance axis (logits unbounded -> keep max).
    logits = proj[0:num_instances, :]                                  # (I, N)
    logits = logits - jnp.max(logits, axis=0, keepdims=True)
    e = jnp.exp(logits)
    probs_ref[...] = e * (1.0 / jnp.sum(e, axis=0, keepdims=True))     # (I, N)

    xqkv = proj[num_instances:, :]                                     # (3C, N)
    # hoisted loop-invariant bias broadcast (JAX does not CSE broadcast_in_dim)
    bqkv_b = jnp.broadcast_to(bqkv_ref[...], (3 * C, N))               # (3C, N)

    scale = 1.0 / (head_dim ** 0.5)
    eps2 = 1e-24                          # (PyTorch F.normalize eps=1e-12)^2
    ones_row = jnp.ones((num_heads, 1, N), jnp.float32)

    def body(i, acc):
        mask = probs_ref[pl.ds(i, 1), :]                               # (1, N)
        qkv = xqkv * mask + bqkv_b                                     # (3C, N)
        q = qkv[0:C, :]
        k = qkv[C:2 * C, :]
        v = qkv[2 * C:3 * C, :]

        # F.normalize(dim=-1): per-channel L2 norm over spatial positions;
        # commutes with the head split.  rsqrt (EUP) instead of sqrt+divide;
        # the 1/sqrt(head_dim) score scale is folded into qn.
        qinv = scale * lax.rsqrt(jnp.maximum(
            jnp.sum(q * q, axis=-1, keepdims=True), eps2))             # (C, 1)
        kinv = lax.rsqrt(jnp.maximum(
            jnp.sum(k * k, axis=-1, keepdims=True), eps2))             # (C, 1)
        qn = q * qinv
        kn = k * kinv

        qh = qn.reshape(num_heads, head_dim, N)
        kh = kn.reshape(num_heads, head_dim, N)
        vh = v.reshape(num_heads, head_dim, N)

        # scores[h, i, j] = sum_c qh[h, c, i] * kh[h, c, j]  (head-batched)
        scores = lax.dot_general(
            qh, kh, (((1,), (1,)), ((0,), (0,))),
            preferred_element_type=jnp.float32)                        # (H, N, N)
        # |scores| <= sqrt(head_dim): exponentiate directly, no row-max pass.
        es = jnp.exp(scores)                                           # (H, N, N)

        # Fuse the softmax denominator into the PV matmul: the appended ones
        # row of vh_aug yields the per-query row-sum of es on the MXU.
        vh_aug = jnp.concatenate([vh, ones_row], axis=1)               # (H, hd+1, N)
        num_den = lax.dot_general(
            vh_aug, es, (((2,), (2,)), ((0,), (0,))),
            preferred_element_type=jnp.float32)                        # (H, hd+1, N)
        numer = num_den[:, :head_dim, :]                               # (H, hd, N)
        denom = num_den[:, head_dim:, :]                               # (H, 1, N)
        attended = numer * (1.0 / denom)                               # (H, hd, N)

        return acc + attended.reshape(C, N) * mask

    acc = lax.fori_loop(0, num_instances, body,
                        jnp.zeros((C, N), jnp.float32))
    out_ref[0] = acc


def local_attention(x_nchw, params, *, num_instances=8, num_heads=4):
    """params = (wi, bi, wq, bq, wk, bk, wv, bv) with conv weights (C_out, C_in)
    and biases (C_out,), matching nn.Conv2d(kernel_size=1)."""
    B, C, H, W = x_nchw.shape
    N = H * W
    head_dim = C // num_heads
    wi, bi, wq, bq, wk, bk, wv, bv = params

    # NCHW -> (B, C, N) is a free reshape; append a ones row so the instance
    # bias rides on the fused projection matmul.
    x = x_nchw.reshape(B, C, N)
    x_aug = jnp.concatenate([x, jnp.ones((B, 1, N), x.dtype)], axis=1)  # (B, C+1, N)

    # Fuse all four 1x1 convs into one weight.  Instance rows carry their bias
    # in the extra column; Q/K/V rows get a zero column (their bias must be
    # added after masking) and their bias is passed separately.
    w_inst = jnp.concatenate([wi, bi[:, None]], axis=1)                 # (I, C+1)
    w_qkv = jnp.concatenate(
        [jnp.concatenate([wq, wk, wv], axis=0),
         jnp.zeros((3 * C, 1), jnp.float32)], axis=1)                   # (3C, C+1)
    w_all = jnp.concatenate([w_inst, w_qkv], axis=0)                    # (I+3C, C+1)
    bqkv = jnp.concatenate([bq, bk, bv], axis=0)[:, None]               # (3C, 1)

    kernel = functools.partial(_local_attention_kernel,
                               num_heads=num_heads,
                               head_dim=head_dim,
                               num_instances=num_instances)

    out = pl.pallas_call(
        kernel,
        out_shape=jax.ShapeDtypeStruct((B, C, N), jnp.float32),
        grid_spec=pltpu.PrefetchScalarGridSpec(
            num_scalar_prefetch=0,
            grid=(B,),
            in_specs=[
                pl.BlockSpec((1, C + 1, N), lambda b: (b, 0, 0)),
                pl.BlockSpec(w_all.shape, lambda b: (0, 0)),
                pl.BlockSpec(bqkv.shape, lambda b: (0, 0)),
            ],
            out_specs=pl.BlockSpec((1, C, N), lambda b: (b, 0, 0)),
            scratch_shapes=[pltpu.VMEM((num_instances, N), jnp.float32)],
        ),
        compiler_params=pltpu.CompilerParams(
            dimension_semantics=("parallel",)),   # B shards across v7x's 2 TCs
    )(x_aug, w_all, bqkv)

    # (B, C, N) -> NCHW: free reshape.
    return out.reshape(B, C, H, W)


def local_attention_reference(x_nchw, params, *, num_instances=8, num_heads=4):
    """Pure-JAX reference mirroring the PyTorch forward, for validation."""
    wi, bi, wq, bq, wk, bk, wv, bv = params
    B, C, H, W = x_nchw.shape
    N = H * W
    head_dim = C // num_heads
    x = x_nchw.reshape(B, C, N)

    inst = jnp.einsum('oc,bcn->bon', wi, x) + bi[None, :, None]
    probs = jax.nn.softmax(inst, axis=1)                          # (B, I, N)

    out = jnp.zeros((B, C, N), jnp.float32)
    for i in range(num_instances):
        mask = probs[:, i:i + 1, :]                               # (B, 1, N)
        xf = x * mask
        q = (jnp.einsum('oc,bcn->bon', wq, xf)
             + bq[None, :, None]).reshape(B, num_heads, head_dim, N)
        k = (jnp.einsum('oc,bcn->bon', wk, xf)
             + bk[None, :, None]).reshape(B, num_heads, head_dim, N)
        v = (jnp.einsum('oc,bcn->bon', wv, xf)
             + bv[None, :, None]).reshape(B, num_heads, head_dim, N)

        def norm(t):
            n = jnp.sqrt(jnp.sum(t * t, axis=-1, keepdims=True))
            return t / jnp.maximum(n, 1e-12)

        qn, kn = norm(q), norm(k)
        scores = jnp.einsum('bhci,bhcj->bhij', qn, kn) / (head_dim ** 0.5)
        attn = jax.nn.softmax(scores, axis=-1)
        att = jnp.einsum('bhij,bhcj->bhci', attn, v).reshape(B, C, N)
        out = out + att * mask
    return out.reshape(B, C, H, W)


if __name__ == "__main__":
    B, C, H, W = 2, 32, 16, 16
    NUM_INSTANCES, NUM_HEADS = 8, 4

    key = jax.random.PRNGKey(0)
    ks = jax.random.split(key, 9)
    x = jax.random.normal(ks[0], (B, C, H, W), jnp.float32)

    # deterministic synthetic 1x1-conv parameters: weight (C_out, C_in), bias (C_out,)
    wi = 0.2 * jax.random.normal(ks[1], (NUM_INSTANCES, C), jnp.float32)
    bi = 0.1 * jax.random.normal(ks[2], (NUM_INSTANCES,), jnp.float32)
    wq = 0.2 * jax.random.normal(ks[3], (C, C), jnp.float32)
    bq = 0.1 * jax.random.normal(ks[4], (C,), jnp.float32)
    wk = 0.2 * jax.random.normal(ks[5], (C, C), jnp.float32)
    bk = 0.1 * jax.random.normal(ks[6], (C,), jnp.float32)
    wv = 0.2 * jax.random.normal(ks[7], (C, C), jnp.float32)
    bv = 0.1 * jax.random.normal(ks[8], (C,), jnp.float32)
    params = (wi, bi, wq, bq, wk, bk, wv, bv)

    out = local_attention(x, params,
                          num_instances=NUM_INSTANCES, num_heads=NUM_HEADS)
    out = jax.block_until_ready(out)

    ref = local_attention_reference(x, params,
                                    num_instances=NUM_INSTANCES,
                                    num_heads=NUM_HEADS)
    ref = jax.block_until_ready(ref)

    assert out.shape == (B, C, H, W)
    assert jnp.allclose(out, ref, rtol=1e-4, atol=1e-4), "mismatch vs reference"
    print("KERNEL_OK")
</pallas_src>

<mosaic_0001>
module attributes {stable_mosaic.version = 11 : i64} {
  func.func @_local_attention_kernel(%arg0: i32, %arg1: memref<1x33x256xf32, #tpu.memory_space<vmem>>, %arg2: memref<104x33xf32, #tpu.memory_space<vmem>>, %arg3: memref<96x1xf32, #tpu.memory_space<vmem>>, %arg4: memref<1x32x256xf32, #tpu.memory_space<vmem>>, %arg5: memref<8x256xf32, #tpu.memory_space<vmem>>) attributes {dimension_semantics = [#tpu.dimension_semantics<parallel>], iteration_bounds = array<i64: 2>, scalar_prefetch = 0 : i64, scratch_operands = 1 : i64, tpu.core_type = #tpu.core_type<tc>, window_params = [{transform_indices = @transform_0, window_bounds = array<i64: 1, 33, 256>}, {pipeline_mode = #tpu.pipeline_mode<synchronous>, transform_indices = @transform_1, window_bounds = array<i64: 104, 33>}, {pipeline_mode = #tpu.pipeline_mode<synchronous>, transform_indices = @transform_2, window_bounds = array<i64: 96, 1>}, {transform_indices = @transform_3, window_bounds = array<i64: 1, 32, 256>}]} {
    %c0 = arith.constant 0 : index
    %c0_0 = arith.constant 0 : index
    %c0_1 = arith.constant 0 : index
    %0 = vector.load %arg1[%c0, %c0_0, %c0_1] : memref<1x33x256xf32, #tpu.memory_space<vmem>>, vector<1x33x256xf32>
    %1 = vector.shape_cast %0 : vector<1x33x256xf32> to vector<33x256xf32>
    %c0_2 = arith.constant 0 : index
    %c0_3 = arith.constant 0 : index
    %2 = vector.load %arg2[%c0_2, %c0_3] : memref<104x33xf32, #tpu.memory_space<vmem>>, vector<104x33xf32>
    %cst = arith.constant dense<0.000000e+00> : vector<104x256xf32>
    %3 = tpu.matmul %2, %1, %cst {dimension_numbers = #tpu.dot_dimension_numbers<[1], [0], [0], [1], [0, 0, 1, 1], [], []>} : vector<104x33xf32>, vector<33x256xf32>, vector<104x256xf32> -> vector<104x256xf32>
    %4 = vector.extract_strided_slice %3 {offsets = [0, 0], sizes = [8, 256], strides = [1, 1]} : vector<104x256xf32> to vector<8x256xf32>
    %cst_4 = arith.constant dense<0xFF800000> : vector<256xf32>
    %5 = vector.multi_reduction <maximumf>, %4, %cst_4 [0] : vector<8x256xf32> to vector<256xf32>
    %6 = vector.shape_cast %5 : vector<256xf32> to vector<1x256xf32>
    %7 = vector.broadcast %6 : vector<1x256xf32> to vector<8x256xf32>
    %8 = arith.subf %4, %7 : vector<8x256xf32>
    %9 = math.exp %8 : vector<8x256xf32>
    %cst_5 = arith.constant dense<0.000000e+00> : vector<256xf32>
    %10 = vector.multi_reduction <add>, %9, %cst_5 [0] : vector<8x256xf32> to vector<256xf32>
    %11 = vector.shape_cast %10 : vector<256xf32> to vector<1x256xf32>
    %cst_6 = arith.constant 1.000000e+00 : f32
    %12 = vector.broadcast %cst_6 : f32 to vector<1x256xf32>
    %13 = arith.divf %12, %11 : vector<1x256xf32>
    %14 = vector.broadcast %13 : vector<1x256xf32> to vector<8x256xf32>
    %15 = arith.mulf %9, %14 : vector<8x256xf32>
    %c0_7 = arith.constant 0 : index
    %c0_8 = arith.constant 0 : index
    %16 = vector.load %arg5[%c0_7, %c0_8] : memref<8x256xf32, #tpu.memory_space<vmem>>, vector<8x256xf32>
    tpu.vector_store %arg5[%c0_7, %c0_8], %15 {strides = array<i32>} : memref<8x256xf32, #tpu.memory_space<vmem>>, vector<8x256xf32>,
    %17 = vector.extract_strided_slice %3 {offsets = [8, 0], sizes = [96, 256], strides = [1, 1]} : vector<104x256xf32> to vector<96x256xf32>
    %c0_9 = arith.constant 0 : index
    %c0_10 = arith.constant 0 : index
    %18 = vector.load %arg3[%c0_9, %c0_10] : memref<96x1xf32, #tpu.memory_space<vmem>>, vector<96x1xf32>
    %19 = vector.shape_cast %18 : vector<96x1xf32> to vector<96x1xf32>
    %20 = vector.broadcast %19 : vector<96x1xf32> to vector<96x256xf32>
    %cst_11 = arith.constant 1.000000e+00 : f32
    %21 = vector.broadcast %cst_11 : f32 to vector<4x1x256xf32>
    %cst_12 = arith.constant 0.000000e+00 : f32
    %22 = vector.broadcast %cst_12 : f32 to vector<32x256xf32>
    %c0_i32 = arith.constant 0 : i32
    %c8_i32 = arith.constant 8 : i32
    %23 = arith.addi %c0_i32, %c8_i32 : i32
    %c1_i32 = arith.constant 1 : i32
    %24 = scf.for %arg6 = %c0_i32 to %23 step %c1_i32 iter_args(%arg7 = %22) -> (vector<32x256xf32>)  : i32 {
      %28 = arith.index_cast %arg6 : i32 to index
      %c0_17 = arith.constant 0 : index
      %29 = vector.load %arg5[%28, %c0_17] : memref<8x256xf32, #tpu.memory_space<vmem>>, vector<1x256xf32>
      %30 = vector.broadcast %29 : vector<1x256xf32> to vector<96x256xf32>
      %31 = arith.mulf %17, %30 : vector<96x256xf32>
      %32 = arith.addf %31, %20 : vector<96x256xf32>
      %33 = vector.extract_strided_slice %32 {offsets = [0, 0], sizes = [32, 256], strides = [1, 1]} : vector<96x256xf32> to vector<32x256xf32>
      %34 = vector.extract_strided_slice %32 {offsets = [32, 0], sizes = [32, 256], strides = [1, 1]} : vector<96x256xf32> to vector<32x256xf32>
      %35 = vector.extract_strided_slice %32 {offsets = [64, 0], sizes = [32, 256], strides = [1, 1]} : vector<96x256xf32> to vector<32x256xf32>
      %36 = arith.mulf %33, %33 : vector<32x256xf32>
      %cst_18 = arith.constant dense<0.000000e+00> : vector<32xf32>
      %37 = vector.multi_reduction <add>, %36, %cst_18 [1] : vector<32x256xf32> to vector<32xf32>
      %38 = vector.shape_cast %37 : vector<32xf32> to vector<32x1xf32>
      %cst_19 = arith.constant 1.000000e-24 : f32
      %39 = vector.broadcast %cst_19 : f32 to vector<32x1xf32>
      %40 = arith.maximumf %38, %39 : vector<32x1xf32>
      %41 = math.rsqrt %40 : vector<32x1xf32>
      %cst_20 = arith.constant 0.353553385 : f32
      %42 = vector.broadcast %cst_20 : f32 to vector<32x1xf32>
      %43 = arith.mulf %42, %41 : vector<32x1xf32>
      %44 = arith.mulf %34, %34 : vector<32x256xf32>
      %cst_21 = arith.constant dense<0.000000e+00> : vector<32xf32>
      %45 = vector.multi_reduction <add>, %44, %cst_21 [1] : vector<32x256xf32> to vector<32xf32>
      %46 = vector.shape_cast %45 : vector<32xf32> to vector<32x1xf32>
      %cst_22 = arith.constant 1.000000e-24 : f32
      %47 = vector.broadcast %cst_22 : f32 to vector<32x1xf32>
      %48 = arith.maximumf %46, %47 : vector<32x1xf32>
      %49 = math.rsqrt %48 : vector<32x1xf32>
      %50 = vector.broadcast %43 : vector<32x1xf32> to vector<32x256xf32>
      %51 = arith.mulf %33, %50 : vector<32x256xf32>
      %52 = vector.broadcast %49 : vector<32x1xf32> to vector<32x256xf32>
      %53 = arith.mulf %34, %52 : vector<32x256xf32>
      %54 = vector.shape_cast %51 : vector<32x256xf32> to vector<4x8x256xf32>
      %55 = vector.shape_cast %53 : vector<32x256xf32> to vector<4x8x256xf32>
      %56 = vector.shape_cast %35 : vector<32x256xf32> to vector<4x8x256xf32>
      %cst_23 = arith.constant dense<0.000000e+00> : vector<4x256x256xf32>
      %57 = tpu.matmul %54, %55, %cst_23 {dimension_numbers = #tpu.dot_dimension_numbers<[1], [1], [2], [2], [0, 0, 0, 2, 1, 2], [0], [0]>} : vector<4x8x256xf32>, vector<4x8x256xf32>, vector<4x256x256xf32> -> vector<4x256x256xf32>
      %58 = math.exp %57 : vector<4x256x256xf32>
      %59 = tpu.concatenate %56, %21 in 1 : vector<4x8x256xf32>, vector<4x1x256xf32> -> vector<4x9x256xf32>
      %cst_24 = arith.constant dense<0.000000e+00> : vector<4x9x256xf32>
      %60 = tpu.matmul %59, %58, %cst_24 {dimension_numbers = #tpu.dot_dimension_numbers<[2], [2], [1], [1], [0, 0, 0, 1, 1, 1], [0], [0]>} : vector<4x9x256xf32>, vector<4x256x256xf32>, vector<4x9x256xf32> -> vector<4x9x256xf32>
      %61 = vector.extract_strided_slice %60 {offsets = [0, 0, 0], sizes = [4, 8, 256], strides = [1, 1, 1]} : vector<4x9x256xf32> to vector<4x8x256xf32>
      %62 = vector.extract_strided_slice %60 {offsets = [0, 8, 0], sizes = [4, 1, 256], strides = [1, 1, 1]} : vector<4x9x256xf32> to vector<4x1x256xf32>
      %cst_25 = arith.constant 1.000000e+00 : f32
      %63 = vector.broadcast %cst_25 : f32 to vector<4x1x256xf32>
      %64 = arith.divf %63, %62 : vector<4x1x256xf32>
      %65 = vector.broadcast %64 : vector<4x1x256xf32> to vector<4x8x256xf32>
      %66 = arith.mulf %61, %65 : vector<4x8x256xf32>
      %67 = vector.shape_cast %66 : vector<4x8x256xf32> to vector<32x256xf32>
      %68 = vector.broadcast %29 : vector<1x256xf32> to vector<32x256xf32>
      %69 = arith.mulf %67, %68 : vector<32x256xf32>
      %70 = arith.addf %arg7, %69 : vector<32x256xf32>
      scf.yield %70 : vector<32x256xf32>
    }
    %c8_i32_13 = arith.constant 8 : i32
    %c0_14 = arith.constant 0 : index
    %c0_15 = arith.constant 0 : index
    %c0_16 = arith.constant 0 : index
    %25 = vector.load %arg4[%c0_14, %c0_15, %c0_16] : memref<1x32x256xf32, #tpu.memory_space<vmem>>, vector<1x32x256xf32>
    %26 = vector.shape_cast %25 : vector<1x32x256xf32> to vector<32x256xf32>
    %27 = vector.shape_cast %24 : vector<32x256xf32> to vector<1x32x256xf32>
    tpu.vector_store %arg4[%c0_14, %c0_15, %c0_16], %27 {strides = array<i32>} : memref<1x32x256xf32, #tpu.memory_space<vmem>>, vector<1x32x256xf32>,
    return
  }
  func.func @transform_0(%arg0: i32) -> (i32, i32, i32) {
    %c0_i32 = arith.constant 0 : i32
    %c0_i32_0 = arith.constant 0 : i32
    %c0_i32_1 = arith.constant 0 : i32
    return %arg0, %c0_i32, %c0_i32_0 : i32, i32, i32
  }
  func.func @transform_1(%arg0: i32) -> (i32, i32) {
    %c0_i32 = arith.constant 0 : i32
    %c0_i32_0 = arith.constant 0 : i32
    %c0_i32_1 = arith.constant 0 : i32
    return %c0_i32, %c0_i32_0 : i32, i32
  }
  func.func @transform_2(%arg0: i32) -> (i32, i32) {
    %c0_i32 = arith.constant 0 : i32
    %c0_i32_0 = arith.constant 0 : i32
    %c0_i32_1 = arith.constant 0 : i32
    return %c0_i32, %c0_i32_0 : i32, i32
  }
  func.func @transform_3(%arg0: i32) -> (i32, i32, i32) {
    %c0_i32 = arith.constant 0 : i32
    %c0_i32_0 = arith.constant 0 : i32
    %c0_i32_1 = arith.constant 0 : i32
    return %arg0, %c0_i32, %c0_i32_0 : i32, i32, i32
  }
}

</mosaic_0001>

<bundles_post_ra>
// kernel: tpu_custom_call.1
= control target key start
LH: loop header
LB: loop body
LE: loop exit
PB: predicated region body
PF: predicated region fallthrough
CT: control target
= control target key end

     0   :  { %8 = vsyncpa [#allocation4], 0  ;;  %s5444_s0 = inlined_call_operand.vmem [shape: f32[2,33,256], index: 0, kind: input, shape index: {}]   ;;  %s5445_s1 = inlined_call_operand.vmem [shape: f32[104,33], index: 1, kind: input, shape index: {}]   ;;  %s5446_s2 = inlined_call_operand.vmem [shape: f32[96,1], index: 2, kind: input, shape index: {}]   ;;  %s5447_s3 = inlined_call_operand.hbm [shape: f32[2,32,256], index: 3, kind: output, shape index: {}]  }
   0x1   :  { %10 = vsyncpa [#allocation4 + $0x1], 0  ;;  %s4590_s12 = smov 0   ;;  %s4592_s13 = smov 0  }
   0x2   :  { %s4594_s14 = smov 0   ;;  %s4596_s15 = smov 0  }
   0x3 LB: > { %s4611_s16 = sadd.s32 4294967295, %s4525_s15   ;;  %s3327_s17 = sadd.s32 4294967294, %s4525_s15   ;;  %s4525_s15 = sphi %s4596_s15, %s5489_s15   ;;  %s4521_s14 = sphi %s4594_s14, %s5488_s14   ;;  %s4517_s13 = sphi %s4592_s13, %s5487_s13   ;;  %s4513_s12 = sphi %s4590_s12, %s5486_s12  }
   0x4   : > { %s4615_s18 = sadd.s32 1, %s4525_s15   ;;  %s91_s19 = sadd.s32 1, %s4521_s14 }
   0x5   : > { %s88_s20 = ssub.s32 %s4525_s15, %s4615_s18  ;;  %p101_p0 = scmp.ne.s32.totalorder %s4521_s14, %s4517_s13 }
   0x6   : > { %p89_p1 = scmp.eq.s32.totalorder %s88_s20, 0  ;;  %p102_p2 = scmp.eq.s32.totalorder %s4611_s16, 1 }
   0x7   : > { %p107_p3 = scmp.ne.s32.totalorder %s4517_s13, %s4513_s12  ;;  %p108_p4 = scmp.eq.s32.totalorder %s3327_s17, 1 }
   0x8   : > { %s4626_s21 = scalar_select %p89_p1, %s4521_s14, %s91_s19  }
   0x9   : > { %p4628_p5 = por %p102_p2, %p101_p0  ;;  %p4632_p6 = por %p108_p4, %p107_p3 }
   0xa   : > { %p3330_p7 = scmp.ge.s32.totalorder %s4525_s15, 1  ;;  %p140_p8 = scmp.lt.s32.totalorder %s4525_s15, 3 }
   0xc   : > { %p141_p9 = pnand %p3330_p7, %p140_p8 }
   0xe   : > { %144 = sbr.rel (%p141_p9) target bundleno = 1465 (0x5b9), region = 32 }
  0x15   : > { %s161_s24 = sand.u32 1, %s4517_s13   ;;  %p164_p10 = scmp.lt.s32.totalorder %s4611_s16, 1  ;;  %v4563_v0 = vmov 0.0   ;;  %v4564_v1 = vmov 0   ;;  %v422_v2 = vld [vmem:[%s5446_s2 + $0x10] sm:$0xff]  ;;  %v420_v3 = vld [vmem:[%s5446_s2] sm:$0xff] }
  0x16   : > { %s4642_s25 = sshll.u32 %s161_s24, 6  ;;  %303 = vmatprep.mubr.f32.mxu0 %v4563_v0  ;;  %345 = vmatprep.mubr.f32.mxu1 %v4563_v0  ;;  %v423_v4 = vld [vmem:[%s5446_s2 + $0x18] sm:$0xff]  ;;  %v421_v5 = vld [vmem:[%s5446_s2 + $0x8] sm:$0xff]  ;;  %v424_v18 = vld [vmem:[%s5446_s2 + $0x20] sm:$0xff]  ;;  %vm232_vm0 = vcmask 1040384   ;;  %vm192_vm1 = vcmask 269312  }
  0x17   : > { %3874 = vset.pattern.permute.xlu1 %v4564_v1  ;;  %3873 = vset.pattern.permute.xlu0 %v4564_v1  ;;  %s165_s26 = scalar_select %p164_p10, %s4611_s16, 1  ;;  %v425_v17 = vld [vmem:[%s5446_s2 + $0x28] sm:$0xff]  ;;  %v427_v21 = vld [vmem:[%s5446_s2 + $0x38] sm:$0xff]  ;;  %v426_v22 = vld [vmem:[%s5446_s2 + $0x30] sm:$0xff] }
  0x18   : > { %444 = vperm.xlu1 %3874, %v422_v2   ;;  %434 = vperm.xlu0 %3873, %v420_v3   ;;  %v179_v24 = vld [vmem:[%s5445_s1] sm:$0xff]  ;;  %v186_v25 = vld [vmem:[%s5445_s1 + $0x38] sm:$0xff]  ;;  %v429_v26 = vld [vmem:[%s5446_s2 + $0x48] sm:$0xff]  ;;  %s4838_s6 = scalar_lea.vmem [#allocation3], %s4642_s25  ;;  %s4856_s8 = smov 0  }
  0x19   : > { %s3755_s27 = smul.u32 80, %s165_s26  ;;  %v428_v27 = vld [vmem:[%s5446_s2 + $0x40] sm:$0xff]  ;;  %v180_v28 = vld [vmem:[%s5445_s1 + $0x8] sm:$0xff]  ;;  %v431_v30 = vld [vmem:[%s5446_s2 + $0x58] sm:$0xff] }
  0x1a   : > { %v187_v29 = vld [vmem:[%s5445_s1 + $0x40] sm:$0xff]  ;;  %v430_v31 = vld [vmem:[%s5446_s2 + $0x50] sm:$0xff]  ;;  %v188_v33 = vld [vmem:[%s5445_s1 + $0x48] sm:$0xff] }
  0x1b   : > { %s4656_s7 = scalar_lea.vmem %s5444_s0, %s3755_s27  ;;  %v181_v32 = vld [vmem:[%s5445_s1 + $0x10] sm:$0xff]  ;;  %v182_v34 = vld [vmem:[%s5445_s1 + $0x18] sm:$0xff]  ;;  %v183_v36 = vld [vmem:[%s5445_s1 + $0x20] sm:$0xff] }
  0x1c   : > { %v170_v6 = vld [vmem:[%s4656_s7 + $0x8] sm:$0xff]  ;;  %v172_v7 = vld [vmem:[%s4656_s7 + $0x18] sm:$0xff]  ;;  %v169_v8 = vld [vmem:[%s4656_s7] sm:$0xff]  ;;  %449 = vperm.xlu1 %3874, %v423_v4   ;;  %439 = vperm.xlu0 %3873, %v421_v5  }
  0x1d   : > { %v3485_v9 = vpack.c.bf16 %v172_v7, %v170_v6  ;;  %v171_v10 = vld [vmem:[%s4656_s7 + $0x10] sm:$0xff]  ;;  %v174_v11 = vld [vmem:[%s4656_s7 + $0x28] sm:$0xff]  ;;  %v176_v12 = vld [vmem:[%s4656_s7 + $0x38] sm:$0xff] }
  0x1e   : > { %v3487_v13 = vpack.c.bf16 %v171_v10, %v169_v8  ;;  %v3489_v14 = vpack.c.bf16 %v176_v12, %v174_v11  ;;  %v173_v15 = vld [vmem:[%s4656_s7 + $0x20] sm:$0xff]  ;;  %v175_v16 = vld [vmem:[%s4656_s7 + $0x30] sm:$0xff]  ;;  %v178_v20 = vld [vmem:[%s4656_s7 + $0x48] sm:$0x1] }
  0x1f   : > { %3486 = vmatprep.subr.bf16.mxu0 %v3485_v9  ;;  %3749 = vmatprep.subr.bf16.mxu1 %v3485_v9  ;;  %v3491_v19 = vpack.c.bf16 %v175_v16, %v173_v15  ;;  %v177_v23 = vld [vmem:[%s4656_s7 + $0x40] sm:$0x1]  ;;  %v189_v35 = vld [vmem:[%s5445_s1 + $0x50] sm:$0xff]  ;;  %v190_v37 = vld [vmem:[%s5445_s1 + $0x58] sm:$0xff] }
  0x20   : > { %3488 = vmatpush1.bf16.msra.mxu0 %v3487_v13  ;;  %3752 = vmatpush1.bf16.msra.mxu1 %v3487_v13  ;;  %v184_v38 = vld [vmem:[%s5445_s1 + $0x28] sm:$0xff]  ;;  %v191_v39 = vld [vmem:[%s5445_s1 + $0x60] sm:$0xff]  ;;  %v185_v40 = vld [vmem:[%s5445_s1 + $0x30] sm:$0xff] }
  0x21   : > { %3490 = vmatprep.subr.bf16.mxu0 %v3489_v14  ;;  %3750 = vmatprep.subr.bf16.mxu1 %v3489_v14 }
  0x22   : > { %459 = vperm.xlu1 %3874, %v425_v17   ;;  %454 = vperm.xlu0 %3873, %v424_v18  }
  0x24   : > { %3492 = vmatpush1.bf16.msra.mxu0 %v3491_v19  ;;  %3753 = vmatpush1.bf16.msra.mxu1 %v3491_v19 }
  0x25   : > { %3333 = vmatprep.subr.msk.mxu0 %vm232_vm0, %v178_v20  ;;  %3751 = vmatprep.subr.msk.mxu1 %vm232_vm0, %v178_v20 }
  0x26   : > { %469 = vperm.xlu1 %3874, %v427_v21   ;;  %464 = vperm.xlu0 %3873, %v426_v22  }
  0x28   : > { %3334 = vmatpush1.msk.msra.mxu0 %vm232_vm0, %v177_v23  ;;  %3754 = vmatpush1.msk.msra.mxu1 %vm232_vm0, %v177_v23 }
  0x29   : > { %3335 = vmatmul.mubr.msk.f32.vlgmr.msra.gmra.mrb[0].mxu0 %vm192_vm1, %v179_v24  ;;  %3342 = vmatmul.mubr.msk.f32.vlgmr.msra.gmra.mrb[0].mxu1 %vm192_vm1, %v186_v25 }
  0x2a   : > { %309 = vmatprep.mubr.f32.mxu0 %v4563_v0  ;;  %351 = vmatprep.mubr.f32.mxu1 %v4563_v0 }
  0x2b   : > { %479 = vperm.xlu1 %3874, %v429_v26   ;;  %474 = vperm.xlu0 %3873, %v428_v27  }
  0x2d   : > { %3336 = vmatmul.mubr.msk.f32.gmra.mrb[2].mxu0 %vm192_vm1, %v180_v28  ;;  %3343 = vmatmul.mubr.msk.f32.gmra.mrb[2].mxu1 %vm192_vm1, %v187_v29 }
  0x2e   : > { %315 = vmatprep.mubr.f32.mxu0 %v4563_v0  ;;  %357 = vmatprep.mubr.f32.mxu1 %v4563_v0 }
  0x2f   : > { %489 = vperm.xlu1 %3874, %v431_v30   ;;  %484 = vperm.xlu0 %3873, %v430_v31  }
  0x31   : > { %3337 = vmatmul.mubr.msk.f32.gmra.mrb[4].mxu0 %vm192_vm1, %v181_v32  ;;  %3344 = vmatmul.mubr.msk.f32.gmra.mrb[4].mxu1 %vm192_vm1, %v188_v33 }
  0x32   : > { %321 = vmatprep.mubr.f32.mxu0 %v4563_v0  ;;  %363 = vmatprep.mubr.f32.mxu1 %v4563_v0 }
  0x35   : > { %3338 = vmatmul.mubr.msk.f32.gmra.mrb[6].mxu0 %vm192_vm1, %v182_v34  ;;  %3345 = vmatmul.mubr.msk.f32.gmra.mrb[6].mxu1 %vm192_vm1, %v189_v35 }
  0x36   : > { %327 = vmatprep.mubr.f32.mxu0 %v4563_v0  ;;  %369 = vmatprep.mubr.f32.mxu1 %v4563_v0 }
  0x39   : > { %3339 = vmatmul.mubr.msk.f32.gmra.mrb[8].mxu0 %vm192_vm1, %v183_v36  ;;  %3346 = vmatmul.mubr.msk.f32.gmra.mrb[8].mxu1 %vm192_vm1, %v190_v37 }
  0x3a   : > { %333 = vmatprep.mubr.f32.mxu0 %v4563_v0  ;;  %375 = vmatprep.mubr.f32.mxu1 %v4563_v0 }
  0x3d   : > { %3340 = vmatmul.mubr.msk.f32.gmra.mrb[10].mxu0 %vm192_vm1, %v184_v38  ;;  %3347 = vmatmul.mubr.msk.f32.gmra.mrb[10].mxu1 %vm192_vm1, %v191_v39 }
  0x3e   : > { %339 = vmatprep.mubr.f32.mxu0 %v4563_v0 }
  0x41   : > { %3341 = vmatmul.mubr.msk.f32.gmra.mrb[12].mxu0 %vm192_vm1, %v185_v40 }
  0x97   : > { %v4765_v41 = vpop.permute.xlu1 %444  ;;  %v4767_v42 = vpop.permute.xlu0 %434 }
  0x98   : > { %5452 = vst [vmem:[#allocation6_spill] sm:$0xff] %v4765_v41  ;;  %5453 = vst [vmem:[#allocation7_spill] sm:$0xff] %v4767_v42 }
  0x9b   : > { %v4769_v43 = vpop.permute.xlu1 %449  ;;  %v4771_v44 = vpop.permute.xlu0 %439 }
  0xa1   : > { %v4773_v45 = vpop.permute.xlu1 %459  ;;  %v4775_v46 = vpop.permute.xlu0 %454 }
  0xa5   : > { %v4777_v47 = vpop.permute.xlu1 %469  ;;  %v4779_v48 = vpop.permute.xlu0 %464 }
  0xaa   : > { %v4781_v49 = vpop.permute.xlu1 %479  ;;  %v4783_v50 = vpop.permute.xlu0 %474 }
  0xae   : > { %v4785_v51 = vpop.permute.xlu1 %489  ;;  %v4787_v52 = vpop.permute.xlu0 %484 }
  0xfc   : > { %v305_v53 = vpop.f32.mrb[0].mxu0  ;;  %v4789_v54 = vpop.f32.mrb[0].mxu1 }
  0xfd   : > { %v382_v55 = vrot.slane %v305_v53, 4  ;;  %v307_v56 = vpop.f32.mrb[1].mxu0  ;;  %v4791_v57 = vpop.f32.mrb[1].mxu1 }
  0xfe   : > { %v388_v58 = vrot.slane %v307_v56, 4 }
  0xff   : > { %v383_v59 = vmax.f32 %v305_v53, %v382_v55 }
 0x100   : > { %v389_v60 = vmax.f32 %v307_v56, %v388_v58  ;;  %v4793_v61 = vpop.f32.mrb[2].mxu0  ;;  %v4795_v62 = vpop.f32.mrb[2].mxu1 }
 0x101   : > { %v384_v63 = vrot.slane %v383_v59, 2  ;;  %v4797_v0 = vpop.f32.mrb[3].mxu0  ;;  %v4799_v1 = vpop.f32.mrb[3].mxu1 }
 0x102   : > { %5454 = vst [vmem:[#allocation8_spill] sm:$0xff] %v4797_v0  ;;  %v390_v2 = vrot.slane %v389_v60, 2 }
 0x103   : > { %v385_v3 = vmax.f32 %v383_v59, %v384_v63 }
 0x104   : > { %v391_v4 = vmax.f32 %v389_v60, %v390_v2  ;;  %v4801_v5 = vpop.f32.mrb[4].mxu0  ;;  %v4803_v6 = vpop.f32.mrb[4].mxu1 }
 0x105   : > { %5455 = vst [vmem:[#allocation9_spill] sm:$0xff] %v4801_v5  ;;  %v386_v7 = vrot.slane %v385_v3, 1  ;;  %v4805_v8 = vpop.f32.mrb[5].mxu0  ;;  %v4807_v9 = vpop.f32.mrb[5].mxu1 }
 0x106   : > { %5456 = vst [vmem:[#allocation10_spill] sm:$0xff] %v4805_v8  ;;  %v392_v10 = vrot.slane %v391_v4, 1 }
 0x107   : > { %v387_v11 = vmax.f32 %v385_v3, %v386_v7  ;;  %v4840_v3 = vmov 0.0   ;;  %v4844_v7 = vmov 0.0  }
 0x108   : > { %v393_v12 = vmax.f32 %v391_v4, %v392_v10  ;;  %v4809_v13 = vpop.f32.mrb[6].mxu0  ;;  %v4811_v14 = vpop.f32.mrb[6].mxu1  ;;  %v4842_v4 = vmov 0.0   ;;  %v4846_v10 = vmov 0.0  }
 0x109   : > { %5457 = vst [vmem:[#allocation11_spill] sm:$0xff] %v4809_v13  ;;  %v394_v15 = vsub.f32 %v305_v53, %v387_v11  ;;  %v4813_v16 = vpop.f32.mrb[7].mxu0  ;;  %v4815_v17 = vpop.f32.mrb[7].mxu1  ;;  %v4848_v11 = vmov 0.0  }
 0x10a   : > { %5458 = vst [vmem:[#allocation12_spill] sm:$0xff] %v4813_v16  ;;  %v395_v18 = vsub.f32 %v307_v56, %v393_v12  ;;  %v4850_v12 = vmov 0.0  }
 0x10b   : > { %v396_v19 = vmul.f32 1.442695, %v394_v15  ;;  %v4852_v15 = vmov 0.0  }
 0x10c   : > { %v398_v20 = vmul.f32 1.442695, %v395_v18  ;;  %v4817_v21 = vpop.f32.mrb[8].mxu0  ;;  %v4819_v22 = vpop.f32.mrb[8].mxu1  ;;  %v4854_v18 = vmov 0.0  }
 0x10d   : > { %5459 = vst [vmem:[#allocation13_spill] sm:$0xff] %v4817_v21  ;;  %3875 = vpow2.f32 %v396_v19  ;;  %v4821_v23 = vpop.f32.mrb[9].mxu0  ;;  %v4823_v24 = vpop.f32.mrb[9].mxu1 }
 0x10e   : > { %5460 = vst [vmem:[#allocation14_spill] sm:$0xff] %v4821_v23  ;;  %3877 = vpow2.f32 %v398_v20 }
 0x110   : > { %v4825_v25 = vpop.f32.mrb[10].mxu0  ;;  %v4827_v26 = vpop.f32.mrb[10].mxu1 }
 0x111   : > { %5461 = vst [vmem:[#allocation15_spill] sm:$0xff] %v4825_v25  ;;  %v4829_v27 = vpop.f32.mrb[11].mxu0  ;;  %v4831_v28 = vpop.f32.mrb[11].mxu1 }
 0x112   : > { %5462 = vst [vmem:[#allocation16_spill] sm:$0xff] %v4829_v27 }
 0x114   : > { %v4833_v29 = vpop.f32.mrb[12].mxu0 }
 0x115   : > { %5463 = vst [vmem:[#allocation17_spill] sm:$0xff] %v4833_v29  ;;  %v4835_v30 = vpop.f32.mrb[13].mxu0 }
 0x116   : > { %5464 = vst [vmem:[#allocation18_spill] sm:$0xff] %v4835_v30 }
 0x117   : > { %v3876_v31 = vpop.eup %3875 }
 0x118   : > { %v3878_v32 = vpop.eup %3877  ;;  %v400_v33 = vrot.slane %v3876_v31, 4 }
 0x119   : > { %v406_v34 = vrot.slane %v3878_v32, 4 }
 0x11a   : > { %v401_v35 = vadd.f32 %v3876_v31, %v400_v33 }
 0x11b   : > { %v407_v36 = vadd.f32 %v3878_v32, %v406_v34 }
 0x11c   : > { %v402_v37 = vrot.slane %v401_v35, 2 }
 0x11d   : > { %v408_v38 = vrot.slane %v407_v36, 2 }
 0x11e   : > { %v403_v39 = vadd.f32 %v402_v37, %v401_v35 }
 0x11f   : > { %v409_v40 = vadd.f32 %v408_v38, %v407_v36 }
 0x120   : > { %v404_v53 = vrot.slane %v403_v39, 1 }
 0x121   : > { %v410_v55 = vrot.slane %v409_v40, 1 }
 0x122   : > { %v405_v56 = vadd.f32 %v404_v53, %v403_v39 }
 0x123   : > { %v411_v58 = vadd.f32 %v410_v55, %v409_v40 }
 0x124   : > { %3879 = vrcp.f32 %v405_v56 }
 0x125   : > { %3881 = vrcp.f32 %v411_v58 }
 0x12e   : > { %v3880_v59 = vpop.eup %3879 }
 0x12f   : > { %v3882_v60 = vpop.eup %3881  ;;  %v416_v63 = vmul.f32 %v3880_v59, %v3876_v31 }
 0x130   : > { %v417_v2 = vmul.f32 %v3882_v60, %v3878_v32 }
 0x131   : > { %418 = vst [vmem:[#allocation2] sm:$0xff] %v416_v63 }
 0x132   : > { %419 = vst [vmem:[#allocation2 + $0x8] sm:$0xff] %v417_v2 }
 0x133 LB: >> { %v5465_v42 = vld [vmem:[#allocation7_spill] sm:$0xff]  ;;  %v5466_v41 = vld [vmem:[#allocation6_spill] sm:$0xff]  ;;  %v516_v19 = vlaneseq  ;;  %s506_s25 = sshra.s32 %s4561_s8, 3  ;;  %s509_s9 = sand.u32 7, %s4561_s8  ;;  %v5467_v0 = vld [vmem:[#allocation8_spill] sm:$0xff]  ;;  %vm714_vm2 = vcmask 64512   ;;  %v4533_v4 = vphi %v4842_v4, %v5479_v4   ;;  %v4529_v3 = vphi %v4840_v3, %v5478_v3   ;;  %s4561_s8 = sphi %s4856_s8, %s497_s8   ;;  %v4557_v18 = vphi %v4854_v18, %v5485_v18   ;;  %v4553_v15 = vphi %v4852_v15, %v5484_v15   ;;  %v4549_v12 = vphi %v4850_v12, %v5483_v12   ;;  %v4545_v11 = vphi %v4848_v11, %v5482_v11   ;;  %v4541_v10 = vphi %v4846_v10, %v5481_v10   ;;  %v4537_v7 = vphi %v4844_v7, %v5480_v7  }
 0x134   : >> { %s3483_s10 = sshll.u32 %s506_s25, 4  ;;  %v5468_v5 = vld [vmem:[#allocation9_spill] sm:$0xff]  ;;  %v5469_v8 = vld [vmem:[#allocation10_spill] sm:$0xff]  ;;  %v5470_v25 = vld [vmem:[#allocation15_spill] sm:$0xff]  ;;  %s497_s8 = sadd.s32 1, %s4561_s8  }
 0x135   : >> { %v517_v20 = vshrl.u32 %v516_v19, 7  ;;  %s512_s7 = sadd.s32 %s3483_s10, %s509_s9  ;;  %v5471_v27 = vld [vmem:[#allocation16_spill] sm:$0xff]  ;;  %v5472_v29 = vld [vmem:[#allocation17_spill] sm:$0xff]  ;;  %v5473_v30 = vld [vmem:[#allocation18_spill] sm:$0xff]  ;;  %p494_p11 = scmp.ge.s32.totalorder %s497_s8, 8  }
 0x136   : >> { %s513_s11 = scalar_lea.vmem [#allocation2], %s512_s7  ;;  %v5474_v21 = vld [vmem:[#allocation13_spill] sm:$0xff]  ;;  %v5475_v23 = vld [vmem:[#allocation14_spill] sm:$0xff]  ;;  %v5476_v13 = vld [vmem:[#allocation11_spill] sm:$0xff]  ;;  %s3484_s17 = sshll.u32 (%p494_p11), %s4611_s16, 10 }
 0x137   : >> { %v4887_v31 = vsub.s32 0, %v517_v20  ;;  %v522_v32 = vsub.s32 1, %v517_v20  ;;  %v5477_v16 = vld [vmem:[#allocation12_spill] sm:$0xff]  ;;  %s5396_s26 = scalar_lea.hbm (%p494_p11), %s5447_s3, %s3484_s17  ;;  %s3233_s27 = sshll.u32 (%p494_p11), %s4838_s6, 4  ;;  %s5399_s27 = int_to_ptr.vmem [resolvable:$true] %s3233_s27 }
 0x138   : > { %s5403_s28 = scalar_lea.sflag (%p494_p11), [#allocation4], %s161_s24  ;;  %s4427_s29 = scalar_lea.vmem (%p494_p11), %s5399_s27, 1024 }
 0x139   : >> { %v514_v33 = vld [vmem:[%s513_s11] ss:$8 sm:$0x3]  ;;  %p4428_p12 = scmp.ne.s32.totalorder (%p494_p11), %s5399_s27, %s4427_s29  ;;  %s4567_s16 = smov (%p494_p11), [#allocation3]  }
 0x13a   : >> { %v4890_v34 = vrot.slane %v514_v33, %v4887_v31  ;;  %v4892_v35 = vrot.slane %v514_v33, %v522_v32  ;;  %s4431_s30 = sshll.u32 (%p494_p11), %s4567_s16, 4  ;;  %s4432_s30 = int_to_ptr.vmem [resolvable:$false] %s4431_s30 }
 0x13b   : > { %p4429_p13 = pnand (%p494_p11), %p4428_p12, %p4628_p5  ;;  %s4433_s4 = scalar_lea.vmem (%p494_p11), %s4432_s30, 2048 }
 0x13c   : >> { %v526_v36 = vmul.f32 %v4890_v34, %v4793_v61  ;;  %v527_v37 = vmul.f32 %v4892_v35, %v5467_v0  ;;  %v528_v38 = vmul.f32 %v4890_v34, %v5468_v5  ;;  %v529_v39 = vmul.f32 %v4892_v35, %v5469_v8  ;;  %p4434_p1 = scmp.lt.s32.totalorder (%p494_p11), %s5399_s27, %s4432_s30  ;;  %p4435_p2 = scmp.lt.s32.totalorder (%p494_p11), %s4433_s4, %s4427_s29 }
 0x13d   : >> { %v534_v40 = vmul.f32 %v4890_v34, %v5470_v25  ;;  %v535_v53 = vmul.f32 %v4892_v35, %v5471_v27  ;;  %v536_v55 = vmul.f32 %v4890_v34, %v5472_v29  ;;  %v537_v56 = vmul.f32 %v4892_v35, %v5473_v30  ;;  %p4430_p0 = pneg (%p494_p11), %p4429_p13 }
 0x13e   : >> { %v550_v58 = vadd.f32 %v526_v36, %v5465_v42  ;;  %v4912_v59 = vadd.f32 %v527_v37, %v5465_v42  ;;  %v4915_v60 = vadd.f32 %v528_v38, %v4771_v44  ;;  %v4918_v63 = vadd.f32 %v529_v39, %v4771_v44  ;;  %p4436_p3 = por (%p494_p11), %p4435_p2, %p4434_p1 }
 0x13f   : >> { %v558_v2 = vadd.f32 %v534_v40, %v4775_v46  ;;  %v559_v19 = vadd.f32 %v535_v53, %v4775_v46  ;;  %v560_v20 = vadd.f32 %v536_v55, %v4773_v45  ;;  %v561_v32 = vadd.f32 %v537_v56, %v4773_v45 }
 0x140   : >> { %v574_v33 = vmul.f32 %v550_v58, %v550_v58  ;;  %v575_v36 = vmul.f32 %v4912_v59, %v4912_v59  ;;  %v576_v37 = vmul.f32 %v4915_v60, %v4915_v60  ;;  %v577_v38 = vmul.f32 %v4918_v63, %v4918_v63  ;;  %p4437_p4 = pnand (%p494_p11), %p4436_p3, %p4430_p0 }
 0x141   : >> { %v606_v39 = vmul.f32 %v558_v2, %v558_v2  ;;  %v607_v0 = vmul.f32 %v559_v19, %v559_v19  ;;  %v608_v5 = vmul.f32 %v560_v20, %v560_v20  ;;  %v609_v40 = vmul.f32 %v561_v32, %v561_v32 }
 0x142   : >> { %v582_v8 = vadd.f32 %v575_v36, %v574_v33  ;;  %v532_v53 = vmul.f32 %v4890_v34, %v5474_v21  ;;  %v533_v55 = vmul.f32 %v4892_v35, %v5475_v23  ;;  %v530_v25 = vmul.f32 %v4890_v34, %v5476_v13 }
 0x143   : >> { %v614_v56 = vadd.f32 %v607_v0, %v606_v39  ;;  %v531_v27 = vmul.f32 %v4892_v35, %v5477_v16  ;;  %v585_v29 = vadd.f32 %v577_v38, %v576_v37  ;;  %v617_v36 = vadd.f32 %v609_v40, %v608_v5 }
 0x144   : >> { %583 = vadd.xlane.f32.xlu0 %v582_v8  ;;  %v4939_v30 = vadd.f32 %v532_v53, %v4769_v43  ;;  %v4942_v33 = vadd.f32 %v533_v55, %v4769_v43  ;;  %v4945_v21 = vadd.f32 %v530_v25, %v5466_v41 }
 0x145   : >> { %615 = vadd.xlane.f32.xlu1 %v614_v56  ;;  %v4948_v0 = vadd.f32 %v531_v27, %v5466_v41 }
 0x146   : >> { %v580_v39 = vmul.f32 %v4939_v30, %v4939_v30  ;;  %v581_v8 = vmul.f32 %v4942_v33, %v4942_v33  ;;  %v578_v37 = vmul.f32 %v4945_v21, %v4945_v21 }
 0x147   : >> { %v579_v38 = vmul.f32 %v4948_v0, %v4948_v0 }
 0x148   : >> { %586 = vadd.xlane.f32.xlu0 %v585_v29  ;;  %v591_v5 = vadd.f32 %v581_v8, %v580_v39 }
 0x149   : >> { %618 = vadd.xlane.f32.xlu1 %v617_v36  ;;  %v588_v25 = vadd.f32 %v579_v38, %v578_v37 }
 0x14c   : >> { %589 = vadd.xlane.f32.xlu0 %v588_v25 }
 0x14d   : >> { %592 = vadd.xlane.f32.xlu1 %v591_v5 }
 0x1d1   : >> { %v584_v27 = vpop.xlane.xlu0 %583 }
 0x1d2   : >> { %v594_v40 = vmax.f32 %v584_v27, 1e-24  ;;  %v616_v53 = vpop.xlane.xlu1 %615 }
 0x1d3   : >> { %v626_v55 = vmax.f32 %v616_v53, 1e-24 }
 0x1d4   : >> { %3883 = vrsqrt.f32 %v594_v40 }
 0x1d5   : >> { %v587_v56 = vpop.xlane.xlu0 %586  ;;  %3885 = vrsqrt.f32 %v626_v55  ;;  %v540_v55 = vmul.f32 %v4890_v34, %v4795_v62 }
 0x1d6   : >> { %v595_v13 = vmax.f32 %v587_v56, 1e-24  ;;  %v619_v16 = vpop.xlane.xlu1 %618  ;;  %v541_v56 = vmul.f32 %v4892_v35, %v4799_v1 }
 0x1d7   : >> { %v627_v23 = vmax.f32 %v619_v16, 1e-24 }
 0x1d8   : >> { %3887 = vrsqrt.f32 %v595_v13  ;;  %v4565_v13 = vmov 0.0  }
 0x1d9   : >> { %3889 = vrsqrt.f32 %v627_v23  ;;  %875 = vmatprep.mubr.f32.mxu0 %v4565_v13  ;;  %1292 = vmatprep.mubr.f32.mxu1 %v4565_v13  ;;  %v4963_v16 = vpop.xlane.xlu0 %589 }
 0x1da   : >> { %v4965_v23 = vpop.xlane.xlu1 %592 }
 0x1de   : >> { %v3884_v41 = vpop.eup %3883 }
 0x1df   : >> { %v3886_v42 = vpop.eup %3885  ;;  %v602_v29 = vmul.f32 0.35355338, %v3884_v41 }
 0x1e0   : >> { %v643_v36 = vmul.f32 %v3886_v42, %v559_v19  ;;  %v642_v39 = vmul.f32 %v3886_v42, %v558_v2 }
 0x1e1   : >> { %v634_v8 = vmul.f32 %v602_v29, %v550_v58  ;;  %v635_v41 = vmul.f32 %v602_v29, %v4912_v59 }
 0x1e2   : >> { %v3888_v37 = vpop.eup %3887  ;;  %811 = vmatprep.subr.mxu0 %v643_v36 }
 0x1e3   : >> { %v3890_v38 = vpop.eup %3889  ;;  %650 = vxpose.xlu0.b32.start.end [1/1] (short) %v634_v8, 128  ;;  %v603_v5 = vmul.f32 0.35355338, %v3888_v37  ;;  %812 = vmatpush1.msra.mxu0 %v642_v39  ;;  %v538_v39 = vmul.f32 %v4890_v34, %v4789_v54  ;;  %v539_v8 = vmul.f32 %v4892_v35, %v4791_v57  ;;  %v4998_v37 = vadd.f32 %v540_v55, %v4777_v47 }
 0x1e4   : >> { %v645_v25 = vmul.f32 %v3890_v38, %v561_v32  ;;  %v644_v27 = vmul.f32 %v3890_v38, %v560_v20  ;;  %v5001_v38 = vadd.f32 %v541_v56, %v4777_v47 }
 0x1e5   : >> { %v636_v40 = vmul.f32 %v603_v5, %v4915_v60  ;;  %v637_v42 = vmul.f32 %v603_v5, %v4918_v63 }
 0x1e6   : >> { %1228 = vmatprep.subr.mxu1 %v645_v25 }
 0x1e7   : >> { %1068 = vxpose.xlu1.b32.start.end [1/1] (short) %v636_v40, 128  ;;  %1229 = vmatpush1.msra.mxu1 %v644_v27  ;;  %v5006_v27 = vadd.f32 %v538_v39, %v4779_v48  ;;  %v5009_v40 = vadd.f32 %v539_v8, %v4779_v48 }
 0x220   : >> { %682 = vxpose.xlu0.b32.start.end [1/1] (short) %v635_v41, 128  ;;  %v612_v41 = vmul.f32 %v4998_v37, %v4998_v37 }
 0x224   : >> { %1100 = vxpose.xlu1.b32.start.end [1/1] (short) %v637_v42, 128  ;;  %v613_v42 = vmul.f32 %v5001_v38, %v5001_v38 }
 0x263   : >> { %v666_v58 = vpop.trf.xlu0 }
 0x264   : >> { %3350 = vmatmul.mubr.msk.f32.vlgmr.msra.gmra.mrb[0].mxu0 %vm714_vm2, %v666_v58 }
 0x265   : >> { %881 = vmatprep.mubr.f32.mxu0 %v4565_v13 }
 0x267   : >> { %v1084_v60 = vpop.trf.xlu1  ;;  %v667_v2 = vpop.trf.xlu0 }
 0x268   : >> { %3382 = vmatmul.mubr.msk.f32.vlgmr.msra.gmra.mrb[0].mxu1 %vm714_vm2, %v1084_v60  ;;  %3351 = vmatmul.mubr.msk.f32.gmra.mrb[2].mxu0 %vm714_vm2, %v667_v2  ;;  %v610_v2 = vmul.f32 %v5006_v27, %v5006_v27 }
 0x269   : >> { %1298 = vmatprep.mubr.f32.mxu1 %v4565_v13  ;;  %887 = vmatprep.mubr.f32.mxu0 %v4565_v13 }
 0x26b   : >> { %v1085_v59 = vpop.trf.xlu1  ;;  %v668_v63 = vpop.trf.xlu0 }
 0x26c   : >> { %3383 = vmatmul.mubr.msk.f32.gmra.mrb[2].mxu1 %vm714_vm2, %v1085_v59  ;;  %3352 = vmatmul.mubr.msk.f32.gmra.mrb[4].mxu0 %vm714_vm2, %v668_v63  ;;  %v611_v59 = vmul.f32 %v5009_v40, %v5009_v40  ;;  %v623_v63 = vadd.f32 %v613_v42, %v612_v41 }
 0x26d   : >> { %1304 = vmatprep.mubr.f32.mxu1 %v4565_v13  ;;  %893 = vmatprep.mubr.f32.mxu0 %v4565_v13 }
 0x26f   : >> { %v1086_v19 = vpop.trf.xlu1  ;;  %v669_v20 = vpop.trf.xlu0 }
 0x270   : >> { %3384 = vmatmul.mubr.msk.f32.gmra.mrb[4].mxu1 %vm714_vm2, %v1086_v19  ;;  %3353 = vmatmul.mubr.msk.f32.gmra.mrb[6].mxu0 %vm714_vm2, %v669_v20 }
 0x271   : >> { %1310 = vmatprep.mubr.f32.mxu1 %v4565_v13  ;;  %899 = vmatprep.mubr.f32.mxu0 %v4565_v13 }
 0x273   : >> { %v1087_v32 = vpop.trf.xlu1  ;;  %v670_v53 = vpop.trf.xlu0 }
 0x274   : >> { %3385 = vmatmul.mubr.msk.f32.gmra.mrb[6].mxu1 %vm714_vm2, %v1087_v32  ;;  %3354 = vmatmul.mubr.msk.f32.gmra.mrb[8].mxu0 %vm714_vm2, %v670_v53  ;;  %v620_v32 = vadd.f32 %v611_v59, %v610_v2 }
 0x275   : >> { %1316 = vmatprep.mubr.f32.mxu1 %v4565_v13  ;;  %905 = vmatprep.mubr.f32.mxu0 %v4565_v13 }
 0x277   : >> { %v1088_v29 = vpop.trf.xlu1  ;;  %v671_v36 = vpop.trf.xlu0 }
 0x278   : >> { %3386 = vmatmul.mubr.msk.f32.gmra.mrb[8].mxu1 %vm714_vm2, %v1088_v29  ;;  %3355 = vmatmul.mubr.msk.f32.gmra.mrb[10].mxu0 %vm714_vm2, %v671_v36 }
 0x279   : >> { %1322 = vmatprep.mubr.f32.mxu1 %v4565_v13  ;;  %911 = vmatprep.mubr.f32.mxu0 %v4565_v13 }
 0x27b   : >> { %v1089_v5 = vpop.trf.xlu1  ;;  %v672_v25 = vpop.trf.xlu0 }
 0x27c   : >> { %3387 = vmatmul.mubr.msk.f32.gmra.mrb[10].mxu1 %vm714_vm2, %v1089_v5  ;;  %3356 = vmatmul.mubr.msk.f32.gmra.mrb[12].mxu0 %vm714_vm2, %v672_v25 }
 0x27d   : >> { %1328 = vmatprep.mubr.f32.mxu1 %v4565_v13  ;;  %917 = vmatprep.mubr.f32.mxu0 %v4565_v13 }
 0x27f   : >> { %v1090_v58 = vpop.trf.xlu1  ;;  %v673_v60 = vpop.trf.xlu0 }
 0x280   : >> { %3388 = vmatmul.mubr.msk.f32.gmra.mrb[12].mxu1 %vm714_vm2, %v1090_v58  ;;  %3357 = vmatmul.mubr.msk.f32.gmra.mrb[14].mxu0 %vm714_vm2, %v673_v60  ;;  %v596_v60 = vmax.f32 %v4963_v16, 1e-24 }
 0x281   : >> { %1334 = vmatprep.mubr.f32.mxu1 %v4565_v13  ;;  %923 = vmatprep.mubr.f32.mxu0 %v4565_v13 }
 0x282   : >> { %3891 = vrsqrt.f32 %v596_v60 }
 0x283   : >> { %v1091_v19 = vpop.trf.xlu1  ;;  %v674_v20 = vpop.trf.xlu0 }
 0x284   : >> { %3389 = vmatmul.mubr.msk.f32.gmra.mrb[14].mxu1 %vm714_vm2, %v1091_v19  ;;  %3358 = vmatmul.mubr.msk.f32.gmra.mrb[16].mxu0 %vm714_vm2, %v674_v20 }
 0x285   : >> { %1340 = vmatprep.mubr.f32.mxu1 %v4565_v13  ;;  %929 = vmatprep.mubr.f32.mxu0 %v4565_v13 }
 0x287   : >> { %624 = vadd.xlane.f32.xlu1 %v623_v63  ;;  %v1092_v53 = vpop.trf.xlu1  ;;  %v675_v55 = vpop.trf.xlu0  ;;  %v597_v63 = vmax.f32 %v4965_v23, 1e-24 }
 0x288   : >> { %3390 = vmatmul.mubr.msk.f32.gmra.mrb[16].mxu1 %vm714_vm2, %v1092_v53  ;;  %3359 = vmatmul.mubr.msk.f32.gmra.mrb[18].mxu0 %vm714_vm2, %v675_v55 }
 0x289   : >> { %621 = vadd.xlane.f32.xlu0 %v620_v32  ;;  %1346 = vmatprep.mubr.f32.mxu1 %v4565_v13  ;;  %3893 = vrsqrt.f32 %v597_v63 }
 0x28a   : >> { %935 = vmatprep.mubr.f32.mxu0 %v4565_v13 }
 0x28b   : >> { %v1093_v56 = vpop.trf.xlu1  ;;  %v676_v29 = vpop.trf.xlu0 }
 0x28c   : >> { %3391 = vmatmul.mubr.msk.f32.gmra.mrb[18].mxu1 %vm714_vm2, %v1093_v56  ;;  %3360 = vmatmul.mubr.msk.f32.gmra.mrb[20].mxu0 %vm714_vm2, %v676_v29  ;;  %v3892_v55 = vpop.eup %3891 }
 0x28d   : >> { %1352 = vmatprep.mubr.f32.mxu1 %v4565_v13  ;;  %941 = vmatprep.mubr.f32.mxu0 %v4565_v13 }
 0x28f   : >> { %v1094_v36 = vpop.trf.xlu1  ;;  %v677_v39 = vpop.trf.xlu0 }
 0x290   : >> { %3392 = vmatmul.mubr.msk.f32.gmra.mrb[20].mxu1 %vm714_vm2, %v1094_v36  ;;  %3361 = vmatmul.mubr.msk.f32.gmra.mrb[22].mxu0 %vm714_vm2, %v677_v39  ;;  %v5071_v36 = vmul.f32 0.35355338, %v3892_v55 }
 0x291   : >> { %1358 = vmatprep.mubr.f32.mxu1 %v4565_v13  ;;  %947 = vmatprep.mubr.f32.mxu0 %v4565_v13 }
 0x293   : >> { %v1095_v8 = vpop.trf.xlu1  ;;  %v678_v5 = vpop.trf.xlu0 }
 0x294   : >> { %3393 = vmatmul.mubr.msk.f32.gmra.mrb[22].mxu1 %vm714_vm2, %v1095_v8  ;;  %3362 = vmatmul.mubr.msk.f32.gmra.mrb[24].mxu0 %vm714_vm2, %v678_v5  ;;  %v3894_v39 = vpop.eup %3893 }
 0x295   : >> { %1364 = vmatprep.mubr.f32.mxu1 %v4565_v13  ;;  %953 = vmatprep.mubr.f32.mxu0 %v4565_v13 }
 0x297   : >> { %v1096_v25 = vpop.trf.xlu1  ;;  %v679_v41 = vpop.trf.xlu0 }
 0x298   : >> { %3394 = vmatmul.mubr.msk.f32.gmra.mrb[24].mxu1 %vm714_vm2, %v1096_v25  ;;  %3363 = vmatmul.mubr.msk.f32.gmra.mrb[26].mxu0 %vm714_vm2, %v679_v41  ;;  %v5077_v25 = vmul.f32 0.35355338, %v3894_v39  ;;  %v638_v41 = vmul.f32 %v5071_v36, %v4945_v21 }
 0x299   : >> { %1370 = vmatprep.mubr.f32.mxu1 %v4565_v13  ;;  %959 = vmatprep.mubr.f32.mxu0 %v4565_v13 }
 0x29a   : >> { %v640_v60 = vmul.f32 %v5077_v25, %v4939_v30 }
 0x29b   : >> { %v1097_v42 = vpop.trf.xlu1  ;;  %v680_v58 = vpop.trf.xlu0 }
 0x29c   : >> { %3395 = vmatmul.mubr.msk.f32.gmra.mrb[26].mxu1 %vm714_vm2, %v1097_v42  ;;  %3364 = vmatmul.mubr.msk.f32.gmra.mrb[28].mxu0 %vm714_vm2, %v680_v58 }
 0x29d   : >> { %1376 = vmatprep.mubr.f32.mxu1 %v4565_v13  ;;  %965 = vmatprep.mubr.f32.mxu0 %v4565_v13 }
 0x29f   : >> { %v1098_v2 = vpop.trf.xlu1  ;;  %v681_v59 = vpop.trf.xlu0 }
 0x2a0   : >> { %3396 = vmatmul.mubr.msk.f32.gmra.mrb[28].mxu1 %vm714_vm2, %v1098_v2  ;;  %3365 = vmatmul.mubr.msk.f32.gmra.mrb[30].mxu0 %vm714_vm2, %v681_v59 }
 0x2a1   : >> { %1382 = vmatprep.mubr.f32.mxu1 %v4565_v13  ;;  %971 = vmatprep.mubr.f32.mxu0 %v4565_v13 }
 0x2a3   : >> { %v1099_v19 = vpop.trf.xlu1  ;;  %v698_v20 = vpop.trf.xlu0 }
 0x2a4   : >> { %3397 = vmatmul.mubr.msk.f32.gmra.mrb[30].mxu1 %vm714_vm2, %v1099_v19  ;;  %3366 = vmatmul.mubr.msk.f32.gmra.mrb[32].mxu0 %vm714_vm2, %v698_v20 }
 0x2a5   : >> { %1388 = vmatprep.mubr.f32.mxu1 %v4565_v13  ;;  %977 = vmatprep.mubr.f32.mxu0 %v4565_v13 }
 0x2a7   : >> { %v1116_v16 = vpop.trf.xlu1  ;;  %v699_v32 = vpop.trf.xlu0 }
 0x2a8   : >> { %3398 = vmatmul.mubr.msk.f32.gmra.mrb[32].mxu1 %vm714_vm2, %v1116_v16  ;;  %3367 = vmatmul.mubr.msk.f32.gmra.mrb[34].mxu0 %vm714_vm2, %v699_v32 }
 0x2a9   : >> { %1394 = vmatprep.mubr.f32.mxu1 %v4565_v13  ;;  %983 = vmatprep.mubr.f32.mxu0 %v4565_v13 }
 0x2ab   : >> { %v1117_v23 = vpop.trf.xlu1  ;;  %v700_v53 = vpop.trf.xlu0 }
 0x2ac   : >> { %3399 = vmatmul.mubr.msk.f32.gmra.mrb[34].mxu1 %vm714_vm2, %v1117_v23  ;;  %3368 = vmatmul.mubr.msk.f32.gmra.mrb[36].mxu0 %vm714_vm2, %v700_v53 }
 0x2ad   : >> { %1400 = vmatprep.mubr.f32.mxu1 %v4565_v13  ;;  %989 = vmatprep.mubr.f32.mxu0 %v4565_v13 }
 0x2af   : >> { %v1118_v56 = vpop.trf.xlu1  ;;  %v701_v29 = vpop.trf.xlu0 }
 0x2b0   : >> { %3400 = vmatmul.mubr.msk.f32.gmra.mrb[36].mxu1 %vm714_vm2, %v1118_v56  ;;  %3369 = vmatmul.mubr.msk.f32.gmra.mrb[38].mxu0 %vm714_vm2, %v701_v29 }
 0x2b1   : >> { %1406 = vmatprep.mubr.f32.mxu1 %v4565_v13  ;;  %995 = vmatprep.mubr.f32.mxu0 %v4565_v13 }
 0x2b3   : >> { %v1119_v8 = vpop.trf.xlu1  ;;  %v702_v5 = vpop.trf.xlu0 }
 0x2b4   : >> { %3401 = vmatmul.mubr.msk.f32.gmra.mrb[38].mxu1 %vm714_vm2, %v1119_v8  ;;  %3370 = vmatmul.mubr.msk.f32.gmra.mrb[40].mxu0 %vm714_vm2, %v702_v5 }
 0x2b5   : >> { %1412 = vmatprep.mubr.f32.mxu1 %v4565_v13  ;;  %1001 = vmatprep.mubr.f32.mxu0 %v4565_v13 }
 0x2b6   : >> { %1485 = vxpose.xlu0.b32.start.end [1/1] (short) %v638_v41, 128 }
 0x2b7   : >> { %v1120_v42 = vpop.trf.xlu1  ;;  %v703_v58 = vpop.trf.xlu0 }
 0x2b8   : >> { %3402 = vmatmul.mubr.msk.f32.gmra.mrb[40].mxu1 %vm714_vm2, %v1120_v42  ;;  %3371 = vmatmul.mubr.msk.f32.gmra.mrb[42].mxu0 %vm714_vm2, %v703_v58 }
 0x2b9   : >> { %1418 = vmatprep.mubr.f32.mxu1 %v4565_v13  ;;  %1007 = vmatprep.mubr.f32.mxu0 %v4565_v13 }
 0x2ba   : >> { %1902 = vxpose.xlu1.b32.start.end [1/1] (short) %v640_v60, 128 }
 0x2bb   : >> { %v1121_v21 = vpop.trf.xlu1  ;;  %v704_v2 = vpop.trf.xlu0 }
 0x2bc   : >> { %3403 = vmatmul.mubr.msk.f32.gmra.mrb[42].mxu1 %vm714_vm2, %v1121_v21  ;;  %3372 = vmatmul.mubr.msk.f32.gmra.mrb[44].mxu0 %vm714_vm2, %v704_v2  ;;  %v639_v21 = vmul.f32 %v5071_v36, %v4948_v0  ;;  %v641_v2 = vmul.f32 %v5077_v25, %v4942_v33 }
 0x2bd   : >> { %1424 = vmatprep.mubr.f32.mxu1 %v4565_v13  ;;  %1013 = vmatprep.mubr.f32.mxu0 %v4565_v13 }
 0x2bf   : >> { %v1122_v30 = vpop.trf.xlu1  ;;  %v705_v59 = vpop.trf.xlu0 }
 0x2c0   : >> { %3404 = vmatmul.mubr.msk.f32.gmra.mrb[44].mxu1 %vm714_vm2, %v1122_v30  ;;  %3373 = vmatmul.mubr.msk.f32.gmra.mrb[46].mxu0 %vm714_vm2, %v705_v59 }
 0x2c1   : >> { %1430 = vmatprep.mubr.f32.mxu1 %v4565_v13  ;;  %1019 = vmatprep.mubr.f32.mxu0 %v4565_v13 }
 0x2c3   : >> { %v1123_v63 = vpop.trf.xlu1  ;;  %v706_v19 = vpop.trf.xlu0 }
 0x2c4   : >> { %3405 = vmatmul.mubr.msk.f32.gmra.mrb[46].mxu1 %vm714_vm2, %v1123_v63  ;;  %3374 = vmatmul.mubr.msk.f32.gmra.mrb[48].mxu0 %vm714_vm2, %v706_v19 }
 0x2c5   : >> { %1436 = vmatprep.mubr.f32.mxu1 %v4565_v13  ;;  %1025 = vmatprep.mubr.f32.mxu0 %v4565_v13 }
 0x2c7   : >> { %v1124_v20 = vpop.trf.xlu1  ;;  %v707_v16 = vpop.trf.xlu0 }
 0x2c8   : >> { %3406 = vmatmul.mubr.msk.f32.gmra.mrb[48].mxu1 %vm714_vm2, %v1124_v20  ;;  %3375 = vmatmul.mubr.msk.f32.gmra.mrb[50].mxu0 %vm714_vm2, %v707_v16 }
 0x2c9   : >> { %1442 = vmatprep.mubr.f32.mxu1 %v4565_v13  ;;  %1031 = vmatprep.mubr.f32.mxu0 %v4565_v13 }
 0x2cb   : >> { %v1125_v32 = vpop.trf.xlu1  ;;  %v708_v23 = vpop.trf.xlu0 }
 0x2cc   : >> { %3407 = vmatmul.mubr.msk.f32.gmra.mrb[50].mxu1 %vm714_vm2, %v1125_v32  ;;  %3376 = vmatmul.mubr.msk.f32.gmra.mrb[52].mxu0 %vm714_vm2, %v708_v23 }
 0x2cd   : >> { %1448 = vmatprep.mubr.f32.mxu1 %v4565_v13  ;;  %1037 = vmatprep.mubr.f32.mxu0 %v4565_v13 }
 0x2cf   : >> { %v1126_v53 = vpop.trf.xlu1  ;;  %v709_v55 = vpop.trf.xlu0 }
 0x2d0   : >> { %3408 = vmatmul.mubr.msk.f32.gmra.mrb[52].mxu1 %vm714_vm2, %v1126_v53  ;;  %3377 = vmatmul.mubr.msk.f32.gmra.mrb[54].mxu0 %vm714_vm2, %v709_v55 }
 0x2d1   : >> { %1454 = vmatprep.mubr.f32.mxu1 %v4565_v13  ;;  %1043 = vmatprep.mubr.f32.mxu0 %v4565_v13 }
 0x2d3   : >> { %v1127_v56 = vpop.trf.xlu1  ;;  %v710_v29 = vpop.trf.xlu0 }
 0x2d4   : >> { %3409 = vmatmul.mubr.msk.f32.gmra.mrb[54].mxu1 %vm714_vm2, %v1127_v56  ;;  %3378 = vmatmul.mubr.msk.f32.gmra.mrb[56].mxu0 %vm714_vm2, %v710_v29 }
 0x2d5   : >> { %1460 = vmatprep.mubr.f32.mxu1 %v4565_v13  ;;  %1049 = vmatprep.mubr.f32.mxu0 %v4565_v13 }
 0x2d7   : >> { %v1128_v39 = vpop.trf.xlu1  ;;  %v711_v8 = vpop.trf.xlu0 }
 0x2d8   : >> { %3410 = vmatmul.mubr.msk.f32.gmra.mrb[56].mxu1 %vm714_vm2, %v1128_v39  ;;  %3379 = vmatmul.mubr.msk.f32.gmra.mrb[58].mxu0 %vm714_vm2, %v711_v8 }
 0x2d9   : >> { %1466 = vmatprep.mubr.f32.mxu1 %v4565_v13  ;;  %1055 = vmatprep.mubr.f32.mxu0 %v4565_v13 }
 0x2db   : >> { %v1129_v5 = vpop.trf.xlu1  ;;  %v712_v41 = vpop.trf.xlu0 }
 0x2dc   : >> { %3411 = vmatmul.mubr.msk.f32.gmra.mrb[58].mxu1 %vm714_vm2, %v1129_v5  ;;  %3380 = vmatmul.mubr.msk.f32.gmra.mrb[60].mxu0 %vm714_vm2, %v712_v41 }
 0x2dd   : >> { %1472 = vmatprep.mubr.f32.mxu1 %v4565_v13  ;;  %1061 = vmatprep.mubr.f32.mxu0 %v4565_v13 }
 0x2df   : >> { %v1130_v42 = vpop.trf.xlu1  ;;  %v713_v58 = vpop.trf.xlu0 }
 0x2e0   : >> { %3412 = vmatmul.mubr.msk.f32.gmra.mrb[60].mxu1 %vm714_vm2, %v1130_v42  ;;  %3381 = vmatmul.mubr.msk.f32.gmra.mrb[62].mxu0 %vm714_vm2, %v713_v58 }
 0x2e1   : >> { %1478 = vmatprep.mubr.f32.mxu1 %v4565_v13  ;;  %1709 = vmatprep.mubr.f32.mxu0 %v4565_v13 }
 0x2e3   : >> { %v1131_v60 = vpop.trf.xlu1 }
 0x2e4   : >> { %3413 = vmatmul.mubr.msk.f32.gmra.mrb[62].mxu1 %vm714_vm2, %v1131_v60 }
 0x2e5   : >> { %2126 = vmatprep.mubr.f32.mxu1 %v4565_v13 }
 0x2f3   : >> { %1517 = vxpose.xlu0.b32.start.end [1/1] (short) %v639_v21, 128 }
 0x2f7   : >> { %1934 = vxpose.xlu1.b32.start.end [1/1] (short) %v641_v2, 128 }
 0x314   : >> { %v625_v30 = vpop.xlane.xlu1 %624 }
 0x315   : >> { %v629_v59 = vmax.f32 %v625_v30, 1e-24 }
 0x316   : >> { %v622_v63 = vpop.xlane.xlu0 %621 }
 0x317   : >> { %3895 = vrsqrt.f32 %v629_v59  ;;  %v628_v19 = vmax.f32 %v622_v63, 1e-24 }
 0x319   : >> { %3897 = vrsqrt.f32 %v628_v19 }
 0x321   : >> { %v3896_v20 = vpop.eup %3895 }
 0x322   : >> { %v649_v16 = vmul.f32 %v3896_v20, %v5001_v38  ;;  %v648_v32 = vmul.f32 %v3896_v20, %v4998_v37 }
 0x323   : >> { %v3898_v23 = vpop.eup %3897 }
 0x324   : >> { %2062 = vmatprep.subr.mxu1 %v649_v16  ;;  %v647_v0 = vmul.f32 %v3898_v23, %v5009_v40  ;;  %v646_v36 = vmul.f32 %v3898_v23, %v5006_v27 }
 0x325   : >> { %2063 = vmatpush1.msra.mxu1 %v648_v32 }
 0x326   : >> { %1645 = vmatprep.subr.mxu0 %v647_v0 }
 0x327   : >> { %1646 = vmatpush1.msra.mxu0 %v646_v36 }
 0x336   : >> { %v1501_v33 = vpop.trf.xlu0 }
 0x337   : >> { %v877_v25 = vpop.f32.mrb[0].mxu0  ;;  %3414 = vmatmul.mubr.msk.f32.vlgmr.msra.gmra.mrb[64].mxu0 %vm714_vm2, %v1501_v33 }
 0x338   : >> { %v2319_v53 = vmul.f32 1.442695, %v877_v25  ;;  %v879_v55 = vpop.f32.mrb[1].mxu0  ;;  %1715 = vmatprep.mubr.f32.mxu0 %v4565_v13 }
 0x339   : >> { %v2321_v38 = vmul.f32 1.442695, %v879_v55 }
 0x33a   : >> { %v1918_v56 = vpop.trf.xlu1  ;;  %v1502_v37 = vpop.trf.xlu0  ;;  %3899 = vpow2.f32 %v2319_v53 }
 0x33b   : >> { %v1294_v29 = vpop.f32.mrb[0].mxu1  ;;  %v883_v39 = vpop.f32.mrb[2].mxu0  ;;  %3446 = vmatmul.mubr.msk.f32.vlgmr.msra.gmra.mrb[64].mxu1 %vm714_vm2, %v1918_v56  ;;  %3415 = vmatmul.mubr.msk.f32.gmra.mrb[66].mxu0 %vm714_vm2, %v1502_v37  ;;  %3901 = vpow2.f32 %v2321_v38 }
 0x33c   : >> { %v2447_v27 = vmul.f32 1.442695, %v1294_v29  ;;  %v1296_v40 = vpop.f32.mrb[1].mxu1  ;;  %v2323_v8 = vmul.f32 1.442695, %v883_v39  ;;  %v885_v5 = vpop.f32.mrb[3].mxu0  ;;  %2132 = vmatprep.mubr.f32.mxu1 %v4565_v13  ;;  %1721 = vmatprep.mubr.f32.mxu0 %v4565_v13 }
 0x33d   : >> { %v2449_v41 = vmul.f32 1.442695, %v1296_v40  ;;  %v2325_v42 = vmul.f32 1.442695, %v885_v5 }
 0x33e   : >> { %3903 = vpow2.f32 %v2447_v27  ;;  %v1919_v58 = vpop.trf.xlu1  ;;  %v1503_v60 = vpop.trf.xlu0 }
 0x33f   : >> { %3905 = vpow2.f32 %v2449_v41  ;;  %v1300_v21 = vpop.f32.mrb[2].mxu1  ;;  %v889_v2 = vpop.f32.mrb[4].mxu0  ;;  %3447 = vmatmul.mubr.msk.f32.gmra.mrb[66].mxu1 %vm714_vm2, %v1919_v58  ;;  %3416 = vmatmul.mubr.msk.f32.gmra.mrb[68].mxu0 %vm714_vm2, %v1503_v60 }
 0x340   : >> { %3907 = vpow2.f32 %v2323_v8  ;;  %v2451_v30 = vmul.f32 1.442695, %v1300_v21  ;;  %v1302_v59 = vpop.f32.mrb[3].mxu1  ;;  %v2327_v63 = vmul.f32 1.442695, %v889_v2  ;;  %v891_v19 = vpop.f32.mrb[5].mxu0  ;;  %2138 = vmatprep.mubr.f32.mxu1 %v4565_v13  ;;  %1727 = vmatprep.mubr.f32.mxu0 %v4565_v13 }
 0x341   : >> { %3909 = vpow2.f32 %v2325_v42  ;;  %v2453_v20 = vmul.f32 1.442695, %v1302_v59  ;;  %v2329_v16 = vmul.f32 1.442695, %v891_v19 }
 0x342   : >> { %3911 = vpow2.f32 %v2451_v30  ;;  %v1920_v32 = vpop.trf.xlu1  ;;  %v1504_v23 = vpop.trf.xlu0 }
 0x343   : >> { %3913 = vpow2.f32 %v2453_v20  ;;  %v1306_v0 = vpop.f32.mrb[4].mxu1  ;;  %v895_v36 = vpop.f32.mrb[6].mxu0  ;;  %3448 = vmatmul.mubr.msk.f32.gmra.mrb[68].mxu1 %vm714_vm2, %v1920_v32  ;;  %3417 = vmatmul.mubr.msk.f32.gmra.mrb[70].mxu0 %vm714_vm2, %v1504_v23 }
 0x344   : >> { %3915 = vpow2.f32 %v2327_v63  ;;  %v2455_v33 = vmul.f32 1.442695, %v1306_v0  ;;  %v1308_v25 = vpop.f32.mrb[5].mxu1  ;;  %v2331_v53 = vmul.f32 1.442695, %v895_v36  ;;  %v897_v55 = vpop.f32.mrb[7].mxu0  ;;  %2144 = vmatprep.mubr.f32.mxu1 %v4565_v13  ;;  %1733 = vmatprep.mubr.f32.mxu0 %v4565_v13 }
 0x345   : >> { %3917 = vpow2.f32 %v2329_v16  ;;  %v2457_v38 = vmul.f32 1.442695, %v1308_v25  ;;  %v2333_v56 = vmul.f32 1.442695, %v897_v55  ;;  %v3900_v37 = vpop.eup %3899 }
 0x346   : >> { %3919 = vpow2.f32 %v2455_v33  ;;  %v1921_v29 = vpop.trf.xlu1  ;;  %v1505_v39 = vpop.trf.xlu0 }
 0x347   : >> { %v3902_v27 = vpop.eup %3901  ;;  %3921 = vpow2.f32 %v2457_v38  ;;  %v1312_v40 = vpop.f32.mrb[6].mxu1  ;;  %3449 = vmatmul.mubr.msk.f32.gmra.mrb[70].mxu1 %vm714_vm2, %v1921_v29  ;;  %3418 = vmatmul.mubr.msk.f32.gmra.mrb[72].mxu0 %vm714_vm2, %v1505_v39 }
 0x348   : >> { %v901_v8 = vpop.f32.mrb[8].mxu0  ;;  %v3904_v5 = vpop.eup %3903  ;;  %3923 = vpow2.f32 %v2331_v53  ;;  %v2459_v41 = vmul.f32 1.442695, %v1312_v40  ;;  %2150 = vmatprep.mubr.f32.mxu1 %v4565_v13  ;;  %1739 = vmatprep.mubr.f32.mxu0 %v4565_v13 }
 0x349   : >> { %v1314_v42 = vpop.f32.mrb[7].mxu1  ;;  %v2335_v58 = vmul.f32 1.442695, %v901_v8  ;;  %v903_v60 = vpop.f32.mrb[9].mxu0  ;;  %3925 = vpow2.f32 %v2333_v56 }
 0x34a   : >> { %v3906_v21 = vpop.eup %3905  ;;  %v2461_v2 = vmul.f32 1.442695, %v1314_v42  ;;  %v2337_v30 = vmul.f32 1.442695, %v903_v60  ;;  %3927 = vpow2.f32 %v2459_v41  ;;  %v1922_v63 = vpop.trf.xlu1 }
 0x34b   : >> { %v3908_v59 = vpop.eup %3907  ;;  %v1506_v19 = vpop.trf.xlu0  ;;  %3450 = vmatmul.mubr.msk.f32.gmra.mrb[72].mxu1 %vm714_vm2, %v1922_v63 }
 0x34c   : >> { %v3910_v20 = vpop.eup %3909  ;;  %3929 = vpow2.f32 %v2461_v2  ;;  %v1318_v16 = vpop.f32.mrb[8].mxu1  ;;  %v3495_v23 = vpack.c.bf16 %v3908_v59, %v3900_v37  ;;  %3419 = vmatmul.mubr.msk.f32.gmra.mrb[74].mxu0 %vm714_vm2, %v1506_v19  ;;  %2156 = vmatprep.mubr.f32.mxu1 %v4565_v13 }
 0x34d   : >> { %v907_v32 = vpop.f32.mrb[10].mxu0  ;;  %v3912_v0 = vpop.eup %3911  ;;  %3931 = vpow2.f32 %v2335_v58  ;;  %v2463_v36 = vmul.f32 1.442695, %v1318_v16  ;;  %v3493_v55 = vpack.c.bf16 %v3910_v20, %v3902_v27  ;;  %1745 = vmatprep.mubr.f32.mxu0 %v4565_v13 }
 0x34e   : >> { %v1320_v33 = vpop.f32.mrb[9].mxu1  ;;  %v2339_v25 = vmul.f32 1.442695, %v907_v32  ;;  %v909_v53 = vpop.f32.mrb[11].mxu0  ;;  %3933 = vpow2.f32 %v2337_v30  ;;  %v3559_v37 = vpack.c.bf16 %v3912_v0, %v3904_v5 }
 0x34f   : >> { %v3914_v38 = vpop.eup %3913  ;;  %v2465_v56 = vmul.f32 1.442695, %v1320_v33  ;;  %v2341_v29 = vmul.f32 1.442695, %v909_v53  ;;  %3935 = vpow2.f32 %v2463_v36  ;;  %3494 = vmatprep.subr.bf16.mxu0 %v3493_v55  ;;  %v1923_v8 = vpop.trf.xlu1 }
 0x350   : >> { %v3916_v39 = vpop.eup %3915  ;;  %v3557_v40 = vpack.c.bf16 %v3914_v38, %v3906_v21  ;;  %v1507_v41 = vpop.trf.xlu0  ;;  %3496 = vmatpush1.bf16.xpose.msra.mxu0 %v3495_v23  ;;  %3451 = vmatmul.mubr.msk.f32.gmra.mrb[74].mxu1 %vm714_vm2, %v1923_v8 }
 0x351   : >> { %v3918_v42 = vpop.eup %3917  ;;  %3937 = vpow2.f32 %v2465_v56  ;;  %v1324_v58 = vpop.f32.mrb[10].mxu1  ;;  %2162 = vmatprep.mubr.f32.mxu1 %v4565_v13  ;;  %3420 = vmatmul.mubr.msk.f32.gmra.mrb[76].mxu0 %vm714_vm2, %v1507_v41 }
 0x352   : >> { %v913_v27 = vpop.f32.mrb[12].mxu0  ;;  %v5164_v60 = vpop.eup %3919  ;;  %3939 = vpow2.f32 %v2339_v25  ;;  %v2467_v2 = vmul.f32 1.442695, %v1324_v58  ;;  %3558 = vmatprep.subr.bf16.mxu1 %v3557_v40  ;;  %1751 = vmatprep.mubr.f32.mxu0 %v4565_v13 }
 0x353   : >> { %v1326_v30 = vpop.f32.mrb[11].mxu1  ;;  %v2343_v5 = vmul.f32 1.442695, %v913_v27  ;;  %v915_v59 = vpop.f32.mrb[13].mxu0  ;;  %3941 = vpow2.f32 %v2341_v29  ;;  %3560 = vmatpush1.bf16.xpose.msra.mxu1 %v3559_v37 }
 0x354   : >> { %v3922_v21 = vpop.eup %3921  ;;  %v2469_v63 = vmul.f32 1.442695, %v1326_v30  ;;  %v2345_v19 = vmul.f32 1.442695, %v915_v59  ;;  %3943 = vpow2.f32 %v2467_v2  ;;  %v1924_v16 = vpop.trf.xlu1 }
 0x355   : >> { %v3924_v20 = vpop.eup %3923  ;;  %v1508_v32 = vpop.trf.xlu0  ;;  %3452 = vmatmul.mubr.msk.f32.gmra.mrb[76].mxu1 %vm714_vm2, %v1924_v16 }
 0x356   : >> { %v3926_v23 = vpop.eup %3925  ;;  %3945 = vpow2.f32 %v2469_v63  ;;  %v1330_v0 = vpop.f32.mrb[12].mxu1  ;;  %v3499_v33 = vpack.c.bf16 %v3924_v20, %v3916_v39  ;;  %2168 = vmatprep.mubr.f32.mxu1 %v4565_v13  ;;  %3421 = vmatmul.mubr.msk.f32.gmra.mrb[78].mxu0 %vm714_vm2, %v1508_v32 }
 0x357   : >> { %v919_v36 = vpop.f32.mrb[14].mxu0  ;;  %v3928_v25 = vpop.eup %3927  ;;  %3947 = vpow2.f32 %v2343_v5  ;;  %v2471_v53 = vmul.f32 1.442695, %v1330_v0  ;;  %v3497_v29 = vpack.c.bf16 %v3926_v23, %v3918_v42  ;;  %1757 = vmatprep.mubr.f32.mxu0 %v4565_v13 }
 0x358   : >> { %v1332_v55 = vpop.f32.mrb[13].mxu1  ;;  %v2347_v38 = vmul.f32 1.442695, %v919_v36  ;;  %v921_v56 = vpop.f32.mrb[15].mxu0  ;;  %3949 = vpow2.f32 %v2345_v19  ;;  %v3563_v41 = vpack.c.bf16 %v3928_v25, %v5164_v60 }
 0x359   : >> { %v3930_v37 = vpop.eup %3929  ;;  %v2473_v40 = vmul.f32 1.442695, %v1332_v55  ;;  %v2349_v8 = vmul.f32 1.442695, %v921_v56  ;;  %3951 = vpow2.f32 %v2471_v53  ;;  %3498 = vmatprep.subr.bf16.mxu0 %v3497_v29  ;;  %v1925_v27 = vpop.trf.xlu1 }
 0x35a   : >> { %v3932_v39 = vpop.eup %3931  ;;  %v3561_v58 = vpack.c.bf16 %v3930_v37, %v3922_v21  ;;  %v1509_v2 = vpop.trf.xlu0  ;;  %3500 = vmatpush1.bf16.xpose.msra.mxu0 %v3499_v33  ;;  %3453 = vmatmul.mubr.msk.f32.gmra.mrb[78].mxu1 %vm714_vm2, %v1925_v27 }
 0x35b   : >> { %v3934_v30 = vpop.eup %3933  ;;  %3953 = vpow2.f32 %v2473_v40  ;;  %v1336_v42 = vpop.f32.mrb[14].mxu1  ;;  %2174 = vmatprep.mubr.f32.mxu1 %v4565_v13  ;;  %3422 = vmatmul.mubr.msk.f32.gmra.mrb[80].mxu0 %vm714_vm2, %v1509_v2 }
 0x35c   : >> { %v925_v5 = vpop.f32.mrb[16].mxu0  ;;  %v5175_v59 = vpop.eup %3935  ;;  %3955 = vpow2.f32 %v2347_v38  ;;  %v2475_v60 = vmul.f32 1.442695, %v1336_v42  ;;  %3562 = vmatprep.subr.bf16.mxu1 %v3561_v58  ;;  %1763 = vmatprep.mubr.f32.mxu0 %v4565_v13 }
 0x35d   : >> { %v1338_v63 = vpop.f32.mrb[15].mxu1  ;;  %v2351_v19 = vmul.f32 1.442695, %v925_v5  ;;  %v927_v20 = vpop.f32.mrb[17].mxu0  ;;  %3957 = vpow2.f32 %v2349_v8  ;;  %3564 = vmatpush1.bf16.xpose.msra.mxu1 %v3563_v41 }
 0x35e   : >> { %v3938_v21 = vpop.eup %3937  ;;  %v2477_v16 = vmul.f32 1.442695, %v1338_v63  ;;  %v2353_v32 = vmul.f32 1.442695, %v927_v20  ;;  %3959 = vpow2.f32 %v2475_v60  ;;  %v1926_v0 = vpop.trf.xlu1 }
 0x35f   : >> { %v3940_v23 = vpop.eup %3939  ;;  %v1510_v36 = vpop.trf.xlu0  ;;  %3454 = vmatmul.mubr.msk.f32.gmra.mrb[80].mxu1 %vm714_vm2, %v1926_v0 }
 0x360   : >> { %v3942_v33 = vpop.eup %3941  ;;  %3961 = vpow2.f32 %v2477_v16  ;;  %v1342_v25 = vpop.f32.mrb[16].mxu1  ;;  %v3503_v55 = vpack.c.bf16 %v3940_v23, %v3932_v39  ;;  %2180 = vmatprep.mubr.f32.mxu1 %v4565_v13  ;;  %3423 = vmatmul.mubr.msk.f32.gmra.mrb[82].mxu0 %vm714_vm2, %v1510_v36 }
 0x361   : >> { %v931_v53 = vpop.f32.mrb[18].mxu0  ;;  %v3944_v38 = vpop.eup %3943  ;;  %3963 = vpow2.f32 %v2351_v19  ;;  %v2479_v56 = vmul.f32 1.442695, %v1342_v25  ;;  %v3501_v8 = vpack.c.bf16 %v3942_v33, %v3934_v30  ;;  %1769 = vmatprep.mubr.f32.mxu0 %v4565_v13 }
 0x362   : >> { %v1344_v29 = vpop.f32.mrb[17].mxu1  ;;  %v2355_v37 = vmul.f32 1.442695, %v931_v53  ;;  %v933_v40 = vpop.f32.mrb[19].mxu0  ;;  %3965 = vpow2.f32 %v2353_v32  ;;  %v3567_v2 = vpack.c.bf16 %v3944_v38, %v5175_v59 }
 0x363   : >> { %v3946_v41 = vpop.eup %3945  ;;  %v2481_v58 = vmul.f32 1.442695, %v1344_v29  ;;  %v2357_v27 = vmul.f32 1.442695, %v933_v40  ;;  %3967 = vpow2.f32 %v2479_v56  ;;  %3502 = vmatprep.subr.bf16.mxu0 %v3501_v8  ;;  %v1927_v5 = vpop.trf.xlu1 }
 0x364   : >> { %v3948_v39 = vpop.eup %3947  ;;  %v3565_v42 = vpack.c.bf16 %v3946_v41, %v3938_v21  ;;  %v1511_v60 = vpop.trf.xlu0  ;;  %3504 = vmatpush1.bf16.xpose.msra.mxu0 %v3503_v55  ;;  %3455 = vmatmul.mubr.msk.f32.gmra.mrb[82].mxu1 %vm714_vm2, %v1927_v5 }
 0x365   : >> { %v3950_v63 = vpop.eup %3949  ;;  %3969 = vpow2.f32 %v2481_v58  ;;  %v1348_v30 = vpop.f32.mrb[18].mxu1  ;;  %2186 = vmatprep.mubr.f32.mxu1 %v4565_v13  ;;  %3424 = vmatmul.mubr.msk.f32.gmra.mrb[84].mxu0 %vm714_vm2, %v1511_v60 }
 0x366   : >> { %v937_v19 = vpop.f32.mrb[20].mxu0  ;;  %v5186_v20 = vpop.eup %3951  ;;  %3971 = vpow2.f32 %v2355_v37  ;;  %v2483_v59 = vmul.f32 1.442695, %v1348_v30  ;;  %3566 = vmatprep.subr.bf16.mxu1 %v3565_v42  ;;  %1775 = vmatprep.mubr.f32.mxu0 %v4565_v13 }
 0x367   : >> { %v1350_v16 = vpop.f32.mrb[19].mxu1  ;;  %v2359_v32 = vmul.f32 1.442695, %v937_v19  ;;  %v939_v23 = vpop.f32.mrb[21].mxu0  ;;  %3973 = vpow2.f32 %v2357_v27  ;;  %3568 = vmatpush1.bf16.xpose.msra.mxu1 %v3567_v2 }
 0x368   : >> { %v3954_v21 = vpop.eup %3953  ;;  %v2485_v0 = vmul.f32 1.442695, %v1350_v16  ;;  %v2361_v36 = vmul.f32 1.442695, %v939_v23  ;;  %3975 = vpow2.f32 %v2483_v59  ;;  %v1928_v25 = vpop.trf.xlu1 }
 0x369   : >> { %v3956_v33 = vpop.eup %3955  ;;  %v1512_v53 = vpop.trf.xlu0  ;;  %3456 = vmatmul.mubr.msk.f32.gmra.mrb[84].mxu1 %vm714_vm2, %v1928_v25 }
 0x36a   : >> { %v3958_v55 = vpop.eup %3957  ;;  %3977 = vpow2.f32 %v2485_v0  ;;  %v1354_v38 = vpop.f32.mrb[20].mxu1  ;;  %v3507_v29 = vpack.c.bf16 %v3956_v33, %v3948_v39  ;;  %2192 = vmatprep.mubr.f32.mxu1 %v4565_v13  ;;  %3425 = vmatmul.mubr.msk.f32.gmra.mrb[86].mxu0 %vm714_vm2, %v1512_v53 }
 0x36b   : >> { %v943_v56 = vpop.f32.mrb[22].mxu0  ;;  %v3960_v37 = vpop.eup %3959  ;;  %3979 = vpow2.f32 %v2359_v32  ;;  %v2487_v40 = vmul.f32 1.442695, %v1354_v38  ;;  %v3505_v27 = vpack.c.bf16 %v3958_v55, %v3950_v63  ;;  %1781 = vmatprep.mubr.f32.mxu0 %v4565_v13 }
 0x36c   : >> { %v1356_v8 = vpop.f32.mrb[21].mxu1  ;;  %v2363_v41 = vmul.f32 1.442695, %v943_v56  ;;  %v945_v58 = vpop.f32.mrb[23].mxu0  ;;  %3981 = vpow2.f32 %v2361_v36  ;;  %v3571_v60 = vpack.c.bf16 %v3960_v37, %v5186_v20 }
 0x36d   : >> { %v3962_v2 = vpop.eup %3961  ;;  %v2489_v42 = vmul.f32 1.442695, %v1356_v8  ;;  %v2365_v5 = vmul.f32 1.442695, %v945_v58  ;;  %3983 = vpow2.f32 %v2487_v40  ;;  %3506 = vmatprep.subr.bf16.mxu0 %v3505_v27  ;;  %v1929_v19 = vpop.trf.xlu1 }
 0x36e   : >> { %v3964_v39 = vpop.eup %3963  ;;  %v3569_v30 = vpack.c.bf16 %v3962_v2, %v3954_v21  ;;  %v1513_v59 = vpop.trf.xlu0  ;;  %3508 = vmatpush1.bf16.xpose.msra.mxu0 %v3507_v29  ;;  %3457 = vmatmul.mubr.msk.f32.gmra.mrb[86].mxu1 %vm714_vm2, %v1929_v19 }
 0x36f   : >> { %v3966_v16 = vpop.eup %3965  ;;  %3985 = vpow2.f32 %v2489_v42  ;;  %v1360_v63 = vpop.f32.mrb[22].mxu1  ;;  %2198 = vmatprep.mubr.f32.mxu1 %v4565_v13  ;;  %3426 = vmatmul.mubr.msk.f32.gmra.mrb[88].mxu0 %vm714_vm2, %v1513_v59 }
 0x370   : >> { %v949_v32 = vpop.f32.mrb[24].mxu0  ;;  %v5197_v23 = vpop.eup %3967  ;;  %3987 = vpow2.f32 %v2363_v41  ;;  %v2491_v20 = vmul.f32 1.442695, %v1360_v63  ;;  %3570 = vmatprep.subr.bf16.mxu1 %v3569_v30  ;;  %1787 = vmatprep.mubr.f32.mxu0 %v4565_v13 }
 0x371   : >> { %v1362_v0 = vpop.f32.mrb[23].mxu1  ;;  %v2367_v36 = vmul.f32 1.442695, %v949_v32  ;;  %v951_v33 = vpop.f32.mrb[25].mxu0  ;;  %3989 = vpow2.f32 %v2365_v5  ;;  %3572 = vmatpush1.bf16.xpose.msra.mxu1 %v3571_v60 }
 0x372   : >> { %v3970_v21 = vpop.eup %3969  ;;  %v2493_v25 = vmul.f32 1.442695, %v1362_v0  ;;  %v2369_v53 = vmul.f32 1.442695, %v951_v33  ;;  %3991 = vpow2.f32 %v2491_v20  ;;  %v1930_v38 = vpop.trf.xlu1 }
 0x373   : >> { %v3972_v55 = vpop.eup %3971  ;;  %v1514_v56 = vpop.trf.xlu0  ;;  %3458 = vmatmul.mubr.msk.f32.gmra.mrb[88].mxu1 %vm714_vm2, %v1930_v38 }
 0x374   : >> { %v3974_v29 = vpop.eup %3973  ;;  %3993 = vpow2.f32 %v2493_v25  ;;  %v1366_v37 = vpop.f32.mrb[24].mxu1  ;;  %v3511_v8 = vpack.c.bf16 %v3972_v55, %v3964_v39  ;;  %2204 = vmatprep.mubr.f32.mxu1 %v4565_v13  ;;  %3427 = vmatmul.mubr.msk.f32.gmra.mrb[90].mxu0 %vm714_vm2, %v1514_v56 }
 0x375   : >> { %v955_v40 = vpop.f32.mrb[26].mxu0  ;;  %v3976_v41 = vpop.eup %3975  ;;  %3995 = vpow2.f32 %v2367_v36  ;;  %v2495_v58 = vmul.f32 1.442695, %v1366_v37  ;;  %v3509_v5 = vpack.c.bf16 %v3974_v29, %v3966_v16  ;;  %1793 = vmatprep.mubr.f32.mxu0 %v4565_v13 }
 0x376   : >> { %v1368_v27 = vpop.f32.mrb[25].mxu1  ;;  %v2371_v2 = vmul.f32 1.442695, %v955_v40  ;;  %v957_v42 = vpop.f32.mrb[27].mxu0  ;;  %3997 = vpow2.f32 %v2369_v53  ;;  %v3575_v59 = vpack.c.bf16 %v3976_v41, %v5197_v23 }
 0x377   : >> { %v3978_v60 = vpop.eup %3977  ;;  %v2497_v30 = vmul.f32 1.442695, %v1368_v27  ;;  %v2373_v19 = vmul.f32 1.442695, %v957_v42  ;;  %3999 = vpow2.f32 %v2495_v58  ;;  %3510 = vmatprep.subr.bf16.mxu0 %v3509_v5  ;;  %v1931_v32 = vpop.trf.xlu1 }
 0x378   : >> { %v3980_v39 = vpop.eup %3979  ;;  %v3573_v63 = vpack.c.bf16 %v3978_v60, %v3970_v21  ;;  %v1515_v20 = vpop.trf.xlu0  ;;  %3512 = vmatpush1.bf16.xpose.msra.mxu0 %v3511_v8  ;;  %3459 = vmatmul.mubr.msk.f32.gmra.mrb[90].mxu1 %vm714_vm2, %v1931_v32 }
 0x379   : >> { %v3982_v0 = vpop.eup %3981  ;;  %4001 = vpow2.f32 %v2497_v30  ;;  %v1372_v16 = vpop.f32.mrb[26].mxu1  ;;  %2210 = vmatprep.mubr.f32.mxu1 %v4565_v13  ;;  %3428 = vmatmul.mubr.msk.f32.gmra.mrb[92].mxu0 %vm714_vm2, %v1515_v20 }
 0x37a   : >> { %v961_v36 = vpop.f32.mrb[28].mxu0  ;;  %v5208_v33 = vpop.eup %3983  ;;  %v2499_v23 = vmul.f32 1.442695, %v1372_v16  ;;  %4003 = vpow2.f32 %v2371_v2  ;;  %3574 = vmatprep.subr.bf16.mxu1 %v3573_v63  ;;  %1799 = vmatprep.mubr.f32.mxu0 %v4565_v13 }
 0x37b   : >> { %v1374_v25 = vpop.f32.mrb[27].mxu1  ;;  %v2375_v53 = vmul.f32 1.442695, %v961_v36  ;;  %v963_v55 = vpop.f32.mrb[29].mxu0  ;;  %4005 = vpow2.f32 %v2373_v19  ;;  %3576 = vmatpush1.bf16.xpose.msra.mxu1 %v3575_v59 }
 0x37c   : >> { %v3986_v21 = vpop.eup %3985  ;;  %v2501_v38 = vmul.f32 1.442695, %v1374_v25  ;;  %v2377_v56 = vmul.f32 1.442695, %v963_v55  ;;  %4007 = vpow2.f32 %v2499_v23  ;;  %v1932_v37 = vpop.trf.xlu1 }
 0x37d   : >> { %v3988_v29 = vpop.eup %3987  ;;  %v1516_v40 = vpop.trf.xlu0  ;;  %3460 = vmatmul.mubr.msk.f32.gmra.mrb[92].mxu1 %vm714_vm2, %v1932_v37 }
 0x37e   : >> { %v3990_v8 = vpop.eup %3989  ;;  %4009 = vpow2.f32 %v2501_v38  ;;  %v1378_v41 = vpop.f32.mrb[28].mxu1  ;;  %v3515_v27 = vpack.c.bf16 %v3988_v29, %v3980_v39  ;;  %2216 = vmatprep.mubr.f32.mxu1 %v4565_v13  ;;  %3429 = vmatmul.mubr.msk.f32.gmra.mrb[94].mxu0 %vm714_vm2, %v1516_v40 }
 0x37f   : >> { %v967_v58 = vpop.f32.mrb[30].mxu0  ;;  %v3992_v2 = vpop.eup %3991  ;;  %4011 = vpow2.f32 %v2375_v53  ;;  %v2503_v42 = vmul.f32 1.442695, %v1378_v41  ;;  %v3513_v19 = vpack.c.bf16 %v3990_v8, %v3982_v0  ;;  %1805 = vmatprep.mubr.f32.mxu0 %v4565_v13 }
 0x380   : >> { %v1380_v5 = vpop.f32.mrb[29].mxu1  ;;  %v2379_v60 = vmul.f32 1.442695, %v967_v58  ;;  %v969_v30 = vpop.f32.mrb[31].mxu0  ;;  %4013 = vpow2.f32 %v2377_v56  ;;  %v3579_v20 = vpack.c.bf16 %v3992_v2, %v5208_v33 }
 0x381   : >> { %v3994_v59 = vpop.eup %3993  ;;  %v2505_v63 = vmul.f32 1.442695, %v1380_v5  ;;  %v2381_v32 = vmul.f32 1.442695, %v969_v30  ;;  %4015 = vpow2.f32 %v2503_v42  ;;  %3514 = vmatprep.subr.bf16.mxu0 %v3513_v19  ;;  %v1933_v36 = vpop.trf.xlu1 }
 0x382   : >> { %v3996_v39 = vpop.eup %3995  ;;  %v3577_v16 = vpack.c.bf16 %v3994_v59, %v3986_v21  ;;  %v1533_v23 = vpop.trf.xlu0  ;;  %3516 = vmatpush1.bf16.xpose.msra.mxu0 %v3515_v27  ;;  %3461 = vmatmul.mubr.msk.f32.gmra.mrb[94].mxu1 %vm714_vm2, %v1933_v36 }
 0x383   : >> { %v3998_v25 = vpop.eup %3997  ;;  %4017 = vpow2.f32 %v2505_v63  ;;  %v1384_v0 = vpop.f32.mrb[30].mxu1  ;;  %2222 = vmatprep.mubr.f32.mxu1 %v4565_v13  ;;  %3430 = vmatmul.mubr.msk.f32.gmra.mrb[96].mxu0 %vm714_vm2, %v1533_v23 }
 0x384   : >> { %v973_v53 = vpop.f32.mrb[32].mxu0  ;;  %v5219_v55 = vpop.eup %3999  ;;  %v2507_v33 = vmul.f32 1.442695, %v1384_v0  ;;  %4019 = vpow2.f32 %v2379_v60  ;;  %3578 = vmatprep.subr.bf16.mxu1 %v3577_v16  ;;  %1811 = vmatprep.mubr.f32.mxu0 %v4565_v13 }
 0x385   : >> { %v1386_v38 = vpop.f32.mrb[31].mxu1  ;;  %v2383_v56 = vmul.f32 1.442695, %v973_v53  ;;  %v975_v29 = vpop.f32.mrb[33].mxu0  ;;  %4021 = vpow2.f32 %v2381_v32  ;;  %3580 = vmatpush1.bf16.xpose.msra.mxu1 %v3579_v20 }
 0x386   : >> { %v4002_v21 = vpop.eup %4001  ;;  %v2509_v37 = vmul.f32 1.442695, %v1386_v38  ;;  %v2385_v40 = vmul.f32 1.442695, %v975_v29  ;;  %4023 = vpow2.f32 %v2507_v33  ;;  %v1950_v41 = vpop.trf.xlu1 }
 0x387   : >> { %v4004_v8 = vpop.eup %4003  ;;  %v1534_v58 = vpop.trf.xlu0  ;;  %3462 = vmatmul.mubr.msk.f32.gmra.mrb[96].mxu1 %vm714_vm2, %v1950_v41 }
 0x388   : >> { %v4006_v27 = vpop.eup %4005  ;;  %4025 = vpow2.f32 %v2509_v37  ;;  %v1390_v2 = vpop.f32.mrb[32].mxu1  ;;  %v3519_v5 = vpack.c.bf16 %v4004_v8, %v3996_v39  ;;  %2228 = vmatprep.mubr.f32.mxu1 %v4565_v13  ;;  %3431 = vmatmul.mubr.msk.f32.gmra.mrb[98].mxu0 %vm714_vm2, %v1534_v58 }
 0x389   : >> { %v979_v42 = vpop.f32.mrb[34].mxu0  ;;  %v4008_v60 = vpop.eup %4007  ;;  %4027 = vpow2.f32 %v2383_v56  ;;  %v2511_v30 = vmul.f32 1.442695, %v1390_v2  ;;  %v3517_v32 = vpack.c.bf16 %v4006_v27, %v3998_v25  ;;  %1817 = vmatprep.mubr.f32.mxu0 %v4565_v13 }
 0x38a   : >> { %v1392_v19 = vpop.f32.mrb[33].mxu1  ;;  %v2387_v59 = vmul.f32 1.442695, %v979_v42  ;;  %v981_v63 = vpop.f32.mrb[35].mxu0  ;;  %4029 = vpow2.f32 %v2385_v40  ;;  %v3583_v23 = vpack.c.bf16 %v4008_v60, %v5219_v55 }
 0x38b   : >> { %v4010_v20 = vpop.eup %4009  ;;  %v2513_v16 = vmul.f32 1.442695, %v1392_v19  ;;  %v2389_v36 = vmul.f32 1.442695, %v981_v63  ;;  %4031 = vpow2.f32 %v2511_v30  ;;  %3518 = vmatprep.subr.bf16.mxu0 %v3517_v32  ;;  %v1951_v53 = vpop.trf.xlu1 }
 0x38c   : >> { %v4012_v39 = vpop.eup %4011  ;;  %v3581_v0 = vpack.c.bf16 %v4010_v20, %v4002_v21  ;;  %v1535_v33 = vpop.trf.xlu0  ;;  %3520 = vmatpush1.bf16.xpose.msra.mxu0 %v3519_v5  ;;  %3463 = vmatmul.mubr.msk.f32.gmra.mrb[98].mxu1 %vm714_vm2, %v1951_v53 }
 0x38d   : >> { %v4014_v38 = vpop.eup %4013  ;;  %4033 = vpow2.f32 %v2513_v16  ;;  %v1396_v25 = vpop.f32.mrb[34].mxu1  ;;  %2234 = vmatprep.mubr.f32.mxu1 %v4565_v13  ;;  %3432 = vmatmul.mubr.msk.f32.gmra.mrb[100].mxu0 %vm714_vm2, %v1535_v33 }
 0x38e   : >> { %v985_v56 = vpop.f32.mrb[36].mxu0  ;;  %v5230_v29 = vpop.eup %4015  ;;  %v2515_v55 = vmul.f32 1.442695, %v1396_v25  ;;  %4035 = vpow2.f32 %v2387_v59  ;;  %3582 = vmatprep.subr.bf16.mxu1 %v3581_v0  ;;  %1823 = vmatprep.mubr.f32.mxu0 %v4565_v13 }
 0x38f   : >> { %v1398_v37 = vpop.f32.mrb[35].mxu1  ;;  %v2391_v40 = vmul.f32 1.442695, %v985_v56  ;;  %v987_v8 = vpop.f32.mrb[37].mxu0  ;;  %4037 = vpow2.f32 %v2389_v36  ;;  %3584 = vmatpush1.bf16.xpose.msra.mxu1 %v3583_v23 }
 0x390   : >> { %v4018_v21 = vpop.eup %4017  ;;  %v2517_v41 = vmul.f32 1.442695, %v1398_v37  ;;  %v2393_v58 = vmul.f32 1.442695, %v987_v8  ;;  %4039 = vpow2.f32 %v2515_v55  ;;  %v1952_v2 = vpop.trf.xlu1 }
 0x391   : >> { %v4020_v27 = vpop.eup %4019  ;;  %v1536_v42 = vpop.trf.xlu0  ;;  %3464 = vmatmul.mubr.msk.f32.gmra.mrb[100].mxu1 %vm714_vm2, %v1952_v2 }
 0x392   : >> { %v4022_v5 = vpop.eup %4021  ;;  %4041 = vpow2.f32 %v2517_v41  ;;  %v1402_v60 = vpop.f32.mrb[36].mxu1  ;;  %v3523_v19 = vpack.c.bf16 %v4020_v27, %v4012_v39  ;;  %2240 = vmatprep.mubr.f32.mxu1 %v4565_v13  ;;  %3433 = vmatmul.mubr.msk.f32.gmra.mrb[102].mxu0 %vm714_vm2, %v1536_v42 }
 0x393   : >> { %v991_v30 = vpop.f32.mrb[38].mxu0  ;;  %v4024_v59 = vpop.eup %4023  ;;  %4043 = vpow2.f32 %v2391_v40  ;;  %v2519_v63 = vmul.f32 1.442695, %v1402_v60  ;;  %v3521_v36 = vpack.c.bf16 %v4022_v5, %v4014_v38  ;;  %1829 = vmatprep.mubr.f32.mxu0 %v4565_v13 }
 0x394   : >> { %v1404_v32 = vpop.f32.mrb[37].mxu1  ;;  %v2395_v20 = vmul.f32 1.442695, %v991_v30  ;;  %v993_v16 = vpop.f32.mrb[39].mxu0  ;;  %4045 = vpow2.f32 %v2393_v58  ;;  %v3587_v33 = vpack.c.bf16 %v4024_v59, %v5230_v29 }
 0x395   : >> { %v4026_v23 = vpop.eup %4025  ;;  %v2521_v0 = vmul.f32 1.442695, %v1404_v32  ;;  %v2397_v53 = vmul.f32 1.442695, %v993_v16  ;;  %4047 = vpow2.f32 %v2519_v63  ;;  %3522 = vmatprep.subr.bf16.mxu0 %v3521_v36  ;;  %v1953_v56 = vpop.trf.xlu1 }
 0x396   : >> { %v4028_v39 = vpop.eup %4027  ;;  %v3585_v25 = vpack.c.bf16 %v4026_v23, %v4018_v21  ;;  %v1537_v55 = vpop.trf.xlu0  ;;  %3524 = vmatpush1.bf16.xpose.msra.mxu0 %v3523_v19  ;;  %3465 = vmatmul.mubr.msk.f32.gmra.mrb[102].mxu1 %vm714_vm2, %v1953_v56 }
 0x397   : >> { %v4030_v37 = vpop.eup %4029  ;;  %4049 = vpow2.f32 %v2521_v0  ;;  %v1408_v38 = vpop.f32.mrb[38].mxu1  ;;  %2246 = vmatprep.mubr.f32.mxu1 %v4565_v13  ;;  %3434 = vmatmul.mubr.msk.f32.gmra.mrb[104].mxu0 %vm714_vm2, %v1537_v55 }
 0x398   : >> { %v997_v40 = vpop.f32.mrb[40].mxu0  ;;  %v5241_v8 = vpop.eup %4031  ;;  %v2523_v29 = vmul.f32 1.442695, %v1408_v38  ;;  %4051 = vpow2.f32 %v2395_v20  ;;  %3586 = vmatprep.subr.bf16.mxu1 %v3585_v25  ;;  %1835 = vmatprep.mubr.f32.mxu0 %v4565_v13 }
 0x399   : >> { %v1410_v41 = vpop.f32.mrb[39].mxu1  ;;  %v2399_v58 = vmul.f32 1.442695, %v997_v40  ;;  %v999_v27 = vpop.f32.mrb[41].mxu0  ;;  %4053 = vpow2.f32 %v2397_v53  ;;  %3588 = vmatpush1.bf16.xpose.msra.mxu1 %v3587_v33 }
 0x39a   : >> { %v4034_v21 = vpop.eup %4033  ;;  %v2525_v2 = vmul.f32 1.442695, %v1410_v41  ;;  %v2401_v42 = vmul.f32 1.442695, %v999_v27  ;;  %4055 = vpow2.f32 %v2523_v29  ;;  %v1954_v60 = vpop.trf.xlu1 }
 0x39b   : >> { %v4036_v5 = vpop.eup %4035  ;;  %v1538_v30 = vpop.trf.xlu0  ;;  %3466 = vmatmul.mubr.msk.f32.gmra.mrb[104].mxu1 %vm714_vm2, %v1954_v60 }
 0x39c   : >> { %v4038_v19 = vpop.eup %4037  ;;  %4057 = vpow2.f32 %v2525_v2  ;;  %v1414_v59 = vpop.f32.mrb[40].mxu1  ;;  %v3527_v32 = vpack.c.bf16 %v4036_v5, %v4028_v39  ;;  %2252 = vmatprep.mubr.f32.mxu1 %v4565_v13  ;;  %3435 = vmatmul.mubr.msk.f32.gmra.mrb[106].mxu0 %vm714_vm2, %v1538_v30 }
 0x39d   : >> { %v1003_v63 = vpop.f32.mrb[42].mxu0  ;;  %v4040_v20 = vpop.eup %4039  ;;  %4059 = vpow2.f32 %v2399_v58  ;;  %v2527_v16 = vmul.f32 1.442695, %v1414_v59  ;;  %v3525_v53 = vpack.c.bf16 %v4038_v19, %v4030_v37  ;;  %1841 = vmatprep.mubr.f32.mxu0 %v4565_v13 }
 0x39e   : >> { %v1416_v36 = vpop.f32.mrb[41].mxu1  ;;  %v2403_v23 = vmul.f32 1.442695, %v1003_v63  ;;  %v1005_v0 = vpop.f32.mrb[43].mxu0  ;;  %4061 = vpow2.f32 %v2401_v42  ;;  %v3591_v55 = vpack.c.bf16 %v4040_v20, %v5241_v8 }
 0x39f   : >> { %v4042_v33 = vpop.eup %4041  ;;  %v2529_v25 = vmul.f32 1.442695, %v1416_v36  ;;  %v2405_v56 = vmul.f32 1.442695, %v1005_v0  ;;  %4063 = vpow2.f32 %v2527_v16  ;;  %3526 = vmatprep.subr.bf16.mxu0 %v3525_v53  ;;  %v1955_v40 = vpop.trf.xlu1 }
 0x3a0   : >> { %v4044_v39 = vpop.eup %4043  ;;  %v3589_v38 = vpack.c.bf16 %v4042_v33, %v4034_v21  ;;  %v1539_v29 = vpop.trf.xlu0  ;;  %3528 = vmatpush1.bf16.xpose.msra.mxu0 %v3527_v32  ;;  %3467 = vmatmul.mubr.msk.f32.gmra.mrb[106].mxu1 %vm714_vm2, %v1955_v40 }
 0x3a1   : >> { %v4046_v41 = vpop.eup %4045  ;;  %4065 = vpow2.f32 %v2529_v25  ;;  %v1420_v37 = vpop.f32.mrb[42].mxu1  ;;  %2258 = vmatprep.mubr.f32.mxu1 %v4565_v13  ;;  %3436 = vmatmul.mubr.msk.f32.gmra.mrb[108].mxu0 %vm714_vm2, %v1539_v29 }
 0x3a2   : >> { %v1009_v58 = vpop.f32.mrb[44].mxu0  ;;  %v5252_v27 = vpop.eup %4047  ;;  %v2531_v8 = vmul.f32 1.442695, %v1420_v37  ;;  %4067 = vpow2.f32 %v2403_v23  ;;  %3590 = vmatprep.subr.bf16.mxu1 %v3589_v38  ;;  %1847 = vmatprep.mubr.f32.mxu0 %v4565_v13 }
 0x3a3   : >> { %v1422_v2 = vpop.f32.mrb[43].mxu1  ;;  %v2407_v42 = vmul.f32 1.442695, %v1009_v58  ;;  %v1011_v5 = vpop.f32.mrb[45].mxu0  ;;  %4069 = vpow2.f32 %v2405_v56  ;;  %3592 = vmatpush1.bf16.xpose.msra.mxu1 %v3591_v55 }
 0x3a4   : >> { %v4050_v21 = vpop.eup %4049  ;;  %v2533_v60 = vmul.f32 1.442695, %v1422_v2  ;;  %v2409_v30 = vmul.f32 1.442695, %v1011_v5  ;;  %4071 = vpow2.f32 %v2531_v8  ;;  %v1956_v59 = vpop.trf.xlu1 }
 0x3a5   : >> { %v4052_v19 = vpop.eup %4051  ;;  %v1540_v63 = vpop.trf.xlu0  ;;  %3468 = vmatmul.mubr.msk.f32.gmra.mrb[108].mxu1 %vm714_vm2, %v1956_v59 }
 0x3a6   : >> { %v4054_v32 = vpop.eup %4053  ;;  %4073 = vpow2.f32 %v2533_v60  ;;  %v1426_v20 = vpop.f32.mrb[44].mxu1  ;;  %v3531_v36 = vpack.c.bf16 %v4052_v19, %v4044_v39  ;;  %2264 = vmatprep.mubr.f32.mxu1 %v4565_v13  ;;  %3437 = vmatmul.mubr.msk.f32.gmra.mrb[110].mxu0 %vm714_vm2, %v1540_v63 }
 0x3a7   : >> { %v1015_v16 = vpop.f32.mrb[46].mxu0  ;;  %v4056_v23 = vpop.eup %4055  ;;  %4075 = vpow2.f32 %v2407_v42  ;;  %v2535_v0 = vmul.f32 1.442695, %v1426_v20  ;;  %v3529_v56 = vpack.c.bf16 %v4054_v32, %v4046_v41  ;;  %1853 = vmatprep.mubr.f32.mxu0 %v4565_v13 }
 0x3a8   : >> { %v1428_v53 = vpop.f32.mrb[45].mxu1  ;;  %v2411_v33 = vmul.f32 1.442695, %v1015_v16  ;;  %v1017_v25 = vpop.f32.mrb[47].mxu0  ;;  %4077 = vpow2.f32 %v2409_v30  ;;  %v3595_v29 = vpack.c.bf16 %v4056_v23, %v5252_v27 }
 0x3a9   : >> { %v4058_v55 = vpop.eup %4057  ;;  %v2537_v38 = vmul.f32 1.442695, %v1428_v53  ;;  %v2413_v40 = vmul.f32 1.442695, %v1017_v25  ;;  %4079 = vpow2.f32 %v2535_v0  ;;  %3530 = vmatprep.subr.bf16.mxu0 %v3529_v56  ;;  %v1957_v58 = vpop.trf.xlu1 }
 0x3aa   : >> { %v4060_v39 = vpop.eup %4059  ;;  %v3593_v37 = vpack.c.bf16 %v4058_v55, %v4050_v21  ;;  %v1541_v8 = vpop.trf.xlu0  ;;  %3532 = vmatpush1.bf16.xpose.msra.mxu0 %v3531_v36  ;;  %3469 = vmatmul.mubr.msk.f32.gmra.mrb[110].mxu1 %vm714_vm2, %v1957_v58 }
 0x3ab   : >> { %v4062_v2 = vpop.eup %4061  ;;  %4081 = vpow2.f32 %v2537_v38  ;;  %v1432_v41 = vpop.f32.mrb[46].mxu1  ;;  %2270 = vmatprep.mubr.f32.mxu1 %v4565_v13  ;;  %3438 = vmatmul.mubr.msk.f32.gmra.mrb[112].mxu0 %vm714_vm2, %v1541_v8 }
 0x3ac   : >> { %v1021_v42 = vpop.f32.mrb[48].mxu0  ;;  %v5263_v5 = vpop.eup %4063  ;;  %v2539_v27 = vmul.f32 1.442695, %v1432_v41  ;;  %4083 = vpow2.f32 %v2411_v33  ;;  %3594 = vmatprep.subr.bf16.mxu1 %v3593_v37  ;;  %1859 = vmatprep.mubr.f32.mxu0 %v4565_v13 }
 0x3ad   : >> { %v1434_v60 = vpop.f32.mrb[47].mxu1  ;;  %v2415_v30 = vmul.f32 1.442695, %v1021_v42  ;;  %v1023_v19 = vpop.f32.mrb[49].mxu0  ;;  %4085 = vpow2.f32 %v2413_v40  ;;  %3596 = vmatpush1.bf16.xpose.msra.mxu1 %v3595_v29 }
 0x3ae   : >> { %v4066_v21 = vpop.eup %4065  ;;  %v2541_v59 = vmul.f32 1.442695, %v1434_v60  ;;  %v2417_v63 = vmul.f32 1.442695, %v1023_v19  ;;  %4087 = vpow2.f32 %v2539_v27  ;;  %v1958_v20 = vpop.trf.xlu1 }
 0x3af   : >> { %v4068_v32 = vpop.eup %4067  ;;  %v1542_v16 = vpop.trf.xlu0  ;;  %3470 = vmatmul.mubr.msk.f32.gmra.mrb[112].mxu1 %vm714_vm2, %v1958_v20 }
 0x3b0   : >> { %v4070_v36 = vpop.eup %4069  ;;  %4089 = vpow2.f32 %v2541_v59  ;;  %v1438_v23 = vpop.f32.mrb[48].mxu1  ;;  %v3535_v53 = vpack.c.bf16 %v4068_v32, %v4060_v39  ;;  %2276 = vmatprep.mubr.f32.mxu1 %v4565_v13  ;;  %3439 = vmatmul.mubr.msk.f32.gmra.mrb[114].mxu0 %vm714_vm2, %v1542_v16 }
 0x3b1   : >> { %v1027_v0 = vpop.f32.mrb[50].mxu0  ;;  %v4072_v33 = vpop.eup %4071  ;;  %4091 = vpow2.f32 %v2415_v30  ;;  %v2543_v25 = vmul.f32 1.442695, %v1438_v23  ;;  %v3533_v40 = vpack.c.bf16 %v4070_v36, %v4062_v2  ;;  %1865 = vmatprep.mubr.f32.mxu0 %v4565_v13 }
 0x3b2   : >> { %v1440_v56 = vpop.f32.mrb[49].mxu1  ;;  %v2419_v55 = vmul.f32 1.442695, %v1027_v0  ;;  %v1029_v38 = vpop.f32.mrb[51].mxu0  ;;  %4093 = vpow2.f32 %v2417_v63  ;;  %v3599_v8 = vpack.c.bf16 %v4072_v33, %v5263_v5 }
 0x3b3   : >> { %v4074_v29 = vpop.eup %4073  ;;  %v2545_v37 = vmul.f32 1.442695, %v1440_v56  ;;  %v2421_v58 = vmul.f32 1.442695, %v1029_v38  ;;  %4095 = vpow2.f32 %v2543_v25  ;;  %3534 = vmatprep.subr.bf16.mxu0 %v3533_v40  ;;  %v1959_v42 = vpop.trf.xlu1 }
 0x3b4   : >> { %v4076_v39 = vpop.eup %4075  ;;  %v3597_v41 = vpack.c.bf16 %v4074_v29, %v4066_v21  ;;  %v1543_v27 = vpop.trf.xlu0  ;;  %3536 = vmatpush1.bf16.xpose.msra.mxu0 %v3535_v53  ;;  %3471 = vmatmul.mubr.msk.f32.gmra.mrb[114].mxu1 %vm714_vm2, %v1959_v42 }
 0x3b5   : >> { %v4078_v60 = vpop.eup %4077  ;;  %4097 = vpow2.f32 %v2545_v37  ;;  %v1444_v2 = vpop.f32.mrb[50].mxu1  ;;  %2282 = vmatprep.mubr.f32.mxu1 %v4565_v13  ;;  %3440 = vmatmul.mubr.msk.f32.gmra.mrb[116].mxu0 %vm714_vm2, %v1543_v27 }
 0x3b6   : >> { %v1033_v30 = vpop.f32.mrb[52].mxu0  ;;  %v5274_v19 = vpop.eup %4079  ;;  %v2547_v5 = vmul.f32 1.442695, %v1444_v2  ;;  %4099 = vpow2.f32 %v2419_v55  ;;  %3598 = vmatprep.subr.bf16.mxu1 %v3597_v41  ;;  %1871 = vmatprep.mubr.f32.mxu0 %v4565_v13 }
 0x3b7   : >> { %v1446_v59 = vpop.f32.mrb[51].mxu1  ;;  %v2423_v63 = vmul.f32 1.442695, %v1033_v30  ;;  %v1035_v32 = vpop.f32.mrb[53].mxu0  ;;  %4101 = vpow2.f32 %v2421_v58  ;;  %3600 = vmatpush1.bf16.xpose.msra.mxu1 %v3599_v8 }
 0x3b8   : >> { %v4082_v21 = vpop.eup %4081  ;;  %v2549_v20 = vmul.f32 1.442695, %v1446_v59  ;;  %v2425_v16 = vmul.f32 1.442695, %v1035_v32  ;;  %4103 = vpow2.f32 %v2547_v5  ;;  %v1960_v23 = vpop.trf.xlu1 }
 0x3b9   : >> { %v4084_v36 = vpop.eup %4083  ;;  %v1544_v0 = vpop.trf.xlu0  ;;  %3472 = vmatmul.mubr.msk.f32.gmra.mrb[116].mxu1 %vm714_vm2, %v1960_v23 }
 0x3ba   : >> { %v4086_v53 = vpop.eup %4085  ;;  %4105 = vpow2.f32 %v2549_v20  ;;  %v1450_v33 = vpop.f32.mrb[52].mxu1  ;;  %v3539_v56 = vpack.c.bf16 %v4084_v36, %v4076_v39  ;;  %2288 = vmatprep.mubr.f32.mxu1 %v4565_v13  ;;  %3441 = vmatmul.mubr.msk.f32.gmra.mrb[118].mxu0 %vm714_vm2, %v1544_v0 }
 0x3bb   : >> { %v1039_v25 = vpop.f32.mrb[54].mxu0  ;;  %v4088_v55 = vpop.eup %4087  ;;  %4107 = vpow2.f32 %v2423_v63  ;;  %v2551_v38 = vmul.f32 1.442695, %v1450_v33  ;;  %v3537_v58 = vpack.c.bf16 %v4086_v53, %v4078_v60  ;;  %1877 = vmatprep.mubr.f32.mxu0 %v4565_v13 }
 0x3bc   : >> { %v1452_v40 = vpop.f32.mrb[53].mxu1  ;;  %v2427_v29 = vmul.f32 1.442695, %v1039_v25  ;;  %v1041_v37 = vpop.f32.mrb[55].mxu0  ;;  %4109 = vpow2.f32 %v2425_v16  ;;  %v3603_v27 = vpack.c.bf16 %v4088_v55, %v5274_v19 }
 0x3bd   : >> { %v4090_v8 = vpop.eup %4089  ;;  %v2553_v41 = vmul.f32 1.442695, %v1452_v40  ;;  %v2429_v42 = vmul.f32 1.442695, %v1041_v37  ;;  %4111 = vpow2.f32 %v2551_v38  ;;  %3538 = vmatprep.subr.bf16.mxu0 %v3537_v58  ;;  %v1961_v30 = vpop.trf.xlu1 }
 0x3be   : >> { %v5283_v39 = vpop.eup %4091  ;;  %v3601_v2 = vpack.c.bf16 %v4090_v8, %v4082_v21  ;;  %v1545_v5 = vpop.trf.xlu0  ;;  %3540 = vmatpush1.bf16.xpose.msra.mxu0 %v3539_v56  ;;  %3473 = vmatmul.mubr.msk.f32.gmra.mrb[118].mxu1 %vm714_vm2, %v1961_v30 }
 0x3bf   : >> { %v4094_v60 = vpop.eup %4093  ;;  %4113 = vpow2.f32 %v2553_v41  ;;  %v1456_v59 = vpop.f32.mrb[54].mxu1  ;;  %2294 = vmatprep.mubr.f32.mxu1 %v4565_v13  ;;  %3442 = vmatmul.mubr.msk.f32.gmra.mrb[120].mxu0 %vm714_vm2, %v1545_v5 }
 0x3c0   : >> { %v1045_v63 = vpop.f32.mrb[56].mxu0  ;;  %v5287_v32 = vpop.eup %4095  ;;  %v2555_v19 = vmul.f32 1.442695, %v1456_v59  ;;  %4115 = vpow2.f32 %v2427_v29  ;;  %3602 = vmatprep.subr.bf16.mxu1 %v3601_v2  ;;  %1883 = vmatprep.mubr.f32.mxu0 %v4565_v13 }
 0x3c1   : >> { %v1458_v20 = vpop.f32.mrb[55].mxu1  ;;  %v2431_v16 = vmul.f32 1.442695, %v1045_v63  ;;  %v1047_v36 = vpop.f32.mrb[57].mxu0  ;;  %4117 = vpow2.f32 %v2429_v42  ;;  %3604 = vmatpush1.bf16.xpose.msra.mxu1 %v3603_v27 }
 0x3c2   : >> { %v4098_v21 = vpop.eup %4097  ;;  %v2557_v23 = vmul.f32 1.442695, %v1458_v20  ;;  %v2433_v0 = vmul.f32 1.442695, %v1047_v36  ;;  %4119 = vpow2.f32 %v2555_v19  ;;  %v1962_v33 = vpop.trf.xlu1 }
 0x3c3   : >> { %v4100_v53 = vpop.eup %4099  ;;  %v1546_v25 = vpop.trf.xlu0  ;;  %3474 = vmatmul.mubr.msk.f32.gmra.mrb[120].mxu1 %vm714_vm2, %v1962_v33 }
 0x3c4   : >> { %v4102_v56 = vpop.eup %4101  ;;  %4121 = vpow2.f32 %v2557_v23  ;;  %v1462_v55 = vpop.f32.mrb[56].mxu1  ;;  %v3543_v40 = vpack.c.bf16 %v4100_v53, %v5283_v39  ;;  %2300 = vmatprep.mubr.f32.mxu1 %v4565_v13  ;;  %3443 = vmatmul.mubr.msk.f32.gmra.mrb[122].mxu0 %vm714_vm2, %v1546_v25 }
 0x3c5   : >> { %v1051_v38 = vpop.f32.mrb[58].mxu0  ;;  %v4104_v29 = vpop.eup %4103  ;;  %4123 = vpow2.f32 %v2431_v16  ;;  %v2559_v37 = vmul.f32 1.442695, %v1462_v55  ;;  %v3541_v42 = vpack.c.bf16 %v4102_v56, %v4094_v60  ;;  %1889 = vmatprep.mubr.f32.mxu0 %v4565_v13  ;;  %v543_v60 = vmul.f32 %v4892_v35, %v4807_v9 }
 0x3c6   : >> { %v1464_v58 = vpop.f32.mrb[57].mxu1  ;;  %v2435_v8 = vmul.f32 1.442695, %v1051_v38  ;;  %v1053_v41 = vpop.f32.mrb[59].mxu0  ;;  %4125 = vpow2.f32 %v2433_v0  ;;  %v3607_v5 = vpack.c.bf16 %v4104_v29, %v5287_v32  ;;  %v545_v32 = vmul.f32 %v4892_v35, %v4815_v17 }
 0x3c7   : >> { %v4106_v27 = vpop.eup %4105  ;;  %v2561_v2 = vmul.f32 1.442695, %v1464_v58  ;;  %v2437_v30 = vmul.f32 1.442695, %v1053_v41  ;;  %4127 = vpow2.f32 %v2559_v37  ;;  %3542 = vmatprep.subr.bf16.mxu0 %v3541_v42  ;;  %v1963_v63 = vpop.trf.xlu1  ;;  %v567_v37 = vadd.f32 %v543_v60, %v4783_v50 }
 0x3c8   : >> { %v5297_v39 = vpop.eup %4107  ;;  %v3605_v59 = vpack.c.bf16 %v4106_v27, %v4098_v21  ;;  %v1547_v19 = vpop.trf.xlu0  ;;  %3544 = vmatpush1.bf16.xpose.msra.mxu0 %v3543_v40  ;;  %3475 = vmatmul.mubr.msk.f32.gmra.mrb[122].mxu1 %vm714_vm2, %v1963_v63  ;;  %v569_v27 = vadd.f32 %v545_v32, %v4781_v49 }
 0x3c9   : >> { %v4110_v20 = vpop.eup %4109  ;;  %4129 = vpow2.f32 %v2561_v2  ;;  %v1468_v16 = vpop.f32.mrb[58].mxu1  ;;  %2306 = vmatprep.mubr.f32.mxu1 %v4565_v13  ;;  %3444 = vmatmul.mubr.msk.f32.gmra.mrb[124].mxu0 %vm714_vm2, %v1547_v19 }
 0x3ca   : >> { %v1057_v36 = vpop.f32.mrb[60].mxu0  ;;  %v4112_v23 = vpop.eup %4111  ;;  %v2563_v0 = vmul.f32 1.442695, %v1468_v16  ;;  %4131 = vpow2.f32 %v2435_v8  ;;  %3606 = vmatprep.subr.bf16.mxu1 %v3605_v59  ;;  %1895 = vmatprep.mubr.f32.mxu0 %v4565_v13 }
 0x3cb   : >> { %v1470_v21 = vpop.f32.mrb[59].mxu1  ;;  %v2439_v53 = vmul.f32 1.442695, %v1057_v36  ;;  %v1059_v33 = vpop.f32.mrb[61].mxu0  ;;  %4133 = vpow2.f32 %v2437_v30  ;;  %3608 = vmatpush1.bf16.xpose.msra.mxu1 %v3607_v5 }
 0x3cc   : >> { %v4114_v25 = vpop.eup %4113  ;;  %v2565_v56 = vmul.f32 1.442695, %v1470_v21  ;;  %v2441_v55 = vmul.f32 1.442695, %v1059_v33  ;;  %4135 = vpow2.f32 %v2563_v0  ;;  %v1964_v40 = vpop.trf.xlu1 }
 0x3cd   : >> { %v4116_v38 = vpop.eup %4115  ;;  %v1548_v29 = vpop.trf.xlu0  ;;  %3476 = vmatmul.mubr.msk.f32.gmra.mrb[124].mxu1 %vm714_vm2, %v1964_v40 }
 0x3ce   : >> { %v4118_v58 = vpop.eup %4117  ;;  %4137 = vpow2.f32 %v2565_v56  ;;  %v1474_v8 = vpop.f32.mrb[60].mxu1  ;;  %v3547_v42 = vpack.c.bf16 %v4116_v38, %v5297_v39  ;;  %2312 = vmatprep.mubr.f32.mxu1 %v4565_v13  ;;  %3445 = vmatmul.mubr.msk.f32.gmra.mrb[126].mxu0 %vm714_vm2, %v1548_v29 }
 0x3cf   : >> { %v1063_v41 = vpop.f32.mrb[62].mxu0  ;;  %v4120_v2 = vpop.eup %4119  ;;  %4139 = vpow2.f32 %v2439_v53  ;;  %v2567_v30 = vmul.f32 1.442695, %v1474_v8  ;;  %v3545_v19 = vpack.c.bf16 %v4118_v58, %v4110_v20  ;;  %2895 = vmatprep.mubr.f32.mxu0 %v567_v37 }
 0x3d0   : >> { %v1476_v5 = vpop.f32.mrb[61].mxu1  ;;  %v2443_v59 = vmul.f32 1.442695, %v1063_v41  ;;  %v1065_v63 = vpop.f32.mrb[63].mxu0  ;;  %4141 = vpow2.f32 %v2441_v55  ;;  %v3611_v0 = vpack.c.bf16 %v4120_v2, %v4112_v23 }
 0x3d1   : >> { %v4122_v60 = vpop.eup %4121  ;;  %v2569_v16 = vmul.f32 1.442695, %v1476_v5  ;;  %v2445_v36 = vmul.f32 1.442695, %v1065_v63  ;;  %4143 = vpow2.f32 %v2567_v30  ;;  %3546 = vmatprep.subr.bf16.mxu0 %v3545_v19  ;;  %v1965_v21 = vpop.trf.xlu1 }
 0x3d2   : >> { %v4124_v39 = vpop.eup %4123  ;;  %v3609_v32 = vpack.c.bf16 %v4122_v60, %v4114_v25  ;;  %v1480_v33 = vpop.f32.mrb[62].mxu1  ;;  %3548 = vmatpush1.bf16.xpose.msra.mxu0 %v3547_v42  ;;  %3477 = vmatmul.mubr.msk.f32.gmra.mrb[126].mxu1 %vm714_vm2, %v1965_v21 }
 0x3d3   : >> { %v4126_v53 = vpop.eup %4125  ;;  %4145 = vpow2.f32 %v2569_v16  ;;  %v2571_v20 = vmul.f32 1.442695, %v1480_v33  ;;  %v1482_v56 = vpop.f32.mrb[63].mxu1  ;;  %2972 = vmatprep.mubr.f32.mxu1 %v569_v27  ;;  %v4566_v33 = vmov 1.0  }
 0x3d4   : >> { %v4128_v13 = vpop.eup %4127  ;;  %4147 = vpow2.f32 %v2443_v59  ;;  %3610 = vmatprep.subr.bf16.mxu1 %v3609_v32  ;;  %v2573_v55 = vmul.f32 1.442695, %v1482_v56  ;;  %v544_v32 = vmul.f32 %v4890_v34, %v4811_v14 }
 0x3d5   : >> { %v4130_v23 = vpop.eup %4129  ;;  %4149 = vpow2.f32 %v2445_v36  ;;  %3612 = vmatpush1.bf16.xpose.msra.mxu1 %v3611_v0 }
 0x3d6   : >> { %v4132_v38 = vpop.eup %4131  ;;  %4151 = vpow2.f32 %v2571_v20 }
 0x3d7   : >> { %v4134_v25 = vpop.eup %4133  ;;  %4153 = vpow2.f32 %v2573_v55  ;;  %v3551_v40 = vpack.c.bf16 %v4132_v38, %v4124_v39  ;;  %v542_v39 = vmul.f32 %v4890_v34, %v4803_v6 }
 0x3d8   : >> { %v4136_v29 = vpop.eup %4135  ;;  %v3549_v37 = vpack.c.bf16 %v4134_v25, %v4126_v53  ;;  %v568_v53 = vadd.f32 %v544_v32, %v4781_v49 }
 0x3d9   : >> { %v4138_v58 = vpop.eup %4137  ;;  %v3615_v8 = vpack.c.bf16 %v4136_v29, %v4128_v13  ;;  %v566_v21 = vadd.f32 %v542_v39, %v4783_v50 }
 0x3da   : >> { %v4140_v41 = vpop.eup %4139  ;;  %3550 = vmatprep.subr.bf16.mxu0 %v3549_v37  ;;  %v3613_v42 = vpack.c.bf16 %v4138_v58, %v4130_v23 }
 0x3db   : >> { %v4142_v2 = vpop.eup %4141  ;;  %3552 = vmatpush1.bf16.xpose.msra.mxu0 %v3551_v40 }
 0x3dc   : >> { %v4144_v30 = vpop.eup %4143  ;;  %3614 = vmatprep.subr.bf16.mxu1 %v3613_v42 }
 0x3dd   : >> { %v4146_v27 = vpop.eup %4145  ;;  %3616 = vmatpush1.bf16.xpose.msra.mxu1 %v3615_v8 }
 0x3de   : >> { %v4148_v5 = vpop.eup %4147 }
 0x3df   : >> { %v4150_v59 = vpop.eup %4149  ;;  %v3555_v63 = vpack.c.bf16 %v4148_v5, %v4140_v41 }
 0x3e0   : >> { %v4152_v19 = vpop.eup %4151  ;;  %v3553_v60 = vpack.c.bf16 %v4150_v59, %v4142_v2 }
 0x3e1   : >> { %v4154_v16 = vpop.eup %4153  ;;  %v3619_v36 = vpack.c.bf16 %v4152_v19, %v4144_v30 }
 0x3e2   : >> { %3554 = vmatprep.subr.bf16.mxu0 %v3553_v60  ;;  %v3617_v0 = vpack.c.bf16 %v4154_v16, %v4146_v27 }
 0x3e3   : >> { %3556 = vmatpush1.bf16.xpose.msra.mxu0 %v3555_v63 }
 0x3e4   : >> { %3618 = vmatprep.subr.bf16.mxu1 %v3617_v0 }
 0x3e5   : >> { %3620 = vmatpush1.bf16.xpose.msra.mxu1 %v3619_v36 }
 0x3ea   : >> { %2896 = vmatmul.mubr.f32.vlgmr.msra.gmra.mrb[128].mxu0 %v566_v21 }
 0x3eb   : >> { %2901 = vmatprep.mubr.f32.mxu0 %v4566_v33 }
 0x3ec   : >> { %2973 = vmatmul.mubr.f32.vlgmr.msra.gmra.mrb[128].mxu1 %v568_v53 }
 0x3ed   : >> { %2978 = vmatprep.mubr.f32.mxu1 %v4566_v33 }
 0x3ee   : >> { %2902 = vmatmul.mubr.f32.gmra.mrb[130].mxu0 %v4566_v33 }
 0x3f0   : >> { %2979 = vmatmul.mubr.f32.gmra.mrb[130].mxu1 %v4566_v33 }
 0x40a   : >> { %v1711_v13 = vpop.f32.mrb[64].mxu0 }
 0x40b   : >> { %v2575_v20 = vmul.f32 1.442695, %v1711_v13  ;;  %v1713_v56 = vpop.f32.mrb[65].mxu0 }
 0x40c   : >> { %v2577_v23 = vmul.f32 1.442695, %v1713_v56 }
 0x40d   : >> { %4155 = vpow2.f32 %v2575_v20 }
 0x40e   : >> { %v2128_v55 = vpop.f32.mrb[64].mxu1  ;;  %v1717_v38 = vpop.f32.mrb[66].mxu0  ;;  %4157 = vpow2.f32 %v2577_v23 }
 0x40f   : >> { %v2703_v25 = vmul.f32 1.442695, %v2128_v55  ;;  %v2130_v40 = vpop.f32.mrb[65].mxu1  ;;  %v2579_v29 = vmul.f32 1.442695, %v1717_v38  ;;  %v1719_v37 = vpop.f32.mrb[67].mxu0 }
 0x410   : >> { %v2705_v58 = vmul.f32 1.442695, %v2130_v40  ;;  %v2581_v8 = vmul.f32 1.442695, %v1719_v37 }
 0x411   : >> { %4159 = vpow2.f32 %v2703_v25 }
 0x412   : >> { %4161 = vpow2.f32 %v2705_v58  ;;  %v2134_v41 = vpop.f32.mrb[66].mxu1  ;;  %v1723_v42 = vpop.f32.mrb[68].mxu0 }
 0x413   : >> { %4163 = vpow2.f32 %v2579_v29  ;;  %v2707_v2 = vmul.f32 1.442695, %v2134_v41  ;;  %v2136_v30 = vpop.f32.mrb[67].mxu1  ;;  %v2583_v27 = vmul.f32 1.442695, %v1723_v42  ;;  %v1725_v5 = vpop.f32.mrb[69].mxu0  ;;  %v549_v42 = vmul.f32 %v4892_v35, %v4831_v28 }
 0x414   : >> { %4165 = vpow2.f32 %v2581_v8  ;;  %v2709_v59 = vmul.f32 1.442695, %v2136_v30  ;;  %v2585_v63 = vmul.f32 1.442695, %v1725_v5  ;;  %v547_v8 = vmul.f32 %v4892_v35, %v4823_v24 }
 0x415   : >> { %4167 = vpow2.f32 %v2707_v2 }
 0x416   : >> { %4169 = vpow2.f32 %v2709_v59  ;;  %v2140_v19 = vpop.f32.mrb[68].mxu1  ;;  %v1729_v60 = vpop.f32.mrb[70].mxu0  ;;  %v571_v59 = vadd.f32 %v547_v8, %v4787_v52 }
 0x417   : >> { %4171 = vpow2.f32 %v2583_v27  ;;  %v2711_v16 = vmul.f32 1.442695, %v2140_v19  ;;  %v2142_v36 = vpop.f32.mrb[69].mxu1  ;;  %v2587_v0 = vmul.f32 1.442695, %v1729_v60  ;;  %v1731_v39 = vpop.f32.mrb[71].mxu0 }
 0x418   : >> { %4173 = vpow2.f32 %v2585_v63  ;;  %v2713_v32 = vmul.f32 1.442695, %v2142_v36  ;;  %v2589_v21 = vmul.f32 1.442695, %v1731_v39  ;;  %v4156_v53 = vpop.eup %4155  ;;  %3049 = vmatprep.mubr.f32.mxu0 %v571_v59 }
 0x419   : >> { %4175 = vpow2.f32 %v2711_v16  ;;  %v4158_v13 = vpop.eup %4157 }
 0x41a   : >> { %4177 = vpow2.f32 %v2713_v32  ;;  %v2146_v20 = vpop.f32.mrb[70].mxu1  ;;  %v1735_v56 = vpop.f32.mrb[72].mxu0 }
 0x41b   : >> { %v4160_v23 = vpop.eup %4159  ;;  %4179 = vpow2.f32 %v2587_v0  ;;  %v2715_v55 = vmul.f32 1.442695, %v2146_v20  ;;  %v2148_v38 = vpop.f32.mrb[71].mxu1  ;;  %v2591_v25 = vmul.f32 1.442695, %v1735_v56 }
 0x41c   : >> { %v1737_v40 = vpop.f32.mrb[73].mxu0  ;;  %v4162_v29 = vpop.eup %4161  ;;  %4181 = vpow2.f32 %v2589_v21  ;;  %v2717_v37 = vmul.f32 1.442695, %v2148_v38 }
 0x41d   : >> { %v2593_v58 = vmul.f32 1.442695, %v1737_v40  ;;  %v4164_v41 = vpop.eup %4163  ;;  %4183 = vpow2.f32 %v2715_v55 }
 0x41e   : >> { %v4166_v2 = vpop.eup %4165  ;;  %4185 = vpow2.f32 %v2717_v37  ;;  %v2152_v30 = vpop.f32.mrb[72].mxu1  ;;  %v3623_v5 = vpack.c.bf16 %v4164_v41, %v4156_v53  ;;  %v573_v53 = vadd.f32 %v549_v42, %v4785_v51 }
 0x41f   : >> { %v1741_v27 = vpop.f32.mrb[74].mxu0  ;;  %v4168_v63 = vpop.eup %4167  ;;  %4187 = vpow2.f32 %v2591_v25  ;;  %v2719_v19 = vmul.f32 1.442695, %v2152_v30  ;;  %v3621_v0 = vpack.c.bf16 %v4166_v2, %v4158_v13 }
 0x420   : >> { %v2154_v60 = vpop.f32.mrb[73].mxu1  ;;  %v2595_v16 = vmul.f32 1.442695, %v1741_v27  ;;  %v1743_v36 = vpop.f32.mrb[75].mxu0  ;;  %4189 = vpow2.f32 %v2593_v58  ;;  %v3687_v20 = vpack.c.bf16 %v4168_v63, %v4160_v23  ;;  %3126 = vmatprep.mubr.f32.mxu1 %v573_v53 }
 0x421   : >> { %v4170_v39 = vpop.eup %4169  ;;  %v2721_v32 = vmul.f32 1.442695, %v2154_v60  ;;  %v2597_v21 = vmul.f32 1.442695, %v1743_v36  ;;  %4191 = vpow2.f32 %v2719_v19  ;;  %3622 = vmatprep.subr.bf16.mxu0 %v3621_v0 }
 0x422   : >> { %v4172_v56 = vpop.eup %4171  ;;  %v3685_v55 = vpack.c.bf16 %v4170_v39, %v4162_v29  ;;  %3624 = vmatpush1.bf16.xpose.msra.mxu0 %v3623_v5 }
 0x423   : >> { %v4174_v38 = vpop.eup %4173  ;;  %4193 = vpow2.f32 %v2721_v32  ;;  %v2158_v25 = vpop.f32.mrb[74].mxu1 }
 0x424   : >> { %v4176_v40 = vpop.eup %4175  ;;  %4195 = vpow2.f32 %v2595_v16  ;;  %v2723_v37 = vmul.f32 1.442695, %v2158_v25  ;;  %v2160_v13 = vpop.f32.mrb[75].mxu1  ;;  %3686 = vmatprep.subr.bf16.mxu1 %v3685_v55 }
 0x425   : >> { %v4178_v58 = vpop.eup %4177  ;;  %4197 = vpow2.f32 %v2597_v21  ;;  %v2725_v23 = vmul.f32 1.442695, %v2160_v13  ;;  %3688 = vmatpush1.bf16.xpose.msra.mxu1 %v3687_v20  ;;  %v1747_v8 = vpop.f32.mrb[76].mxu0 }
 0x426   : >> { %v4180_v41 = vpop.eup %4179  ;;  %4199 = vpow2.f32 %v2723_v37  ;;  %v2599_v29 = vmul.f32 1.442695, %v1747_v8  ;;  %v1749_v2 = vpop.f32.mrb[77].mxu0 }
 0x427   : >> { %v4182_v42 = vpop.eup %4181  ;;  %4201 = vpow2.f32 %v2725_v23  ;;  %v2601_v27 = vmul.f32 1.442695, %v1749_v2  ;;  %v3627_v5 = vpack.c.bf16 %v4180_v41, %v4172_v56 }
 0x428   : >> { %v2164_v30 = vpop.f32.mrb[76].mxu1  ;;  %v4184_v59 = vpop.eup %4183  ;;  %4203 = vpow2.f32 %v2599_v29  ;;  %v3625_v60 = vpack.c.bf16 %v4182_v42, %v4174_v38 }
 0x429   : >> { %v2727_v63 = vmul.f32 1.442695, %v2164_v30  ;;  %v2166_v19 = vpop.f32.mrb[77].mxu1  ;;  %v4186_v16 = vpop.eup %4185  ;;  %4205 = vpow2.f32 %v2601_v27  ;;  %v3691_v39 = vpack.c.bf16 %v4184_v59, %v4176_v40 }
 0x42a   : >> { %v2729_v36 = vmul.f32 1.442695, %v2166_v19  ;;  %v1753_v0 = vpop.f32.mrb[78].mxu0  ;;  %v4188_v32 = vpop.eup %4187  ;;  %3626 = vmatprep.subr.bf16.mxu0 %v3625_v60  ;;  %v3689_v55 = vpack.c.bf16 %v4186_v16, %v4178_v58 }
 0x42b   : >> { %4207 = vpow2.f32 %v2727_v63  ;;  %v2603_v21 = vmul.f32 1.442695, %v1753_v0  ;;  %v1755_v20 = vpop.f32.mrb[79].mxu0  ;;  %v4190_v53 = vpop.eup %4189  ;;  %3628 = vmatpush1.bf16.xpose.msra.mxu0 %v3627_v5 }
 0x42c   : >> { %4209 = vpow2.f32 %v2729_v36  ;;  %v2605_v56 = vmul.f32 1.442695, %v1755_v20  ;;  %v4192_v37 = vpop.eup %4191  ;;  %3690 = vmatprep.subr.bf16.mxu1 %v3689_v55 }
 0x42d   : >> { %v2170_v25 = vpop.f32.mrb[78].mxu1  ;;  %4211 = vpow2.f32 %v2603_v21  ;;  %v4194_v23 = vpop.eup %4193  ;;  %3692 = vmatpush1.bf16.xpose.msra.mxu1 %v3691_v39 }
 0x42e   : >> { %v2731_v13 = vmul.f32 1.442695, %v2170_v25  ;;  %v2172_v38 = vpop.f32.mrb[79].mxu1  ;;  %4213 = vpow2.f32 %v2605_v56  ;;  %v1759_v40 = vpop.f32.mrb[80].mxu0 }
 0x42f   : >> { %v2733_v8 = vmul.f32 1.442695, %v2172_v38  ;;  %v4196_v41 = vpop.eup %4195  ;;  %v2607_v29 = vmul.f32 1.442695, %v1759_v40  ;;  %v1761_v2 = vpop.f32.mrb[81].mxu0 }
 0x430   : >> { %4215 = vpow2.f32 %v2731_v13  ;;  %v4198_v58 = vpop.eup %4197  ;;  %v2609_v30 = vmul.f32 1.442695, %v1761_v2  ;;  %v3631_v27 = vpack.c.bf16 %v4196_v41, %v4188_v32 }
 0x431   : >> { %4217 = vpow2.f32 %v2733_v8  ;;  %v4200_v5 = vpop.eup %4199  ;;  %v3629_v19 = vpack.c.bf16 %v4198_v58, %v4190_v53 }
 0x432   : >> { %v2176_v42 = vpop.f32.mrb[80].mxu1  ;;  %4219 = vpow2.f32 %v2607_v29  ;;  %v4202_v60 = vpop.eup %4201  ;;  %v3695_v0 = vpack.c.bf16 %v4200_v5, %v4192_v37 }
 0x433   : >> { %v2735_v59 = vmul.f32 1.442695, %v2176_v42  ;;  %v2178_v63 = vpop.f32.mrb[81].mxu1  ;;  %4221 = vpow2.f32 %v2609_v30  ;;  %v1765_v36 = vpop.f32.mrb[82].mxu0  ;;  %3630 = vmatprep.subr.bf16.mxu0 %v3629_v19  ;;  %v3693_v55 = vpack.c.bf16 %v4202_v60, %v4194_v23 }
 0x434   : >> { %v2737_v16 = vmul.f32 1.442695, %v2178_v63  ;;  %v4204_v39 = vpop.eup %4203  ;;  %v2611_v21 = vmul.f32 1.442695, %v1765_v36  ;;  %v1767_v20 = vpop.f32.mrb[83].mxu0  ;;  %3632 = vmatpush1.bf16.xpose.msra.mxu0 %v3631_v27 }
 0x435   : >> { %4223 = vpow2.f32 %v2735_v59  ;;  %v4206_v25 = vpop.eup %4205  ;;  %v2613_v32 = vmul.f32 1.442695, %v1767_v20  ;;  %3694 = vmatprep.subr.bf16.mxu1 %v3693_v55 }
 0x436   : >> { %4225 = vpow2.f32 %v2737_v16  ;;  %v4208_v13 = vpop.eup %4207  ;;  %3696 = vmatpush1.bf16.xpose.msra.mxu1 %v3695_v0 }
 0x437   : >> { %v2182_v56 = vpop.f32.mrb[82].mxu1  ;;  %4227 = vpow2.f32 %v2611_v21  ;;  %v4210_v8 = vpop.eup %4209 }
 0x438   : >> { %v2739_v38 = vmul.f32 1.442695, %v2182_v56  ;;  %v2184_v53 = vpop.f32.mrb[83].mxu1  ;;  %4229 = vpow2.f32 %v2613_v32  ;;  %v1771_v37 = vpop.f32.mrb[84].mxu0 }
 0x439   : >> { %v2741_v40 = vmul.f32 1.442695, %v2184_v53  ;;  %v4212_v41 = vpop.eup %4211  ;;  %v2615_v29 = vmul.f32 1.442695, %v1771_v37  ;;  %v1773_v2 = vpop.f32.mrb[85].mxu0 }
 0x43a   : >> { %4231 = vpow2.f32 %v2739_v38  ;;  %v4214_v23 = vpop.eup %4213  ;;  %v2617_v42 = vmul.f32 1.442695, %v1773_v2  ;;  %v3635_v30 = vpack.c.bf16 %v4212_v41, %v4204_v39 }
 0x43b   : >> { %4233 = vpow2.f32 %v2741_v40  ;;  %v4216_v27 = vpop.eup %4215  ;;  %v3633_v63 = vpack.c.bf16 %v4214_v23, %v4206_v25 }
 0x43c   : >> { %v2188_v58 = vpop.f32.mrb[84].mxu1  ;;  %4235 = vpow2.f32 %v2615_v29  ;;  %v4218_v19 = vpop.eup %4217  ;;  %v3699_v36 = vpack.c.bf16 %v4216_v27, %v4208_v13 }
 0x43d   : >> { %v2743_v5 = vmul.f32 1.442695, %v2188_v58  ;;  %v2190_v59 = vpop.f32.mrb[85].mxu1  ;;  %4237 = vpow2.f32 %v2617_v42  ;;  %v1777_v16 = vpop.f32.mrb[86].mxu0  ;;  %3634 = vmatprep.subr.bf16.mxu0 %v3633_v63  ;;  %v3697_v55 = vpack.c.bf16 %v4218_v19, %v4210_v8 }
 0x43e   : >> { %v2745_v60 = vmul.f32 1.442695, %v2190_v59  ;;  %v4220_v0 = vpop.eup %4219  ;;  %v2619_v21 = vmul.f32 1.442695, %v1777_v16  ;;  %v1779_v20 = vpop.f32.mrb[87].mxu0  ;;  %3636 = vmatpush1.bf16.xpose.msra.mxu0 %v3635_v30 }
 0x43f   : >> { %4239 = vpow2.f32 %v2743_v5  ;;  %v4222_v56 = vpop.eup %4221  ;;  %v2621_v39 = vmul.f32 1.442695, %v1779_v20  ;;  %3698 = vmatprep.subr.bf16.mxu1 %v3697_v55 }
 0x440   : >> { %4241 = vpow2.f32 %v2745_v60  ;;  %v4224_v38 = vpop.eup %4223  ;;  %3700 = vmatpush1.bf16.xpose.msra.mxu1 %v3699_v36 }
 0x441   : >> { %v2194_v32 = vpop.f32.mrb[86].mxu1  ;;  %4243 = vpow2.f32 %v2619_v21  ;;  %v4226_v40 = vpop.eup %4225 }
 0x442   : >> { %v2747_v53 = vmul.f32 1.442695, %v2194_v32  ;;  %v2196_v25 = vpop.f32.mrb[87].mxu1  ;;  %4245 = vpow2.f32 %v2621_v39  ;;  %v1783_v13 = vpop.f32.mrb[88].mxu0 }
 0x443   : >> { %v2749_v37 = vmul.f32 1.442695, %v2196_v25  ;;  %v4228_v41 = vpop.eup %4227  ;;  %v2623_v29 = vmul.f32 1.442695, %v1783_v13  ;;  %v1785_v2 = vpop.f32.mrb[89].mxu0 }
 0x444   : >> { %4247 = vpow2.f32 %v2747_v53  ;;  %v4230_v8 = vpop.eup %4229  ;;  %v2625_v58 = vmul.f32 1.442695, %v1785_v2  ;;  %v3639_v42 = vpack.c.bf16 %v4228_v41, %v4220_v0 }
 0x445   : >> { %4249 = vpow2.f32 %v2749_v37  ;;  %v4232_v30 = vpop.eup %4231  ;;  %v3637_v59 = vpack.c.bf16 %v4230_v8, %v4222_v56 }
 0x446   : >> { %v2200_v23 = vpop.f32.mrb[88].mxu1  ;;  %4251 = vpow2.f32 %v2623_v29  ;;  %v4234_v63 = vpop.eup %4233  ;;  %v3703_v16 = vpack.c.bf16 %v4232_v30, %v4224_v38 }
 0x447   : >> { %v2751_v27 = vmul.f32 1.442695, %v2200_v23  ;;  %v2202_v5 = vpop.f32.mrb[89].mxu1  ;;  %4253 = vpow2.f32 %v2625_v58  ;;  %v1789_v60 = vpop.f32.mrb[90].mxu0  ;;  %3638 = vmatprep.subr.bf16.mxu0 %v3637_v59  ;;  %v3701_v55 = vpack.c.bf16 %v4234_v63, %v4226_v40 }
 0x448   : >> { %v2753_v19 = vmul.f32 1.442695, %v2202_v5  ;;  %v4236_v36 = vpop.eup %4235  ;;  %v2627_v21 = vmul.f32 1.442695, %v1789_v60  ;;  %v1791_v20 = vpop.f32.mrb[91].mxu0  ;;  %3640 = vmatpush1.bf16.xpose.msra.mxu0 %v3639_v42 }
 0x449   : >> { %4255 = vpow2.f32 %v2751_v27  ;;  %v4238_v32 = vpop.eup %4237  ;;  %v2629_v0 = vmul.f32 1.442695, %v1791_v20  ;;  %3702 = vmatprep.subr.bf16.mxu1 %v3701_v55 }
 0x44a   : >> { %4257 = vpow2.f32 %v2753_v19  ;;  %v4240_v53 = vpop.eup %4239  ;;  %3704 = vmatpush1.bf16.xpose.msra.mxu1 %v3703_v16 }
 0x44b   : >> { %v2206_v39 = vpop.f32.mrb[90].mxu1  ;;  %4259 = vpow2.f32 %v2627_v21  ;;  %v4242_v37 = vpop.eup %4241 }
 0x44c   : >> { %v2755_v25 = vmul.f32 1.442695, %v2206_v39  ;;  %v2208_v56 = vpop.f32.mrb[91].mxu1  ;;  %4261 = vpow2.f32 %v2629_v0  ;;  %v1795_v38 = vpop.f32.mrb[92].mxu0 }
 0x44d   : >> { %v2757_v13 = vmul.f32 1.442695, %v2208_v56  ;;  %v4244_v41 = vpop.eup %4243  ;;  %v2631_v29 = vmul.f32 1.442695, %v1795_v38  ;;  %v1797_v2 = vpop.f32.mrb[93].mxu0 }
 0x44e   : >> { %4263 = vpow2.f32 %v2755_v25  ;;  %v4246_v40 = vpop.eup %4245  ;;  %v2633_v23 = vmul.f32 1.442695, %v1797_v2  ;;  %v3643_v58 = vpack.c.bf16 %v4244_v41, %v4236_v36 }
 0x44f   : >> { %4265 = vpow2.f32 %v2757_v13  ;;  %v4248_v42 = vpop.eup %4247  ;;  %v3641_v5 = vpack.c.bf16 %v4246_v40, %v4238_v32 }
 0x450   : >> { %v2212_v8 = vpop.f32.mrb[92].mxu1  ;;  %4267 = vpow2.f32 %v2631_v29  ;;  %v4250_v59 = vpop.eup %4249  ;;  %v3707_v60 = vpack.c.bf16 %v4248_v42, %v4240_v53 }
 0x451   : >> { %v2759_v30 = vmul.f32 1.442695, %v2212_v8  ;;  %v2214_v27 = vpop.f32.mrb[93].mxu1  ;;  %4269 = vpow2.f32 %v2633_v23  ;;  %v1801_v19 = vpop.f32.mrb[94].mxu0  ;;  %3642 = vmatprep.subr.bf16.mxu0 %v3641_v5  ;;  %v3705_v55 = vpack.c.bf16 %v4250_v59, %v4242_v37 }
 0x452   : >> { %v2761_v63 = vmul.f32 1.442695, %v2214_v27  ;;  %v4252_v16 = vpop.eup %4251  ;;  %v2635_v21 = vmul.f32 1.442695, %v1801_v19  ;;  %v1803_v20 = vpop.f32.mrb[95].mxu0  ;;  %3644 = vmatpush1.bf16.xpose.msra.mxu0 %v3643_v58 }
 0x453   : >> { %4271 = vpow2.f32 %v2759_v30  ;;  %v4254_v39 = vpop.eup %4253  ;;  %v2637_v36 = vmul.f32 1.442695, %v1803_v20  ;;  %3706 = vmatprep.subr.bf16.mxu1 %v3705_v55 }
 0x454   : >> { %4273 = vpow2.f32 %v2761_v63  ;;  %v4256_v25 = vpop.eup %4255  ;;  %3708 = vmatpush1.bf16.xpose.msra.mxu1 %v3707_v60 }
 0x455   : >> { %v2218_v0 = vpop.f32.mrb[94].mxu1  ;;  %4275 = vpow2.f32 %v2635_v21  ;;  %v4258_v13 = vpop.eup %4257 }
 0x456   : >> { %v2763_v56 = vmul.f32 1.442695, %v2218_v0  ;;  %v2220_v32 = vpop.f32.mrb[95].mxu1  ;;  %4277 = vpow2.f32 %v2637_v36  ;;  %v1807_v53 = vpop.f32.mrb[96].mxu0 }
 0x457   : >> { %v2765_v38 = vmul.f32 1.442695, %v2220_v32  ;;  %v4260_v41 = vpop.eup %4259  ;;  %v2639_v29 = vmul.f32 1.442695, %v1807_v53  ;;  %v1809_v2 = vpop.f32.mrb[97].mxu0 }
 0x458   : >> { %4279 = vpow2.f32 %v2763_v56  ;;  %v4262_v37 = vpop.eup %4261  ;;  %v2641_v8 = vmul.f32 1.442695, %v1809_v2  ;;  %v3647_v23 = vpack.c.bf16 %v4260_v41, %v4252_v16 }
 0x459   : >> { %4281 = vpow2.f32 %v2765_v38  ;;  %v4264_v58 = vpop.eup %4263  ;;  %v3645_v27 = vpack.c.bf16 %v4262_v37, %v4254_v39 }
 0x45a   : >> { %v2224_v40 = vpop.f32.mrb[96].mxu1  ;;  %4283 = vpow2.f32 %v2639_v29  ;;  %v4266_v5 = vpop.eup %4265  ;;  %v3711_v19 = vpack.c.bf16 %v4264_v58, %v4256_v25 }
 0x45b   : >> { %v2767_v42 = vmul.f32 1.442695, %v2224_v40  ;;  %v2226_v30 = vpop.f32.mrb[97].mxu1  ;;  %4285 = vpow2.f32 %v2641_v8  ;;  %v1813_v63 = vpop.f32.mrb[98].mxu0  ;;  %3646 = vmatprep.subr.bf16.mxu0 %v3645_v27  ;;  %v3709_v55 = vpack.c.bf16 %v4266_v5, %v4258_v13 }
 0x45c   : >> { %v2769_v59 = vmul.f32 1.442695, %v2226_v30  ;;  %v4268_v60 = vpop.eup %4267  ;;  %v2643_v21 = vmul.f32 1.442695, %v1813_v63  ;;  %v1815_v20 = vpop.f32.mrb[99].mxu0  ;;  %3648 = vmatpush1.bf16.xpose.msra.mxu0 %v3647_v23 }
 0x45d   : >> { %4287 = vpow2.f32 %v2767_v42  ;;  %v4270_v0 = vpop.eup %4269  ;;  %v2645_v16 = vmul.f32 1.442695, %v1815_v20  ;;  %3710 = vmatprep.subr.bf16.mxu1 %v3709_v55 }
 0x45e   : >> { %4289 = vpow2.f32 %v2769_v59  ;;  %v4272_v56 = vpop.eup %4271  ;;  %3712 = vmatpush1.bf16.xpose.msra.mxu1 %v3711_v19 }
 0x45f   : >> { %v2230_v36 = vpop.f32.mrb[98].mxu1  ;;  %4291 = vpow2.f32 %v2643_v21  ;;  %v4274_v38 = vpop.eup %4273 }
 0x460   : >> { %v2771_v32 = vmul.f32 1.442695, %v2230_v36  ;;  %v2232_v39 = vpop.f32.mrb[99].mxu1  ;;  %4293 = vpow2.f32 %v2645_v16  ;;  %v1819_v25 = vpop.f32.mrb[100].mxu0 }
 0x461   : >> { %v2773_v53 = vmul.f32 1.442695, %v2232_v39  ;;  %v4276_v41 = vpop.eup %4275  ;;  %v2647_v29 = vmul.f32 1.442695, %v1819_v25  ;;  %v1821_v2 = vpop.f32.mrb[101].mxu0 }
 0x462   : >> { %4295 = vpow2.f32 %v2771_v32  ;;  %v4278_v13 = vpop.eup %4277  ;;  %v2649_v40 = vmul.f32 1.442695, %v1821_v2  ;;  %v3651_v8 = vpack.c.bf16 %v4276_v41, %v4268_v60 }
 0x463   : >> { %4297 = vpow2.f32 %v2773_v53  ;;  %v4280_v23 = vpop.eup %4279  ;;  %v3649_v30 = vpack.c.bf16 %v4278_v13, %v4270_v0 }
 0x464   : >> { %v2236_v37 = vpop.f32.mrb[100].mxu1  ;;  %4299 = vpow2.f32 %v2647_v29  ;;  %v4282_v27 = vpop.eup %4281  ;;  %v3715_v63 = vpack.c.bf16 %v4280_v23, %v4272_v56 }
 0x465   : >> { %v2775_v58 = vmul.f32 1.442695, %v2236_v37  ;;  %v2238_v42 = vpop.f32.mrb[101].mxu1  ;;  %4301 = vpow2.f32 %v2649_v40  ;;  %v1825_v59 = vpop.f32.mrb[102].mxu0  ;;  %3650 = vmatprep.subr.bf16.mxu0 %v3649_v30  ;;  %v3713_v55 = vpack.c.bf16 %v4282_v27, %v4274_v38 }
 0x466   : >> { %v2777_v5 = vmul.f32 1.442695, %v2238_v42  ;;  %v4284_v19 = vpop.eup %4283  ;;  %v2651_v21 = vmul.f32 1.442695, %v1825_v59  ;;  %v1827_v20 = vpop.f32.mrb[103].mxu0  ;;  %3652 = vmatpush1.bf16.xpose.msra.mxu0 %v3651_v8 }
 0x467   : >> { %4303 = vpow2.f32 %v2775_v58  ;;  %v4286_v36 = vpop.eup %4285  ;;  %v2653_v60 = vmul.f32 1.442695, %v1827_v20  ;;  %3714 = vmatprep.subr.bf16.mxu1 %v3713_v55 }
 0x468   : >> { %4305 = vpow2.f32 %v2777_v5  ;;  %v4288_v32 = vpop.eup %4287  ;;  %3716 = vmatpush1.bf16.xpose.msra.mxu1 %v3715_v63 }
 0x469   : >> { %v2242_v16 = vpop.f32.mrb[102].mxu1  ;;  %4307 = vpow2.f32 %v2651_v21  ;;  %v4290_v53 = vpop.eup %4289 }
 0x46a   : >> { %v2779_v39 = vmul.f32 1.442695, %v2242_v16  ;;  %v2244_v0 = vpop.f32.mrb[103].mxu1  ;;  %4309 = vpow2.f32 %v2653_v60  ;;  %v1831_v56 = vpop.f32.mrb[104].mxu0 }
 0x46b   : >> { %v2781_v25 = vmul.f32 1.442695, %v2244_v0  ;;  %v4292_v41 = vpop.eup %4291  ;;  %v2655_v29 = vmul.f32 1.442695, %v1831_v56  ;;  %v1833_v2 = vpop.f32.mrb[105].mxu0 }
 0x46c   : >> { %4311 = vpow2.f32 %v2779_v39  ;;  %v4294_v38 = vpop.eup %4293  ;;  %v2657_v37 = vmul.f32 1.442695, %v1833_v2  ;;  %v3655_v40 = vpack.c.bf16 %v4292_v41, %v4284_v19 }
 0x46d   : >> { %4313 = vpow2.f32 %v2781_v25  ;;  %v4296_v8 = vpop.eup %4295  ;;  %v3653_v42 = vpack.c.bf16 %v4294_v38, %v4286_v36 }
 0x46e   : >> { %v2248_v13 = vpop.f32.mrb[104].mxu1  ;;  %4315 = vpow2.f32 %v2655_v29  ;;  %v4298_v30 = vpop.eup %4297  ;;  %v3719_v59 = vpack.c.bf16 %v4296_v8, %v4288_v32 }
 0x46f   : >> { %v2783_v23 = vmul.f32 1.442695, %v2248_v13  ;;  %v2250_v58 = vpop.f32.mrb[105].mxu1  ;;  %4317 = vpow2.f32 %v2657_v37  ;;  %v1837_v5 = vpop.f32.mrb[106].mxu0  ;;  %3654 = vmatprep.subr.bf16.mxu0 %v3653_v42  ;;  %v3717_v55 = vpack.c.bf16 %v4298_v30, %v4290_v53 }
 0x470   : >> { %v2785_v27 = vmul.f32 1.442695, %v2250_v58  ;;  %v4300_v63 = vpop.eup %4299  ;;  %v2659_v21 = vmul.f32 1.442695, %v1837_v5  ;;  %v1839_v20 = vpop.f32.mrb[107].mxu0  ;;  %3656 = vmatpush1.bf16.xpose.msra.mxu0 %v3655_v40 }
 0x471   : >> { %4319 = vpow2.f32 %v2783_v23  ;;  %v4302_v16 = vpop.eup %4301  ;;  %v2661_v19 = vmul.f32 1.442695, %v1839_v20  ;;  %3718 = vmatprep.subr.bf16.mxu1 %v3717_v55 }
 0x472   : >> { %4321 = vpow2.f32 %v2785_v27  ;;  %v4304_v39 = vpop.eup %4303  ;;  %3720 = vmatpush1.bf16.xpose.msra.mxu1 %v3719_v59 }
 0x473   : >> { %v2254_v60 = vpop.f32.mrb[106].mxu1  ;;  %4323 = vpow2.f32 %v2659_v21  ;;  %v4306_v25 = vpop.eup %4305 }
 0x474   : >> { %v2787_v0 = vmul.f32 1.442695, %v2254_v60  ;;  %v2256_v36 = vpop.f32.mrb[107].mxu1  ;;  %4325 = vpow2.f32 %v2661_v19  ;;  %v1843_v32 = vpop.f32.mrb[108].mxu0 }
 0x475   : >> { %v2789_v56 = vmul.f32 1.442695, %v2256_v36  ;;  %v4308_v41 = vpop.eup %4307  ;;  %v2663_v29 = vmul.f32 1.442695, %v1843_v32  ;;  %v1845_v2 = vpop.f32.mrb[109].mxu0 }
 0x476   : >> { %4327 = vpow2.f32 %v2787_v0  ;;  %v4310_v53 = vpop.eup %4309  ;;  %v2665_v13 = vmul.f32 1.442695, %v1845_v2  ;;  %v3659_v37 = vpack.c.bf16 %v4308_v41, %v4300_v63 }
 0x477   : >> { %4329 = vpow2.f32 %v2789_v56  ;;  %v4312_v40 = vpop.eup %4311  ;;  %v3657_v58 = vpack.c.bf16 %v4310_v53, %v4302_v16 }
 0x478   : >> { %v2260_v38 = vpop.f32.mrb[108].mxu1  ;;  %4331 = vpow2.f32 %v2663_v29  ;;  %v4314_v42 = vpop.eup %4313  ;;  %v3723_v5 = vpack.c.bf16 %v4312_v40, %v4304_v39 }
 0x479   : >> { %v2791_v8 = vmul.f32 1.442695, %v2260_v38  ;;  %v2262_v23 = vpop.f32.mrb[109].mxu1  ;;  %4333 = vpow2.f32 %v2665_v13  ;;  %v1849_v27 = vpop.f32.mrb[110].mxu0  ;;  %3658 = vmatprep.subr.bf16.mxu0 %v3657_v58  ;;  %v3721_v55 = vpack.c.bf16 %v4314_v42, %v4306_v25 }
 0x47a   : >> { %v2793_v30 = vmul.f32 1.442695, %v2262_v23  ;;  %v4316_v59 = vpop.eup %4315  ;;  %v2667_v21 = vmul.f32 1.442695, %v1849_v27  ;;  %v1851_v20 = vpop.f32.mrb[111].mxu0  ;;  %3660 = vmatpush1.bf16.xpose.msra.mxu0 %v3659_v37 }
 0x47b   : >> { %4335 = vpow2.f32 %v2791_v8  ;;  %v4318_v60 = vpop.eup %4317  ;;  %v2669_v63 = vmul.f32 1.442695, %v1851_v20  ;;  %3722 = vmatprep.subr.bf16.mxu1 %v3721_v55 }
 0x47c   : >> { %4337 = vpow2.f32 %v2793_v30  ;;  %v4320_v0 = vpop.eup %4319  ;;  %3724 = vmatpush1.bf16.xpose.msra.mxu1 %v3723_v5 }
 0x47d   : >> { %v2266_v19 = vpop.f32.mrb[110].mxu1  ;;  %4339 = vpow2.f32 %v2667_v21  ;;  %v4322_v56 = vpop.eup %4321 }
 0x47e   : >> { %v2795_v36 = vmul.f32 1.442695, %v2266_v19  ;;  %v2268_v16 = vpop.f32.mrb[111].mxu1  ;;  %4341 = vpow2.f32 %v2669_v63  ;;  %v1855_v39 = vpop.f32.mrb[112].mxu0 }
 0x47f   : >> { %v2797_v32 = vmul.f32 1.442695, %v2268_v16  ;;  %v4324_v41 = vpop.eup %4323  ;;  %v2671_v29 = vmul.f32 1.442695, %v1855_v39  ;;  %v1857_v2 = vpop.f32.mrb[113].mxu0 }
 0x480   : >> { %4343 = vpow2.f32 %v2795_v36  ;;  %v4326_v25 = vpop.eup %4325  ;;  %v2673_v38 = vmul.f32 1.442695, %v1857_v2  ;;  %v3663_v13 = vpack.c.bf16 %v4324_v41, %v4316_v59 }
 0x481   : >> { %4345 = vpow2.f32 %v2797_v32  ;;  %v4328_v37 = vpop.eup %4327  ;;  %v3661_v23 = vpack.c.bf16 %v4326_v25, %v4318_v60 }
 0x482   : >> { %v2272_v53 = vpop.f32.mrb[112].mxu1  ;;  %4347 = vpow2.f32 %v2671_v29  ;;  %v4330_v58 = vpop.eup %4329  ;;  %v3727_v27 = vpack.c.bf16 %v4328_v37, %v4320_v0 }
 0x483   : >> { %v2799_v40 = vmul.f32 1.442695, %v2272_v53  ;;  %v2274_v8 = vpop.f32.mrb[113].mxu1  ;;  %4349 = vpow2.f32 %v2673_v38  ;;  %v1861_v30 = vpop.f32.mrb[114].mxu0  ;;  %3662 = vmatprep.subr.bf16.mxu0 %v3661_v23  ;;  %v3725_v55 = vpack.c.bf16 %v4330_v58, %v4322_v56 }
 0x484   : >> { %v2801_v42 = vmul.f32 1.442695, %v2274_v8  ;;  %v4332_v5 = vpop.eup %4331  ;;  %v2675_v21 = vmul.f32 1.442695, %v1861_v30  ;;  %v1863_v20 = vpop.f32.mrb[115].mxu0  ;;  %3664 = vmatpush1.bf16.xpose.msra.mxu0 %v3663_v13 }
 0x485   : >> { %4351 = vpow2.f32 %v2799_v40  ;;  %v4334_v19 = vpop.eup %4333  ;;  %v2677_v59 = vmul.f32 1.442695, %v1863_v20  ;;  %3726 = vmatprep.subr.bf16.mxu1 %v3725_v55 }
 0x486   : >> { %4353 = vpow2.f32 %v2801_v42  ;;  %v4336_v36 = vpop.eup %4335  ;;  %3728 = vmatpush1.bf16.xpose.msra.mxu1 %v3727_v27 }
 0x487   : >> { %v2278_v63 = vpop.f32.mrb[114].mxu1  ;;  %4355 = vpow2.f32 %v2675_v21  ;;  %v4338_v32 = vpop.eup %4337 }
 0x488   : >> { %v2803_v16 = vmul.f32 1.442695, %v2278_v63  ;;  %v2280_v60 = vpop.f32.mrb[115].mxu1  ;;  %4357 = vpow2.f32 %v2677_v59  ;;  %v1867_v0 = vpop.f32.mrb[116].mxu0 }
 0x489   : >> { %v2805_v39 = vmul.f32 1.442695, %v2280_v60  ;;  %v4340_v41 = vpop.eup %4339  ;;  %v2679_v29 = vmul.f32 1.442695, %v1867_v0  ;;  %v1869_v2 = vpop.f32.mrb[117].mxu0 }
 0x48a   : >> { %4359 = vpow2.f32 %v2803_v16  ;;  %v4342_v56 = vpop.eup %4341  ;;  %v2681_v53 = vmul.f32 1.442695, %v1869_v2  ;;  %v3667_v38 = vpack.c.bf16 %v4340_v41, %v4332_v5 }
 0x48b   : >> { %4361 = vpow2.f32 %v2805_v39  ;;  %v4344_v13 = vpop.eup %4343  ;;  %v3665_v8 = vpack.c.bf16 %v4342_v56, %v4334_v19 }
 0x48c   : >> { %v2284_v25 = vpop.f32.mrb[116].mxu1  ;;  %4363 = vpow2.f32 %v2679_v29  ;;  %v4346_v23 = vpop.eup %4345  ;;  %v3731_v30 = vpack.c.bf16 %v4344_v13, %v4336_v36 }
 0x48d   : >> { %v2807_v37 = vmul.f32 1.442695, %v2284_v25  ;;  %v2286_v40 = vpop.f32.mrb[117].mxu1  ;;  %4365 = vpow2.f32 %v2681_v53  ;;  %v1873_v42 = vpop.f32.mrb[118].mxu0  ;;  %3666 = vmatprep.subr.bf16.mxu0 %v3665_v8  ;;  %v3729_v55 = vpack.c.bf16 %v4346_v23, %v4338_v32 }
 0x48e   : >> { %v2809_v58 = vmul.f32 1.442695, %v2286_v40  ;;  %v4348_v27 = vpop.eup %4347  ;;  %v2683_v21 = vmul.f32 1.442695, %v1873_v42  ;;  %v1875_v20 = vpop.f32.mrb[119].mxu0  ;;  %3668 = vmatpush1.bf16.xpose.msra.mxu0 %v3667_v38 }
 0x48f   : >> { %4367 = vpow2.f32 %v2807_v37  ;;  %v4350_v63 = vpop.eup %4349  ;;  %v2685_v5 = vmul.f32 1.442695, %v1875_v20  ;;  %3730 = vmatprep.subr.bf16.mxu1 %v3729_v55 }
 0x490   : >> { %4369 = vpow2.f32 %v2809_v58  ;;  %v4352_v16 = vpop.eup %4351  ;;  %3732 = vmatpush1.bf16.xpose.msra.mxu1 %v3731_v30 }
 0x491   : >> { %v2290_v59 = vpop.f32.mrb[118].mxu1  ;;  %4371 = vpow2.f32 %v2683_v21  ;;  %v4354_v39 = vpop.eup %4353 }
 0x492   : >> { %v2811_v60 = vmul.f32 1.442695, %v2290_v59  ;;  %v2292_v19 = vpop.f32.mrb[119].mxu1  ;;  %4373 = vpow2.f32 %v2685_v5  ;;  %v1879_v36 = vpop.f32.mrb[120].mxu0 }
 0x493   : >> { %v2813_v0 = vmul.f32 1.442695, %v2292_v19  ;;  %v4356_v41 = vpop.eup %4355  ;;  %v2687_v29 = vmul.f32 1.442695, %v1879_v36  ;;  %v1881_v2 = vpop.f32.mrb[121].mxu0 }
 0x494   : >> { %4375 = vpow2.f32 %v2811_v60  ;;  %v4358_v32 = vpop.eup %4357  ;;  %v2689_v25 = vmul.f32 1.442695, %v1881_v2  ;;  %v3671_v53 = vpack.c.bf16 %v4356_v41, %v4348_v27 }
 0x495   : >> { %4377 = vpow2.f32 %v2813_v0  ;;  %v4360_v38 = vpop.eup %4359  ;;  %v3669_v40 = vpack.c.bf16 %v4358_v32, %v4350_v63 }
 0x496   : >> { %v2296_v56 = vpop.f32.mrb[120].mxu1  ;;  %4379 = vpow2.f32 %v2687_v29  ;;  %v4362_v8 = vpop.eup %4361  ;;  %v3735_v42 = vpack.c.bf16 %v4360_v38, %v4352_v16 }
 0x497   : >> { %v2815_v13 = vmul.f32 1.442695, %v2296_v56  ;;  %v2298_v37 = vpop.f32.mrb[121].mxu1  ;;  %4381 = vpow2.f32 %v2689_v25  ;;  %v1885_v58 = vpop.f32.mrb[122].mxu0  ;;  %3670 = vmatprep.subr.bf16.mxu0 %v3669_v40  ;;  %v3733_v55 = vpack.c.bf16 %v4362_v8, %v4354_v39 }
 0x498   : >> { %v2817_v23 = vmul.f32 1.442695, %v2298_v37  ;;  %v4364_v30 = vpop.eup %4363  ;;  %v2691_v21 = vmul.f32 1.442695, %v1885_v58  ;;  %v1887_v20 = vpop.f32.mrb[123].mxu0  ;;  %3672 = vmatpush1.bf16.xpose.msra.mxu0 %v3671_v53 }
 0x499   : >> { %4383 = vpow2.f32 %v2815_v13  ;;  %v4366_v59 = vpop.eup %4365  ;;  %v2693_v27 = vmul.f32 1.442695, %v1887_v20  ;;  %3734 = vmatprep.subr.bf16.mxu1 %v3733_v55 }
 0x49a   : >> { %4385 = vpow2.f32 %v2817_v23  ;;  %v4368_v60 = vpop.eup %4367  ;;  %3736 = vmatpush1.bf16.xpose.msra.mxu1 %v3735_v42 }
 0x49b   : >> { %v2302_v5 = vpop.f32.mrb[122].mxu1  ;;  %4387 = vpow2.f32 %v2691_v21  ;;  %v4370_v0 = vpop.eup %4369 }
 0x49c   : >> { %v2819_v19 = vmul.f32 1.442695, %v2302_v5  ;;  %v2304_v63 = vpop.f32.mrb[123].mxu1  ;;  %4389 = vpow2.f32 %v2693_v27  ;;  %v1891_v16 = vpop.f32.mrb[124].mxu0 }
 0x49d   : >> { %v2821_v36 = vmul.f32 1.442695, %v2304_v63  ;;  %v4372_v41 = vpop.eup %4371  ;;  %v2695_v29 = vmul.f32 1.442695, %v1891_v16  ;;  %v1893_v2 = vpop.f32.mrb[125].mxu0 }
 0x49e   : >> { %4391 = vpow2.f32 %v2819_v19  ;;  %v4374_v39 = vpop.eup %4373  ;;  %v2697_v56 = vmul.f32 1.442695, %v1893_v2  ;;  %v3675_v25 = vpack.c.bf16 %v4372_v41, %v4364_v30 }
 0x49f   : >> { %4393 = vpow2.f32 %v2821_v36  ;;  %v4376_v53 = vpop.eup %4375  ;;  %v3673_v37 = vpack.c.bf16 %v4374_v39, %v4366_v59 }
 0x4a0   : >> { %v2308_v32 = vpop.f32.mrb[124].mxu1  ;;  %4395 = vpow2.f32 %v2695_v29  ;;  %v4378_v40 = vpop.eup %4377  ;;  %v3739_v58 = vpack.c.bf16 %v4376_v53, %v4368_v60 }
 0x4a1   : >> { %v2823_v38 = vmul.f32 1.442695, %v2308_v32  ;;  %v2310_v13 = vpop.f32.mrb[125].mxu1  ;;  %4397 = vpow2.f32 %v2697_v56  ;;  %v1897_v23 = vpop.f32.mrb[126].mxu0  ;;  %3674 = vmatprep.subr.bf16.mxu0 %v3673_v37  ;;  %v3737_v55 = vpack.c.bf16 %v4378_v40, %v4370_v0 }
 0x4a2   : >> { %v2825_v8 = vmul.f32 1.442695, %v2310_v13  ;;  %v4380_v42 = vpop.eup %4379  ;;  %v2699_v21 = vmul.f32 1.442695, %v1897_v23  ;;  %v1899_v20 = vpop.f32.mrb[127].mxu0  ;;  %3676 = vmatpush1.bf16.xpose.msra.mxu0 %v3675_v25 }
 0x4a3   : >> { %4399 = vpow2.f32 %v2823_v38  ;;  %v4382_v5 = vpop.eup %4381  ;;  %v2701_v30 = vmul.f32 1.442695, %v1899_v20  ;;  %3738 = vmatprep.subr.bf16.mxu1 %v3737_v55  ;;  %v546_v55 = vmul.f32 %v4890_v34, %v4819_v22 }
 0x4a4   : >> { %4401 = vpow2.f32 %v2825_v8  ;;  %v4384_v19 = vpop.eup %4383  ;;  %3740 = vmatpush1.bf16.xpose.msra.mxu1 %v3739_v58 }
 0x4a5   : >> { %v2314_v27 = vpop.f32.mrb[126].mxu1  ;;  %4403 = vpow2.f32 %v2699_v21  ;;  %v4386_v36 = vpop.eup %4385 }
 0x4a6   : >> { %v2827_v63 = vmul.f32 1.442695, %v2314_v27  ;;  %v2316_v59 = vpop.f32.mrb[127].mxu1  ;;  %4405 = vpow2.f32 %v2701_v30  ;;  %v4388_v60 = vpop.eup %4387  ;;  %v570_v27 = vadd.f32 %v546_v55, %v4787_v52 }
 0x4a7   : >> { %v2829_v16 = vmul.f32 1.442695, %v2316_v59  ;;  %v4390_v41 = vpop.eup %4389  ;;  %v3679_v29 = vpack.c.bf16 %v4388_v60, %v4380_v42 }
 0x4a8   : >> { %4407 = vpow2.f32 %v2827_v63  ;;  %v4392_v0 = vpop.eup %4391  ;;  %v3677_v2 = vpack.c.bf16 %v4390_v41, %v4382_v5  ;;  %v548_v5 = vmul.f32 %v4890_v34, %v4827_v26 }
 0x4a9   : >> { %4409 = vpow2.f32 %v2829_v16  ;;  %v4394_v39 = vpop.eup %4393  ;;  %v3743_v32 = vpack.c.bf16 %v4392_v0, %v4384_v19 }
 0x4aa   : >> { %v4396_v56 = vpop.eup %4395  ;;  %3678 = vmatprep.subr.bf16.mxu0 %v3677_v2  ;;  %v3741_v25 = vpack.c.bf16 %v4394_v39, %v4386_v36  ;;  %v572_v30 = vadd.f32 %v548_v5, %v4785_v51 }
 0x4ab   : >> { %v4398_v53 = vpop.eup %4397  ;;  %3680 = vmatpush1.bf16.xpose.msra.mxu0 %v3679_v29 }
 0x4ac   : >> { %3742 = vmatprep.subr.bf16.mxu1 %v3741_v25 }
 0x4ad   : >> { %v4400_v38 = vpop.eup %4399  ;;  %3744 = vmatpush1.bf16.xpose.msra.mxu1 %v3743_v32 }
 0x4ae   : >> { %v4402_v13 = vpop.eup %4401 }
 0x4af   : >> { %v4404_v37 = vpop.eup %4403 }
 0x4b0   : >> { %v4406_v40 = vpop.eup %4405  ;;  %v3683_v8 = vpack.c.bf16 %v4404_v37, %v4396_v56 }
 0x4b1   : >> { %v3681_v58 = vpack.c.bf16 %v4406_v40, %v4398_v53 }
 0x4b2   : >> { %v4408_v23 = vpop.eup %4407 }
 0x4b3   : >> { %v4410_v21 = vpop.eup %4409  ;;  %v3747_v42 = vpack.c.bf16 %v4408_v23, %v4400_v38  ;;  %3682 = vmatprep.subr.bf16.mxu0 %v3681_v58 }
 0x4b4   : >> { %v3745_v20 = vpack.c.bf16 %v4410_v21, %v4402_v13  ;;  %3684 = vmatpush1.bf16.xpose.msra.mxu0 %v3683_v8 }
 0x4b6   : >> { %3746 = vmatprep.subr.bf16.mxu1 %v3745_v20 }
 0x4b7   : >> { %3748 = vmatpush1.bf16.xpose.msra.mxu1 %v3747_v42 }
 0x4bb   : >> { %3050 = vmatmul.mubr.f32.vlgmr.msra.gmra.mrb[132].mxu0 %v570_v27 }
 0x4bc   : >> { %3055 = vmatprep.mubr.f32.mxu0 %v4566_v33 }
 0x4bd   : >> { %v2897_v19 = vpop.f32.mrb[128].mxu0 }
 0x4be   : >> { %v2899_v63 = vpop.f32.mrb[129].mxu0  ;;  %3127 = vmatmul.mubr.f32.vlgmr.msra.gmra.mrb[132].mxu1 %v572_v30 }
 0x4bf   : >> { %v2974_v59 = vpop.f32.mrb[128].mxu1  ;;  %3132 = vmatprep.mubr.f32.mxu1 %v4566_v33  ;;  %3056 = vmatmul.mubr.f32.gmra.mrb[134].mxu0 %v4566_v33 }
 0x4c0   : >> { %v2976_v36 = vpop.f32.mrb[129].mxu1 }
 0x4c1   : >> { %v2903_v16 = vpop.f32.mrb[130].mxu0 }
 0x4c2   : >> { %4411 = vrcp.f32 %v2903_v16  ;;  %v2905_v60 = vpop.f32.mrb[131].mxu0  ;;  %3133 = vmatmul.mubr.f32.gmra.mrb[134].mxu1 %v4566_v33 }
 0x4c3   : >> { %v2980_v41 = vpop.f32.mrb[130].mxu1  ;;  %4413 = vrcp.f32 %v2905_v60 }
 0x4c4   : >> { %4415 = vrcp.f32 %v2980_v41  ;;  %v2982_v29 = vpop.f32.mrb[131].mxu1 }
 0x4c5   : >> { %4417 = vrcp.f32 %v2982_v29 }
 0x4cc   : >> { %v4412_v0 = vpop.eup %4411 }
 0x4cd   : >> { %v4414_v2 = vpop.eup %4413  ;;  %v3158_v39 = vrot.slane %v4412_v0, %v4887_v31 }
 0x4ce   : >> { %v4416_v32 = vpop.eup %4415  ;;  %v3162_v56 = vrot.slane %v4414_v2, %v4887_v31 }
 0x4cf   : >> { %v4418_v25 = vpop.eup %4417  ;;  %v3187_v53 = vmul.f32 %v3158_v39, %v2897_v19  ;;  %v3166_v38 = vrot.slane %v4416_v32, %v4887_v31 }
 0x4d0   : >> { %v3188_v13 = vmul.f32 %v3162_v56, %v2899_v63  ;;  %v3170_v37 = vrot.slane %v4418_v25, %v4887_v31 }
 0x4d1   : >> { %v3195_v33 = vmul.f32 %v3187_v53, %v4890_v34  ;;  %v3189_v40 = vmul.f32 %v3166_v38, %v2974_v59 }
 0x4d2   : >> { %v3196_v8 = vmul.f32 %v3188_v13, %v4892_v35  ;;  %v3190_v23 = vmul.f32 %v3170_v37, %v2976_v36 }
 0x4d3   : >> { %v3203_v58 = vadd.f32 %v4557_v18, %v3195_v33   ;;  %v3197_v21 = vmul.f32 %v3189_v40, %v4890_v34 }
 0x4d4   : >> { %v3204_v42 = vadd.f32 %v4553_v15, %v3196_v8   ;;  %v3198_v20 = vmul.f32 %v3190_v23, %v4892_v35 }
 0x4d5   : >> { %v3205_v55 = vadd.f32 %v4549_v12, %v3197_v21   ;;  %3211 = vst [vmem:[%s4838_s6] sm:$0xff] (%p494_p11), %v3203_v58 }
 0x4d6   : >> { %v3206_v5 = vadd.f32 %v4545_v11, %v3198_v20   ;;  %3212 = vst [vmem:[%s4838_s6 + $0x8] sm:$0xff] (%p494_p11), %v3204_v42 }
 0x4d7   : > { %3213 = vst [vmem:[%s4838_s6 + $0x10] sm:$0xff] (%p494_p11), %v3205_v55 }
 0x4d8   : > { %3214 = vst [vmem:[%s4838_s6 + $0x18] sm:$0xff] (%p494_p11), %v3206_v5 }
 0x58e   : >> { %v3051_v27 = vpop.f32.mrb[132].mxu0 }
 0x58f   : >> { %v3053_v30 = vpop.f32.mrb[133].mxu0 }
 0x591   : >> { %v3128_v19 = vpop.f32.mrb[132].mxu1 }
 0x592   : >> { %v3130_v63 = vpop.f32.mrb[133].mxu1  ;;  %v3057_v59 = vpop.f32.mrb[134].mxu0 }
 0x593   : >> { %4419 = vrcp.f32 %v3057_v59  ;;  %v3059_v16 = vpop.f32.mrb[135].mxu0 }
 0x594   : >> { %4421 = vrcp.f32 %v3059_v16 }
 0x595   : >> { %v3134_v36 = vpop.f32.mrb[134].mxu1 }
 0x596   : >> { %4423 = vrcp.f32 %v3134_v36  ;;  %v3136_v18 = vpop.f32.mrb[135].mxu1 }
 0x597   : >> { %4425 = vrcp.f32 %v3136_v18  ;;  %v5485_v18 = vmov %v3203_v58 }
 0x59d   : >> { %v4420_v60 = vpop.eup %4419 }
 0x59e   : >> { %v4422_v15 = vpop.eup %4421  ;;  %v3174_v41 = vrot.slane %v4420_v60, %v4887_v31 }
 0x59f   : >> { %v3178_v12 = vrot.slane %v4422_v15, %v4887_v31  ;;  %v5484_v15 = vmov %v3204_v42 }
 0x5a0   : >> { %v4424_v29 = vpop.eup %4423  ;;  %v3191_v0 = vmul.f32 %v3174_v41, %v3051_v27 }
 0x5a1   : >> { %v4426_v11 = vpop.eup %4425  ;;  %v3182_v2 = vrot.slane %v4424_v29, %v4887_v31  ;;  %v3192_v39 = vmul.f32 %v3178_v12, %v3053_v30  ;;  %v5483_v12 = vmov %v3205_v55 }
 0x5a2   : >> { %v3186_v32 = vrot.slane %v4426_v11, %v4887_v31  ;;  %v3199_v56 = vmul.f32 %v3191_v0, %v4890_v34  ;;  %v5482_v11 = vmov %v3206_v5 }
 0x5a3   : >> { %v3193_v25 = vmul.f32 %v3182_v2, %v3128_v19  ;;  %v3200_v53 = vmul.f32 %v3192_v39, %v4892_v35 }
 0x5a4   : >> { %v3194_v38 = vmul.f32 %v3186_v32, %v3130_v63  ;;  %v3207_v13 = vadd.f32 %v4541_v10, %v3199_v56   ;;  %496 = sbr.rel (!%p494_p11) target bundleno = 307 (0x133), region = 75 }
 0x5a5   : >> { %v3201_v37 = vmul.f32 %v3193_v25, %v4890_v34  ;;  %v3208_v33 = vadd.f32 %v4537_v7, %v3200_v53  }
 0x5a6   : >> { %v3202_v40 = vmul.f32 %v3194_v38, %v4892_v35  ;;  %v5481_v10 = vmov %v3207_v13  ;;  %3215 = vst [vmem:[%s4838_s6 + $0x20] sm:$0xff] (%p494_p11), %v3207_v13 }
 0x5a7   : >> { %v3209_v8 = vadd.f32 %v4533_v4, %v3201_v37   ;;  %v5480_v7 = vmov %v3208_v33  ;;  %3216 = vst [vmem:[%s4838_s6 + $0x28] sm:$0xff] (%p494_p11), %v3208_v33 }
 0x5a8   : >> { %v3210_v23 = vadd.f32 %v4529_v3, %v3202_v40  }
 0x5a9   : >> { %v5479_v4 = vmov %v3209_v8  ;;  %3217 = vst [vmem:[%s4838_s6 + $0x30] sm:$0xff] (%p494_p11), %v3209_v8 }
 0x5aa   : >> { %v5478_v3 = vmov %v3210_v23  ;;  %3218 = vst [vmem:[%s4838_s6 + $0x38] sm:$0xff] (%p494_p11), %v3210_v23 }
 0x5ab   : > { %4440 = shalt.err (!%p4437_p4)
}
 0x5ac   : > { %s4441_s24 = scalar_lea.hbm %s5396_s26, 1024  ;;  %s4445_s8 = scalar_lea.hbm %s5447_s3, 2048 }
 0x5ad   : > { %p4442_p7 = scmp.ne.s32.totalorder %s5396_s26, %s4441_s24  ;;  %p4446_p10 = scmp.lt.u32.totalorder %s5396_s26, %s5447_s3 }
 0x5ae   : > { %p4447_p11 = scmp.lt.u32.totalorder %s4445_s8, %s4441_s24  ;;  %p4449_p13 = scmp.lt.u32.totalorder %s4441_s24, %s5396_s26 }
 0x5af   : > { %p4443_p8 = pnand %p4442_p7, %p4628_p5 }
 0x5b0   : > { %p4448_p12 = por %p4447_p11, %p4446_p10 }
 0x5b1   : > { %p4444_p9 = pneg %p4443_p8 }
 0x5b2   : > { %p4450_p0 = por %p4449_p13, %p4448_p12 }
 0x5b4   : > { %p4451_p1 = pnand %p4450_p0, %p4444_p9 }
 0x5b6   : > { %4454 = shalt.err (!%p4451_p1)
}
 0x5b7   : > { %s4568_s10 = smov 256   ;;  %s4569_s7 = smov 16  }
 0x5b8   : > { %3756 = dma.vmem_to_hbm [thread:$0]  (%p4628_p5), %s5399_s27, 1024, %s5396_s26, %s5403_s28, %s4568_s10, %s4568_s10, %s4569_s7  }
 0x5b9 PF: > { %p3762_p2 = scmp.ge.s32.totalorder %s4525_s15, 2  ;;  %s3248_s11 = sand.u32 1, %s4513_s12  }
 0x5ba   : > { %s3249_s17 = scalar_lea.sflag [#allocation4], %s3248_s11 }
 0x5bb   : > { %p3759_p3 = pnand %p3762_p2, %p4632_p6 }
 0x5bd   : > { %4508 = dma.done.wait (!%p3759_p3), %s3249_s17, 1024  }
 0x5be   : > { %4510 = vsyncadd (!%p3759_p3), %s3249_s17, 4294966272  ;;  %p13_p4 = scmp.ge.s32.totalorder %s4615_s18, 4   ;;  %s5486_s12 = smov %s4517_s13 }
 0x5bf   : > { %s5487_s13 = smov %s4521_s14  ;;  %s5488_s14 = smov %s4626_s21 }
 0x5c0   : > { %s5489_s15 = smov %s4615_s18  ;;  %15 = sbr.rel (!%p13_p4) target bundleno = 3 (0x3), region = 86 }
 0x5c7   :  { %3254 = vsyncpa [#allocation4], 1 }
 0x5c8   :  { %3256 = vsyncpa [#allocation4 + $0x1], 1 }

</bundles_post_ra>
